<compile_context>
chip_gen: v5e
topology: v5e:2x2
jax: 0.10.0
libtpu: 0.0.40
codegen_flags: <defaults>
</compile_context>

<pallas_src>
import functools
import math

import jax
import jax.numpy as jnp
from jax.experimental import pallas as pl
from jax.experimental.pallas import tpu as pltpu


# ----------------------------- in-kernel MAB block -----------------------------

def _mab_block(q_proj, xk, wkv, bkv, wo, bo, *, num_heads, dim_V):
    """One MAB, batched over the batch block.

    q_proj: (Bb, nq, dim_V)  -- already through fc_q (unscaled).
    xk:     (Bb, nk, dim_K)
    wkv:    (dim_K, 2*dim_V), bkv: (1, 2*dim_V)   -- fused fc_k | fc_v
    wo:     (dim_V, dim_V),   bo:  (1, dim_V)
    returns (Bb, nq, dim_V)
    """
    Bb, nq, _ = q_proj.shape
    nk, dim_K = xk.shape[1], xk.shape[2]
    ds = dim_V // num_heads
    scale = 1.0 / math.sqrt(dim_V)   # PyTorch MAB scales by sqrt(dim_V), not sqrt(head_dim)

    # Fused K/V projection: one (Bb*nk, dim_K) @ (dim_K, 2*dim_V) MXU matmul.
    kv = jnp.dot(xk.reshape(Bb * nk, dim_K), wkv,
                 preferred_element_type=jnp.float32) + bkv
    kv = kv.reshape(Bb, nk, 2 * dim_V)

    # Scale applied once to a score-only copy of Q (residual uses unscaled q_proj).
    qs = q_proj * scale

    head_outs = []
    for h in range(num_heads):                       # static unrolled; batched over Bb
        qh = qs[:, :, h * ds:(h + 1) * ds]                       # (Bb, nq, ds)
        kh = kv[:, :, h * ds:(h + 1) * ds]                       # (Bb, nk, ds)
        vh = kv[:, :, dim_V + h * ds: dim_V + (h + 1) * ds]      # (Bb, nk, ds)
        s = jnp.einsum("bqd,bkd->bqk", qh, kh,
                       preferred_element_type=jnp.float32)       # (Bb, nq, nk)
        s = s - jnp.max(s, axis=-1, keepdims=True)
        p = jnp.exp(s)
        a = p * pl.reciprocal(jnp.sum(p, axis=-1, keepdims=True), approx=True)
        head_outs.append(jnp.einsum("bqk,bkd->bqd", a, vh,
                                    preferred_element_type=jnp.float32))

    o = q_proj + jnp.concatenate(head_outs, axis=-1)             # (Bb, nq, dim_V)

    # O = O + relu(fc_o(O))
    o2 = o.reshape(Bb * nq, dim_V)
    ff = jnp.maximum(jnp.dot(o2, wo, preferred_element_type=jnp.float32) + bo, 0.0)
    return (o2 + ff).reshape(Bb, nq, dim_V)


# ------------------------------ fused ISAB kernel ------------------------------

def isab_kernel(i_ref, x_ref,
                wq0_ref, bq0_ref, wkv0_ref, bkv0_ref, wo0_ref, bo0_ref,
                wq1_ref, bq1_ref, wkv1_ref, bkv1_ref, wo1_ref, bo1_ref,
                o_ref, *, num_heads, dim_V):
    x = x_ref[...]                                   # (Bb, n, dim_in)
    Bb, n, dim_in = x.shape

    # ---- MAB0: H = MAB(I, X) ----------------------------------------------
    # fc_q(I) is batch-independent -> compute once, broadcast in VMEM only.
    q_i = jnp.dot(i_ref[0], wq0_ref[...],
                  preferred_element_type=jnp.float32) + bq0_ref[...]   # (m, dim_V)
    m = q_i.shape[0]
    q0 = jnp.broadcast_to(q_i[None, :, :], (Bb, m, dim_V))
    h = _mab_block(q0, x, wkv0_ref[...], bkv0_ref[...], wo0_ref[...], bo0_ref[...],
                   num_heads=num_heads, dim_V=dim_V)                    # (Bb, m, dim_V)

    # ---- MAB1: out = MAB(X, H) -- H stays on-chip, no HBM round trip --------
    q1 = (jnp.dot(x.reshape(Bb * n, dim_in), wq1_ref[...],
                  preferred_element_type=jnp.float32) + bq1_ref[...]
          ).reshape(Bb, n, dim_V)
    out = _mab_block(q1, h, wkv1_ref[...], bkv1_ref[...], wo1_ref[...], bo1_ref[...],
                     num_heads=num_heads, dim_V=dim_V)                  # (Bb, n, dim_V)

    o_ref[...] = out.astype(o_ref.dtype)


def isab_pallas(params, X, num_heads, block_b=8):
    """ISAB forward: X (B, n, dim_in) -> (B, n, dim_out), one fused Pallas call."""
    B, n, dim_in = X.shape
    I = params["I"]                                  # (1, m, dim_out)
    dim_V = I.shape[2]
    p0, p1 = params["mab0"], params["mab1"]

    # Fuse fc_k / fc_v weights into one projection per MAB.
    wkv0 = jnp.concatenate([p0["wk"], p0["wv"]], axis=1)
    bkv0 = jnp.concatenate([p0["bk"], p0["bv"]], axis=1)
    wkv1 = jnp.concatenate([p1["wk"], p1["wv"]], axis=1)
    bkv1 = jnp.concatenate([p1["bk"], p1["bv"]], axis=1)

    Bb = min(block_b, B)
    grid = (pl.cdiv(B, Bb),)

    kernel = functools.partial(isab_kernel, num_heads=num_heads, dim_V=dim_V)

    def const(shape):
        # Whole-array block, same for every grid step -> stays resident in VMEM.
        return pl.BlockSpec(shape, lambda b, _s=len(shape): (0,) * _s)

    return pl.pallas_call(
        kernel,
        out_shape=jax.ShapeDtypeStruct((B, n, dim_V), X.dtype),
        grid=grid,
        in_specs=[
            const(I.shape),                                      # inducing points
            pl.BlockSpec((Bb, n, dim_in), lambda b: (b, 0, 0)),  # X batch block
            const(p0["wq"].shape), const(p0["bq"].shape),
            const(wkv0.shape), const(bkv0.shape),
            const(p0["wo"].shape), const(p0["bo"].shape),
            const(p1["wq"].shape), const(p1["bq"].shape),
            const(wkv1.shape), const(bkv1.shape),
            const(p1["wo"].shape), const(p1["bo"].shape),
        ],
        out_specs=pl.BlockSpec((Bb, n, dim_V), lambda b: (b, 0, 0)),
        compiler_params=pltpu.CompilerParams(
            dimension_semantics=("parallel",)),
    )(I, X,
      p0["wq"], p0["bq"], wkv0, bkv0, p0["wo"], p0["bo"],
      p1["wq"], p1["bq"], wkv1, bkv1, p1["wo"], p1["bo"])


# ---------------- parameter construction (deterministic, in-script) ----------------

def _linear_params(key, fan_in, fan_out, dtype=jnp.float32):
    k1, k2 = jax.random.split(key)
    bound = 1.0 / math.sqrt(fan_in)
    w = jax.random.uniform(k1, (fan_in, fan_out), dtype, -bound, bound)
    b = jax.random.uniform(k2, (1, fan_out), dtype, -bound, bound)
    return w, b


def make_mab_params(key, dim_Q, dim_K, dim_V):
    ks = jax.random.split(key, 4)
    wq, bq = _linear_params(ks[0], dim_Q, dim_V)
    wk, bk = _linear_params(ks[1], dim_K, dim_V)
    wv, bv = _linear_params(ks[2], dim_K, dim_V)
    wo, bo = _linear_params(ks[3], dim_V, dim_V)
    return dict(wq=wq, bq=bq, wk=wk, bk=bk, wv=wv, bv=bv, wo=wo, bo=bo)


def make_isab_params(key, dim_in, dim_out, m):
    k_i, k0, k1 = jax.random.split(key, 3)
    bound = math.sqrt(6.0 / (m + dim_out))           # xavier_uniform on (1, m, dim_out)
    I = jax.random.uniform(k_i, (1, m, dim_out), jnp.float32, -bound, bound)
    mab0 = make_mab_params(k0, dim_out, dim_in, dim_out)   # MAB(dim_out, dim_in, dim_out)
    mab1 = make_mab_params(k1, dim_in, dim_out, dim_out)   # MAB(dim_in, dim_out, dim_out)
    return dict(I=I, mab0=mab0, mab1=mab1)


# ---------------- pure-JAX reference (mirrors the PyTorch module) ----------------

def _mab_ref(xq, xk, p, num_heads):
    dim_V = p["wq"].shape[1]
    Q = xq @ p["wq"] + p["bq"]
    K = xk @ p["wk"] + p["bk"]
    V = xk @ p["wv"] + p["bv"]
    Q_ = jnp.concatenate(jnp.split(Q, num_heads, axis=2), axis=0)
    K_ = jnp.concatenate(jnp.split(K, num_heads, axis=2), axis=0)
    V_ = jnp.concatenate(jnp.split(V, num_heads, axis=2), axis=0)
    A = jax.nn.softmax(jnp.einsum("bqd,bkd->bqk", Q_, K_) / math.sqrt(dim_V), axis=2)
    O = Q_ + jnp.einsum("bqk,bkd->bqd", A, V_)
    O = jnp.concatenate(jnp.split(O, num_heads, axis=0), axis=2)
    O = O + jax.nn.relu(O @ p["wo"] + p["bo"])
    return O


def _isab_ref(params, X, num_heads):
    B = X.shape[0]
    I_rep = jnp.broadcast_to(params["I"], (B,) + params["I"].shape[1:])
    H = _mab_ref(I_rep, X, params["mab0"], num_heads)
    return _mab_ref(X, H, params["mab1"], num_heads)


if __name__ == "__main__":
    B, n, dim_in, dim_out, num_heads, m = 8, 16, 32, 32, 4, 8

    key = jax.random.PRNGKey(0)
    k_params, k_x = jax.random.split(key)
    params = make_isab_params(k_params, dim_in, dim_out, m)
    X = jax.random.normal(k_x, (B, n, dim_in), jnp.float32)

    out = isab_pallas(params, X, num_heads, block_b=4)   # grid of 2 batch blocks
    out = jax.block_until_ready(out)

    ref = _isab_ref(params, X, num_heads)
    assert out.shape == (B, n, dim_out)
    # Tolerance 5e-3 (not 1e-4) only because the softmax denominator uses the EUP
    # approximate reciprocal (pl.reciprocal(approx=True)); all other math is exact f32.
    assert jnp.allclose(out, ref, atol=5e-3, rtol=5e-3), "Pallas ISAB mismatch vs reference"

    print("KERNEL_OK")
</pallas_src>

<mosaic_0001>
module attributes {stable_mosaic.version = 11 : i64} {
  func.func @isab_kernel(%arg0: i32, %arg1: memref<1x8x32xf32, #tpu.memory_space<vmem>>, %arg2: memref<4x16x32xf32, #tpu.memory_space<vmem>>, %arg3: memref<32x32xf32, #tpu.memory_space<vmem>>, %arg4: memref<1x32xf32, #tpu.memory_space<vmem>>, %arg5: memref<32x64xf32, #tpu.memory_space<vmem>>, %arg6: memref<1x64xf32, #tpu.memory_space<vmem>>, %arg7: memref<32x32xf32, #tpu.memory_space<vmem>>, %arg8: memref<1x32xf32, #tpu.memory_space<vmem>>, %arg9: memref<32x32xf32, #tpu.memory_space<vmem>>, %arg10: memref<1x32xf32, #tpu.memory_space<vmem>>, %arg11: memref<32x64xf32, #tpu.memory_space<vmem>>, %arg12: memref<1x64xf32, #tpu.memory_space<vmem>>, %arg13: memref<32x32xf32, #tpu.memory_space<vmem>>, %arg14: memref<1x32xf32, #tpu.memory_space<vmem>>, %arg15: memref<4x16x32xf32, #tpu.memory_space<vmem>>) attributes {dimension_semantics = [#tpu.dimension_semantics<parallel>], iteration_bounds = array<i64: 2>, scalar_prefetch = 0 : i64, scratch_operands = 0 : i64, tpu.core_type = #tpu.core_type<tc>, window_params = [{pipeline_mode = #tpu.pipeline_mode<synchronous>, transform_indices = @transform_0, window_bounds = array<i64: 1, 8, 32>}, {transform_indices = @transform_1, window_bounds = array<i64: 4, 16, 32>}, {pipeline_mode = #tpu.pipeline_mode<synchronous>, transform_indices = @transform_2, window_bounds = array<i64: 32, 32>}, {pipeline_mode = #tpu.pipeline_mode<synchronous>, transform_indices = @transform_3, window_bounds = array<i64: 1, 32>}, {pipeline_mode = #tpu.pipeline_mode<synchronous>, transform_indices = @transform_4, window_bounds = array<i64: 32, 64>}, {pipeline_mode = #tpu.pipeline_mode<synchronous>, transform_indices = @transform_5, window_bounds = array<i64: 1, 64>}, {pipeline_mode = #tpu.pipeline_mode<synchronous>, transform_indices = @transform_6, window_bounds = array<i64: 32, 32>}, {pipeline_mode = #tpu.pipeline_mode<synchronous>, transform_indices = @transform_7, window_bounds = array<i64: 1, 32>}, {pipeline_mode = #tpu.pipeline_mode<synchronous>, transform_indices = @transform_8, window_bounds = array<i64: 32, 32>}, {pipeline_mode = #tpu.pipeline_mode<synchronous>, transform_indices = @transform_9, window_bounds = array<i64: 1, 32>}, {pipeline_mode = #tpu.pipeline_mode<synchronous>, transform_indices = @transform_10, window_bounds = array<i64: 32, 64>}, {pipeline_mode = #tpu.pipeline_mode<synchronous>, transform_indices = @transform_11, window_bounds = array<i64: 1, 64>}, {pipeline_mode = #tpu.pipeline_mode<synchronous>, transform_indices = @transform_12, window_bounds = array<i64: 32, 32>}, {pipeline_mode = #tpu.pipeline_mode<synchronous>, transform_indices = @transform_13, window_bounds = array<i64: 1, 32>}, {transform_indices = @transform_14, window_bounds = array<i64: 4, 16, 32>}]} {
    %c0 = arith.constant 0 : index
    %c0_0 = arith.constant 0 : index
    %c0_1 = arith.constant 0 : index
    %0 = vector.load %arg2[%c0, %c0_0, %c0_1] : memref<4x16x32xf32, #tpu.memory_space<vmem>>, vector<4x16x32xf32>
    %c0_2 = arith.constant 0 : index
    %c0_3 = arith.constant 0 : index
    %c0_4 = arith.constant 0 : index
    %1 = vector.load %arg1[%c0_2, %c0_3, %c0_4] : memref<1x8x32xf32, #tpu.memory_space<vmem>>, vector<1x8x32xf32>
    %2 = vector.shape_cast %1 : vector<1x8x32xf32> to vector<8x32xf32>
    %c0_5 = arith.constant 0 : index
    %c0_6 = arith.constant 0 : index
    %3 = vector.load %arg3[%c0_5, %c0_6] : memref<32x32xf32, #tpu.memory_space<vmem>>, vector<32x32xf32>
    %cst = arith.constant dense<0.000000e+00> : vector<8x32xf32>
    %4 = tpu.matmul %2, %3, %cst {dimension_numbers = #tpu.dot_dimension_numbers<[1], [0], [0], [1], [0, 0, 1, 1], [], []>} : vector<8x32xf32>, vector<32x32xf32>, vector<8x32xf32> -> vector<8x32xf32>
    %c0_7 = arith.constant 0 : index
    %c0_8 = arith.constant 0 : index
    %5 = vector.load %arg4[%c0_7, %c0_8] : memref<1x32xf32, #tpu.memory_space<vmem>>, vector<1x32xf32>
    %6 = vector.broadcast %5 : vector<1x32xf32> to vector<8x32xf32>
    %7 = arith.addf %4, %6 : vector<8x32xf32>
    %8 = vector.shape_cast %7 : vector<8x32xf32> to vector<1x8x32xf32>
    %9 = vector.shape_cast %8 : vector<1x8x32xf32> to vector<1x8x32xf32>
    %10 = vector.broadcast %9 : vector<1x8x32xf32> to vector<4x8x32xf32>
    %c0_9 = arith.constant 0 : index
    %c0_10 = arith.constant 0 : index
    %11 = vector.load %arg5[%c0_9, %c0_10] : memref<32x64xf32, #tpu.memory_space<vmem>>, vector<32x64xf32>
    %c0_11 = arith.constant 0 : index
    %c0_12 = arith.constant 0 : index
    %12 = vector.load %arg6[%c0_11, %c0_12] : memref<1x64xf32, #tpu.memory_space<vmem>>, vector<1x64xf32>
    %c0_13 = arith.constant 0 : index
    %c0_14 = arith.constant 0 : index
    %13 = vector.load %arg7[%c0_13, %c0_14] : memref<32x32xf32, #tpu.memory_space<vmem>>, vector<32x32xf32>
    %c0_15 = arith.constant 0 : index
    %c0_16 = arith.constant 0 : index
    %14 = vector.load %arg8[%c0_15, %c0_16] : memref<1x32xf32, #tpu.memory_space<vmem>>, vector<1x32xf32>
    %15 = vector.shape_cast %0 : vector<4x16x32xf32> to vector<64x32xf32>
    %cst_17 = arith.constant dense<0.000000e+00> : vector<64x64xf32>
    %16 = tpu.matmul %15, %11, %cst_17 {dimension_numbers = #tpu.dot_dimension_numbers<[1], [0], [0], [1], [0, 0, 1, 1], [], []>} : vector<64x32xf32>, vector<32x64xf32>, vector<64x64xf32> -> vector<64x64xf32>
    %17 = vector.broadcast %12 : vector<1x64xf32> to vector<64x64xf32>
    %18 = arith.addf %16, %17 : vector<64x64xf32>
    %19 = vector.shape_cast %18 : vector<64x64xf32> to vector<4x16x64xf32>
    %cst_18 = arith.constant 0.176776692 : f32
    %20 = vector.broadcast %cst_18 : f32 to vector<4x8x32xf32>
    %21 = arith.mulf %10, %20 : vector<4x8x32xf32>
    %22 = vector.extract_strided_slice %21 {offsets = [0, 0, 0], sizes = [4, 8, 8], strides = [1, 1, 1]} : vector<4x8x32xf32> to vector<4x8x8xf32>
    %23 = vector.extract_strided_slice %19 {offsets = [0, 0, 0], sizes = [4, 16, 8], strides = [1, 1, 1]} : vector<4x16x64xf32> to vector<4x16x8xf32>
    %24 = vector.extract_strided_slice %19 {offsets = [0, 0, 32], sizes = [4, 16, 8], strides = [1, 1, 1]} : vector<4x16x64xf32> to vector<4x16x8xf32>
    "tpu.trace_start"() <{level = 10 : i32, message = "bqd,bkd->bqk"}> : () -> ()
    %cst_19 = arith.constant dense<0.000000e+00> : vector<4x8x16xf32>
    %25 = tpu.matmul %22, %23, %cst_19 {dimension_numbers = #tpu.dot_dimension_numbers<[2], [2], [1], [1], [0, 0, 0, 1, 1, 1], [0], [0]>} : vector<4x8x8xf32>, vector<4x16x8xf32>, vector<4x8x16xf32> -> vector<4x8x16xf32>
    "tpu.trace_stop"() : () -> ()
    %cst_20 = arith.constant dense<0xFF800000> : vector<4x8xf32>
    %26 = vector.multi_reduction <maximumf>, %25, %cst_20 [2] : vector<4x8x16xf32> to vector<4x8xf32>
    %27 = vector.shape_cast %26 : vector<4x8xf32> to vector<4x8x1xf32>
    %28 = vector.broadcast %27 : vector<4x8x1xf32> to vector<4x8x16xf32>
    %29 = arith.subf %25, %28 : vector<4x8x16xf32>
    %30 = math.exp %29 : vector<4x8x16xf32>
    %cst_21 = arith.constant dense<0.000000e+00> : vector<4x8xf32>
    %31 = vector.multi_reduction <add>, %30, %cst_21 [2] : vector<4x8x16xf32> to vector<4x8xf32>
    %32 = vector.shape_cast %31 : vector<4x8xf32> to vector<4x8x1xf32>
    %33 = tpu.reciprocal %32 {approx = true} : vector<4x8x1xf32> -> vector<4x8x1xf32>
    %34 = vector.broadcast %33 : vector<4x8x1xf32> to vector<4x8x16xf32>
    %35 = arith.mulf %30, %34 : vector<4x8x16xf32>
    "tpu.trace_start"() <{level = 10 : i32, message = "bqk,bkd->bqd"}> : () -> ()
    %cst_22 = arith.constant dense<0.000000e+00> : vector<4x8x8xf32>
    %36 = tpu.matmul %35, %24, %cst_22 {dimension_numbers = #tpu.dot_dimension_numbers<[2], [1], [1], [2], [0, 0, 0, 1, 1, 2], [0], [0]>} : vector<4x8x16xf32>, vector<4x16x8xf32>, vector<4x8x8xf32> -> vector<4x8x8xf32>
    "tpu.trace_stop"() : () -> ()
    %37 = vector.extract_strided_slice %21 {offsets = [0, 0, 8], sizes = [4, 8, 8], strides = [1, 1, 1]} : vector<4x8x32xf32> to vector<4x8x8xf32>
    %38 = vector.extract_strided_slice %19 {offsets = [0, 0, 8], sizes = [4, 16, 8], strides = [1, 1, 1]} : vector<4x16x64xf32> to vector<4x16x8xf32>
    %39 = vector.extract_strided_slice %19 {offsets = [0, 0, 40], sizes = [4, 16, 8], strides = [1, 1, 1]} : vector<4x16x64xf32> to vector<4x16x8xf32>
    "tpu.trace_start"() <{level = 10 : i32, message = "bqd,bkd->bqk"}> : () -> ()
    %cst_23 = arith.constant dense<0.000000e+00> : vector<4x8x16xf32>
    %40 = tpu.matmul %37, %38, %cst_23 {dimension_numbers = #tpu.dot_dimension_numbers<[2], [2], [1], [1], [0, 0, 0, 1, 1, 1], [0], [0]>} : vector<4x8x8xf32>, vector<4x16x8xf32>, vector<4x8x16xf32> -> vector<4x8x16xf32>
    "tpu.trace_stop"() : () -> ()
    %cst_24 = arith.constant dense<0xFF800000> : vector<4x8xf32>
    %41 = vector.multi_reduction <maximumf>, %40, %cst_24 [2] : vector<4x8x16xf32> to vector<4x8xf32>
    %42 = vector.shape_cast %41 : vector<4x8xf32> to vector<4x8x1xf32>
    %43 = vector.broadcast %42 : vector<4x8x1xf32> to vector<4x8x16xf32>
    %44 = arith.subf %40, %43 : vector<4x8x16xf32>
    %45 = math.exp %44 : vector<4x8x16xf32>
    %cst_25 = arith.constant dense<0.000000e+00> : vector<4x8xf32>
    %46 = vector.multi_reduction <add>, %45, %cst_25 [2] : vector<4x8x16xf32> to vector<4x8xf32>
    %47 = vector.shape_cast %46 : vector<4x8xf32> to vector<4x8x1xf32>
    %48 = tpu.reciprocal %47 {approx = true} : vector<4x8x1xf32> -> vector<4x8x1xf32>
    %49 = vector.broadcast %48 : vector<4x8x1xf32> to vector<4x8x16xf32>
    %50 = arith.mulf %45, %49 : vector<4x8x16xf32>
    "tpu.trace_start"() <{level = 10 : i32, message = "bqk,bkd->bqd"}> : () -> ()
    %cst_26 = arith.constant dense<0.000000e+00> : vector<4x8x8xf32>
    %51 = tpu.matmul %50, %39, %cst_26 {dimension_numbers = #tpu.dot_dimension_numbers<[2], [1], [1], [2], [0, 0, 0, 1, 1, 2], [0], [0]>} : vector<4x8x16xf32>, vector<4x16x8xf32>, vector<4x8x8xf32> -> vector<4x8x8xf32>
    "tpu.trace_stop"() : () -> ()
    %52 = vector.extract_strided_slice %21 {offsets = [0, 0, 16], sizes = [4, 8, 8], strides = [1, 1, 1]} : vector<4x8x32xf32> to vector<4x8x8xf32>
    %53 = vector.extract_strided_slice %19 {offsets = [0, 0, 16], sizes = [4, 16, 8], strides = [1, 1, 1]} : vector<4x16x64xf32> to vector<4x16x8xf32>
    %54 = vector.extract_strided_slice %19 {offsets = [0, 0, 48], sizes = [4, 16, 8], strides = [1, 1, 1]} : vector<4x16x64xf32> to vector<4x16x8xf32>
    "tpu.trace_start"() <{level = 10 : i32, message = "bqd,bkd->bqk"}> : () -> ()
    %cst_27 = arith.constant dense<0.000000e+00> : vector<4x8x16xf32>
    %55 = tpu.matmul %52, %53, %cst_27 {dimension_numbers = #tpu.dot_dimension_numbers<[2], [2], [1], [1], [0, 0, 0, 1, 1, 1], [0], [0]>} : vector<4x8x8xf32>, vector<4x16x8xf32>, vector<4x8x16xf32> -> vector<4x8x16xf32>
    "tpu.trace_stop"() : () -> ()
    %cst_28 = arith.constant dense<0xFF800000> : vector<4x8xf32>
    %56 = vector.multi_reduction <maximumf>, %55, %cst_28 [2] : vector<4x8x16xf32> to vector<4x8xf32>
    %57 = vector.shape_cast %56 : vector<4x8xf32> to vector<4x8x1xf32>
    %58 = vector.broadcast %57 : vector<4x8x1xf32> to vector<4x8x16xf32>
    %59 = arith.subf %55, %58 : vector<4x8x16xf32>
    %60 = math.exp %59 : vector<4x8x16xf32>
    %cst_29 = arith.constant dense<0.000000e+00> : vector<4x8xf32>
    %61 = vector.multi_reduction <add>, %60, %cst_29 [2] : vector<4x8x16xf32> to vector<4x8xf32>
    %62 = vector.shape_cast %61 : vector<4x8xf32> to vector<4x8x1xf32>
    %63 = tpu.reciprocal %62 {approx = true} : vector<4x8x1xf32> -> vector<4x8x1xf32>
    %64 = vector.broadcast %63 : vector<4x8x1xf32> to vector<4x8x16xf32>
    %65 = arith.mulf %60, %64 : vector<4x8x16xf32>
    "tpu.trace_start"() <{level = 10 : i32, message = "bqk,bkd->bqd"}> : () -> ()
    %cst_30 = arith.constant dense<0.000000e+00> : vector<4x8x8xf32>
    %66 = tpu.matmul %65, %54, %cst_30 {dimension_numbers = #tpu.dot_dimension_numbers<[2], [1], [1], [2], [0, 0, 0, 1, 1, 2], [0], [0]>} : vector<4x8x16xf32>, vector<4x16x8xf32>, vector<4x8x8xf32> -> vector<4x8x8xf32>
    "tpu.trace_stop"() : () -> ()
    %67 = vector.extract_strided_slice %21 {offsets = [0, 0, 24], sizes = [4, 8, 8], strides = [1, 1, 1]} : vector<4x8x32xf32> to vector<4x8x8xf32>
    %68 = vector.extract_strided_slice %19 {offsets = [0, 0, 24], sizes = [4, 16, 8], strides = [1, 1, 1]} : vector<4x16x64xf32> to vector<4x16x8xf32>
    %69 = vector.extract_strided_slice %19 {offsets = [0, 0, 56], sizes = [4, 16, 8], strides = [1, 1, 1]} : vector<4x16x64xf32> to vector<4x16x8xf32>
    "tpu.trace_start"() <{level = 10 : i32, message = "bqd,bkd->bqk"}> : () -> ()
    %cst_31 = arith.constant dense<0.000000e+00> : vector<4x8x16xf32>
    %70 = tpu.matmul %67, %68, %cst_31 {dimension_numbers = #tpu.dot_dimension_numbers<[2], [2], [1], [1], [0, 0, 0, 1, 1, 1], [0], [0]>} : vector<4x8x8xf32>, vector<4x16x8xf32>, vector<4x8x16xf32> -> vector<4x8x16xf32>
    "tpu.trace_stop"() : () -> ()
    %cst_32 = arith.constant dense<0xFF800000> : vector<4x8xf32>
    %71 = vector.multi_reduction <maximumf>, %70, %cst_32 [2] : vector<4x8x16xf32> to vector<4x8xf32>
    %72 = vector.shape_cast %71 : vector<4x8xf32> to vector<4x8x1xf32>
    %73 = vector.broadcast %72 : vector<4x8x1xf32> to vector<4x8x16xf32>
    %74 = arith.subf %70, %73 : vector<4x8x16xf32>
    %75 = math.exp %74 : vector<4x8x16xf32>
    %cst_33 = arith.constant dense<0.000000e+00> : vector<4x8xf32>
    %76 = vector.multi_reduction <add>, %75, %cst_33 [2] : vector<4x8x16xf32> to vector<4x8xf32>
    %77 = vector.shape_cast %76 : vector<4x8xf32> to vector<4x8x1xf32>
    %78 = tpu.reciprocal %77 {approx = true} : vector<4x8x1xf32> -> vector<4x8x1xf32>
    %79 = vector.broadcast %78 : vector<4x8x1xf32> to vector<4x8x16xf32>
    %80 = arith.mulf %75, %79 : vector<4x8x16xf32>
    "tpu.trace_start"() <{level = 10 : i32, message = "bqk,bkd->bqd"}> : () -> ()
    %cst_34 = arith.constant dense<0.000000e+00> : vector<4x8x8xf32>
    %81 = tpu.matmul %80, %69, %cst_34 {dimension_numbers = #tpu.dot_dimension_numbers<[2], [1], [1], [2], [0, 0, 0, 1, 1, 2], [0], [0]>} : vector<4x8x16xf32>, vector<4x16x8xf32>, vector<4x8x8xf32> -> vector<4x8x8xf32>
    "tpu.trace_stop"() : () -> ()
    %82 = tpu.concatenate %36, %51, %66, %81 in 2 : vector<4x8x8xf32>, vector<4x8x8xf32>, vector<4x8x8xf32>, vector<4x8x8xf32> -> vector<4x8x32xf32>
    %83 = arith.addf %10, %82 : vector<4x8x32xf32>
    %84 = vector.shape_cast %83 : vector<4x8x32xf32> to vector<32x32xf32>
    %cst_35 = arith.constant dense<0.000000e+00> : vector<32x32xf32>
    %85 = tpu.matmul %84, %13, %cst_35 {dimension_numbers = #tpu.dot_dimension_numbers<[1], [0], [0], [1], [0, 0, 1, 1], [], []>} : vector<32x32xf32>, vector<32x32xf32>, vector<32x32xf32> -> vector<32x32xf32>
    %86 = vector.broadcast %14 : vector<1x32xf32> to vector<32x32xf32>
    %87 = arith.addf %85, %86 : vector<32x32xf32>
    %cst_36 = arith.constant 0.000000e+00 : f32
    %88 = vector.broadcast %cst_36 : f32 to vector<32x32xf32>
    %89 = arith.maximumf %87, %88 : vector<32x32xf32>
    %90 = arith.addf %84, %89 : vector<32x32xf32>
    %91 = vector.shape_cast %90 : vector<32x32xf32> to vector<4x8x32xf32>
    %92 = vector.shape_cast %0 : vector<4x16x32xf32> to vector<64x32xf32>
    %c0_37 = arith.constant 0 : index
    %c0_38 = arith.constant 0 : index
    %93 = vector.load %arg9[%c0_37, %c0_38] : memref<32x32xf32, #tpu.memory_space<vmem>>, vector<32x32xf32>
    %cst_39 = arith.constant dense<0.000000e+00> : vector<64x32xf32>
    %94 = tpu.matmul %92, %93, %cst_39 {dimension_numbers = #tpu.dot_dimension_numbers<[1], [0], [0], [1], [0, 0, 1, 1], [], []>} : vector<64x32xf32>, vector<32x32xf32>, vector<64x32xf32> -> vector<64x32xf32>
    %c0_40 = arith.constant 0 : index
    %c0_41 = arith.constant 0 : index
    %95 = vector.load %arg10[%c0_40, %c0_41] : memref<1x32xf32, #tpu.memory_space<vmem>>, vector<1x32xf32>
    %96 = vector.broadcast %95 : vector<1x32xf32> to vector<64x32xf32>
    %97 = arith.addf %94, %96 : vector<64x32xf32>
    %98 = vector.shape_cast %97 : vector<64x32xf32> to vector<4x16x32xf32>
    %c0_42 = arith.constant 0 : index
    %c0_43 = arith.constant 0 : index
    %99 = vector.load %arg11[%c0_42, %c0_43] : memref<32x64xf32, #tpu.memory_space<vmem>>, vector<32x64xf32>
    %c0_44 = arith.constant 0 : index
    %c0_45 = arith.constant 0 : index
    %100 = vector.load %arg12[%c0_44, %c0_45] : memref<1x64xf32, #tpu.memory_space<vmem>>, vector<1x64xf32>
    %c0_46 = arith.constant 0 : index
    %c0_47 = arith.constant 0 : index
    %101 = vector.load %arg13[%c0_46, %c0_47] : memref<32x32xf32, #tpu.memory_space<vmem>>, vector<32x32xf32>
    %c0_48 = arith.constant 0 : index
    %c0_49 = arith.constant 0 : index
    %102 = vector.load %arg14[%c0_48, %c0_49] : memref<1x32xf32, #tpu.memory_space<vmem>>, vector<1x32xf32>
    %103 = vector.shape_cast %91 : vector<4x8x32xf32> to vector<32x32xf32>
    %cst_50 = arith.constant dense<0.000000e+00> : vector<32x64xf32>
    %104 = tpu.matmul %103, %99, %cst_50 {dimension_numbers = #tpu.dot_dimension_numbers<[1], [0], [0], [1], [0, 0, 1, 1], [], []>} : vector<32x32xf32>, vector<32x64xf32>, vector<32x64xf32> -> vector<32x64xf32>
    %105 = vector.broadcast %100 : vector<1x64xf32> to vector<32x64xf32>
    %106 = arith.addf %104, %105 : vector<32x64xf32>
    %107 = vector.shape_cast %106 : vector<32x64xf32> to vector<4x8x64xf32>
    %cst_51 = arith.constant 0.176776692 : f32
    %108 = vector.broadcast %cst_51 : f32 to vector<4x16x32xf32>
    %109 = arith.mulf %98, %108 : vector<4x16x32xf32>
    %110 = vector.extract_strided_slice %109 {offsets = [0, 0, 0], sizes = [4, 16, 8], strides = [1, 1, 1]} : vector<4x16x32xf32> to vector<4x16x8xf32>
    %111 = vector.extract_strided_slice %107 {offsets = [0, 0, 0], sizes = [4, 8, 8], strides = [1, 1, 1]} : vector<4x8x64xf32> to vector<4x8x8xf32>
    %112 = vector.extract_strided_slice %107 {offsets = [0, 0, 32], sizes = [4, 8, 8], strides = [1, 1, 1]} : vector<4x8x64xf32> to vector<4x8x8xf32>
    "tpu.trace_start"() <{level = 10 : i32, message = "bqd,bkd->bqk"}> : () -> ()
    %cst_52 = arith.constant dense<0.000000e+00> : vector<4x16x8xf32>
    %113 = tpu.matmul %110, %111, %cst_52 {dimension_numbers = #tpu.dot_dimension_numbers<[2], [2], [1], [1], [0, 0, 0, 1, 1, 1], [0], [0]>} : vector<4x16x8xf32>, vector<4x8x8xf32>, vector<4x16x8xf32> -> vector<4x16x8xf32>
    "tpu.trace_stop"() : () -> ()
    %cst_53 = arith.constant dense<0xFF800000> : vector<4x16xf32>
    %114 = vector.multi_reduction <maximumf>, %113, %cst_53 [2] : vector<4x16x8xf32> to vector<4x16xf32>
    %115 = vector.shape_cast %114 : vector<4x16xf32> to vector<4x16x1xf32>
    %116 = vector.broadcast %115 : vector<4x16x1xf32> to vector<4x16x8xf32>
    %117 = arith.subf %113, %116 : vector<4x16x8xf32>
    %118 = math.exp %117 : vector<4x16x8xf32>
    %cst_54 = arith.constant dense<0.000000e+00> : vector<4x16xf32>
    %119 = vector.multi_reduction <add>, %118, %cst_54 [2] : vector<4x16x8xf32> to vector<4x16xf32>
    %120 = vector.shape_cast %119 : vector<4x16xf32> to vector<4x16x1xf32>
    %121 = tpu.reciprocal %120 {approx = true} : vector<4x16x1xf32> -> vector<4x16x1xf32>
    %122 = vector.broadcast %121 : vector<4x16x1xf32> to vector<4x16x8xf32>
    %123 = arith.mulf %118, %122 : vector<4x16x8xf32>
    "tpu.trace_start"() <{level = 10 : i32, message = "bqk,bkd->bqd"}> : () -> ()
    %cst_55 = arith.constant dense<0.000000e+00> : vector<4x16x8xf32>
    %124 = tpu.matmul %123, %112, %cst_55 {dimension_numbers = #tpu.dot_dimension_numbers<[2], [1], [1], [2], [0, 0, 0, 1, 1, 2], [0], [0]>} : vector<4x16x8xf32>, vector<4x8x8xf32>, vector<4x16x8xf32> -> vector<4x16x8xf32>
    "tpu.trace_stop"() : () -> ()
    %125 = vector.extract_strided_slice %109 {offsets = [0, 0, 8], sizes = [4, 16, 8], strides = [1, 1, 1]} : vector<4x16x32xf32> to vector<4x16x8xf32>
    %126 = vector.extract_strided_slice %107 {offsets = [0, 0, 8], sizes = [4, 8, 8], strides = [1, 1, 1]} : vector<4x8x64xf32> to vector<4x8x8xf32>
    %127 = vector.extract_strided_slice %107 {offsets = [0, 0, 40], sizes = [4, 8, 8], strides = [1, 1, 1]} : vector<4x8x64xf32> to vector<4x8x8xf32>
    "tpu.trace_start"() <{level = 10 : i32, message = "bqd,bkd->bqk"}> : () -> ()
    %cst_56 = arith.constant dense<0.000000e+00> : vector<4x16x8xf32>
    %128 = tpu.matmul %125, %126, %cst_56 {dimension_numbers = #tpu.dot_dimension_numbers<[2], [2], [1], [1], [0, 0, 0, 1, 1, 1], [0], [0]>} : vector<4x16x8xf32>, vector<4x8x8xf32>, vector<4x16x8xf32> -> vector<4x16x8xf32>
    "tpu.trace_stop"() : () -> ()
    %cst_57 = arith.constant dense<0xFF800000> : vector<4x16xf32>
    %129 = vector.multi_reduction <maximumf>, %128, %cst_57 [2] : vector<4x16x8xf32> to vector<4x16xf32>
    %130 = vector.shape_cast %129 : vector<4x16xf32> to vector<4x16x1xf32>
    %131 = vector.broadcast %130 : vector<4x16x1xf32> to vector<4x16x8xf32>
    %132 = arith.subf %128, %131 : vector<4x16x8xf32>
    %133 = math.exp %132 : vector<4x16x8xf32>
    %cst_58 = arith.constant dense<0.000000e+00> : vector<4x16xf32>
    %134 = vector.multi_reduction <add>, %133, %cst_58 [2] : vector<4x16x8xf32> to vector<4x16xf32>
    %135 = vector.shape_cast %134 : vector<4x16xf32> to vector<4x16x1xf32>
    %136 = tpu.reciprocal %135 {approx = true} : vector<4x16x1xf32> -> vector<4x16x1xf32>
    %137 = vector.broadcast %136 : vector<4x16x1xf32> to vector<4x16x8xf32>
    %138 = arith.mulf %133, %137 : vector<4x16x8xf32>
    "tpu.trace_start"() <{level = 10 : i32, message = "bqk,bkd->bqd"}> : () -> ()
    %cst_59 = arith.constant dense<0.000000e+00> : vector<4x16x8xf32>
    %139 = tpu.matmul %138, %127, %cst_59 {dimension_numbers = #tpu.dot_dimension_numbers<[2], [1], [1], [2], [0, 0, 0, 1, 1, 2], [0], [0]>} : vector<4x16x8xf32>, vector<4x8x8xf32>, vector<4x16x8xf32> -> vector<4x16x8xf32>
    "tpu.trace_stop"() : () -> ()
    %140 = vector.extract_strided_slice %109 {offsets = [0, 0, 16], sizes = [4, 16, 8], strides = [1, 1, 1]} : vector<4x16x32xf32> to vector<4x16x8xf32>
    %141 = vector.extract_strided_slice %107 {offsets = [0, 0, 16], sizes = [4, 8, 8], strides = [1, 1, 1]} : vector<4x8x64xf32> to vector<4x8x8xf32>
    %142 = vector.extract_strided_slice %107 {offsets = [0, 0, 48], sizes = [4, 8, 8], strides = [1, 1, 1]} : vector<4x8x64xf32> to vector<4x8x8xf32>
    "tpu.trace_start"() <{level = 10 : i32, message = "bqd,bkd->bqk"}> : () -> ()
    %cst_60 = arith.constant dense<0.000000e+00> : vector<4x16x8xf32>
    %143 = tpu.matmul %140, %141, %cst_60 {dimension_numbers = #tpu.dot_dimension_numbers<[2], [2], [1], [1], [0, 0, 0, 1, 1, 1], [0], [0]>} : vector<4x16x8xf32>, vector<4x8x8xf32>, vector<4x16x8xf32> -> vector<4x16x8xf32>
    "tpu.trace_stop"() : () -> ()
    %cst_61 = arith.constant dense<0xFF800000> : vector<4x16xf32>
    %144 = vector.multi_reduction <maximumf>, %143, %cst_61 [2] : vector<4x16x8xf32> to vector<4x16xf32>
    %145 = vector.shape_cast %144 : vector<4x16xf32> to vector<4x16x1xf32>
    %146 = vector.broadcast %145 : vector<4x16x1xf32> to vector<4x16x8xf32>
    %147 = arith.subf %143, %146 : vector<4x16x8xf32>
    %148 = math.exp %147 : vector<4x16x8xf32>
    %cst_62 = arith.constant dense<0.000000e+00> : vector<4x16xf32>
    %149 = vector.multi_reduction <add>, %148, %cst_62 [2] : vector<4x16x8xf32> to vector<4x16xf32>
    %150 = vector.shape_cast %149 : vector<4x16xf32> to vector<4x16x1xf32>
    %151 = tpu.reciprocal %150 {approx = true} : vector<4x16x1xf32> -> vector<4x16x1xf32>
    %152 = vector.broadcast %151 : vector<4x16x1xf32> to vector<4x16x8xf32>
    %153 = arith.mulf %148, %152 : vector<4x16x8xf32>
    "tpu.trace_start"() <{level = 10 : i32, message = "bqk,bkd->bqd"}> : () -> ()
    %cst_63 = arith.constant dense<0.000000e+00> : vector<4x16x8xf32>
    %154 = tpu.matmul %153, %142, %cst_63 {dimension_numbers = #tpu.dot_dimension_numbers<[2], [1], [1], [2], [0, 0, 0, 1, 1, 2], [0], [0]>} : vector<4x16x8xf32>, vector<4x8x8xf32>, vector<4x16x8xf32> -> vector<4x16x8xf32>
    "tpu.trace_stop"() : () -> ()
    %155 = vector.extract_strided_slice %109 {offsets = [0, 0, 24], sizes = [4, 16, 8], strides = [1, 1, 1]} : vector<4x16x32xf32> to vector<4x16x8xf32>
    %156 = vector.extract_strided_slice %107 {offsets = [0, 0, 24], sizes = [4, 8, 8], strides = [1, 1, 1]} : vector<4x8x64xf32> to vector<4x8x8xf32>
    %157 = vector.extract_strided_slice %107 {offsets = [0, 0, 56], sizes = [4, 8, 8], strides = [1, 1, 1]} : vector<4x8x64xf32> to vector<4x8x8xf32>
    "tpu.trace_start"() <{level = 10 : i32, message = "bqd,bkd->bqk"}> : () -> ()
    %cst_64 = arith.constant dense<0.000000e+00> : vector<4x16x8xf32>
    %158 = tpu.matmul %155, %156, %cst_64 {dimension_numbers = #tpu.dot_dimension_numbers<[2], [2], [1], [1], [0, 0, 0, 1, 1, 1], [0], [0]>} : vector<4x16x8xf32>, vector<4x8x8xf32>, vector<4x16x8xf32> -> vector<4x16x8xf32>
    "tpu.trace_stop"() : () -> ()
    %cst_65 = arith.constant dense<0xFF800000> : vector<4x16xf32>
    %159 = vector.multi_reduction <maximumf>, %158, %cst_65 [2] : vector<4x16x8xf32> to vector<4x16xf32>
    %160 = vector.shape_cast %159 : vector<4x16xf32> to vector<4x16x1xf32>
    %161 = vector.broadcast %160 : vector<4x16x1xf32> to vector<4x16x8xf32>
    %162 = arith.subf %158, %161 : vector<4x16x8xf32>
    %163 = math.exp %162 : vector<4x16x8xf32>
    %cst_66 = arith.constant dense<0.000000e+00> : vector<4x16xf32>
    %164 = vector.multi_reduction <add>, %163, %cst_66 [2] : vector<4x16x8xf32> to vector<4x16xf32>
    %165 = vector.shape_cast %164 : vector<4x16xf32> to vector<4x16x1xf32>
    %166 = tpu.reciprocal %165 {approx = true} : vector<4x16x1xf32> -> vector<4x16x1xf32>
    %167 = vector.broadcast %166 : vector<4x16x1xf32> to vector<4x16x8xf32>
    %168 = arith.mulf %163, %167 : vector<4x16x8xf32>
    "tpu.trace_start"() <{level = 10 : i32, message = "bqk,bkd->bqd"}> : () -> ()
    %cst_67 = arith.constant dense<0.000000e+00> : vector<4x16x8xf32>
    %169 = tpu.matmul %168, %157, %cst_67 {dimension_numbers = #tpu.dot_dimension_numbers<[2], [1], [1], [2], [0, 0, 0, 1, 1, 2], [0], [0]>} : vector<4x16x8xf32>, vector<4x8x8xf32>, vector<4x16x8xf32> -> vector<4x16x8xf32>
    "tpu.trace_stop"() : () -> ()
    %170 = tpu.concatenate %124, %139, %154, %169 in 2 : vector<4x16x8xf32>, vector<4x16x8xf32>, vector<4x16x8xf32>, vector<4x16x8xf32> -> vector<4x16x32xf32>
    %171 = arith.addf %98, %170 : vector<4x16x32xf32>
    %172 = vector.shape_cast %171 : vector<4x16x32xf32> to vector<64x32xf32>
    %cst_68 = arith.constant dense<0.000000e+00> : vector<64x32xf32>
    %173 = tpu.matmul %172, %101, %cst_68 {dimension_numbers = #tpu.dot_dimension_numbers<[1], [0], [0], [1], [0, 0, 1, 1], [], []>} : vector<64x32xf32>, vector<32x32xf32>, vector<64x32xf32> -> vector<64x32xf32>
    %174 = vector.broadcast %102 : vector<1x32xf32> to vector<64x32xf32>
    %175 = arith.addf %173, %174 : vector<64x32xf32>
    %cst_69 = arith.constant 0.000000e+00 : f32
    %176 = vector.broadcast %cst_69 : f32 to vector<64x32xf32>
    %177 = arith.maximumf %175, %176 : vector<64x32xf32>
    %178 = arith.addf %172, %177 : vector<64x32xf32>
    %179 = vector.shape_cast %178 : vector<64x32xf32> to vector<4x16x32xf32>
    %c0_70 = arith.constant 0 : index
    %c0_71 = arith.constant 0 : index
    %c0_72 = arith.constant 0 : index
    %180 = vector.load %arg15[%c0_70, %c0_71, %c0_72] : memref<4x16x32xf32, #tpu.memory_space<vmem>>, vector<4x16x32xf32>
    tpu.vector_store %arg15[%c0_70, %c0_71, %c0_72], %179 {strides = array<i32>} : memref<4x16x32xf32, #tpu.memory_space<vmem>>, vector<4x16x32xf32>,
    return
  }
  func.func @transform_0(%arg0: i32) -> (i32, i32, i32) {
    %c0_i32 = arith.constant 0 : i32
    %c0_i32_0 = arith.constant 0 : i32
    %c0_i32_1 = arith.constant 0 : i32
    %c0_i32_2 = arith.constant 0 : i32
    return %c0_i32, %c0_i32_0, %c0_i32_1 : i32, i32, i32
  }
  func.func @transform_1(%arg0: i32) -> (i32, i32, i32) {
    %c0_i32 = arith.constant 0 : i32
    %c0_i32_0 = arith.constant 0 : i32
    %c0_i32_1 = arith.constant 0 : i32
    return %arg0, %c0_i32, %c0_i32_0 : i32, i32, i32
  }
  func.func @transform_2(%arg0: i32) -> (i32, i32) {
    %c0_i32 = arith.constant 0 : i32
    %c0_i32_0 = arith.constant 0 : i32
    %c0_i32_1 = arith.constant 0 : i32
    return %c0_i32, %c0_i32_0 : i32, i32
  }
  func.func @transform_3(%arg0: i32) -> (i32, i32) {
    %c0_i32 = arith.constant 0 : i32
    %c0_i32_0 = arith.constant 0 : i32
    %c0_i32_1 = arith.constant 0 : i32
    return %c0_i32, %c0_i32_0 : i32, i32
  }
  func.func @transform_4(%arg0: i32) -> (i32, i32) {
    %c0_i32 = arith.constant 0 : i32
    %c0_i32_0 = arith.constant 0 : i32
    %c0_i32_1 = arith.constant 0 : i32
    return %c0_i32, %c0_i32_0 : i32, i32
  }
  func.func @transform_5(%arg0: i32) -> (i32, i32) {
    %c0_i32 = arith.constant 0 : i32
    %c0_i32_0 = arith.constant 0 : i32
    %c0_i32_1 = arith.constant 0 : i32
    return %c0_i32, %c0_i32_0 : i32, i32
  }
  func.func @transform_6(%arg0: i32) -> (i32, i32) {
    %c0_i32 = arith.constant 0 : i32
    %c0_i32_0 = arith.constant 0 : i32
    %c0_i32_1 = arith.constant 0 : i32
    return %c0_i32, %c0_i32_0 : i32, i32
  }
  func.func @transform_7(%arg0: i32) -> (i32, i32) {
    %c0_i32 = arith.constant 0 : i32
    %c0_i32_0 = arith.constant 0 : i32
    %c0_i32_1 = arith.constant 0 : i32
    return %c0_i32, %c0_i32_0 : i32, i32
  }
  func.func @transform_8(%arg0: i32) -> (i32, i32) {
    %c0_i32 = arith.constant 0 : i32
    %c0_i32_0 = arith.constant 0 : i32
    %c0_i32_1 = arith.constant 0 : i32
    return %c0_i32, %c0_i32_0 : i32, i32
  }
  func.func @transform_9(%arg0: i32) -> (i32, i32) {
    %c0_i32 = arith.constant 0 : i32
    %c0_i32_0 = arith.constant 0 : i32
    %c0_i32_1 = arith.constant 0 : i32
    return %c0_i32, %c0_i32_0 : i32, i32
  }
  func.func @transform_10(%arg0: i32) -> (i32, i32) {
    %c0_i32 = arith.constant 0 : i32
    %c0_i32_0 = arith.constant 0 : i32
    %c0_i32_1 = arith.constant 0 : i32
    return %c0_i32, %c0_i32_0 : i32, i32
  }
  func.func @transform_11(%arg0: i32) -> (i32, i32) {
    %c0_i32 = arith.constant 0 : i32
    %c0_i32_0 = arith.constant 0 : i32
    %c0_i32_1 = arith.constant 0 : i32
    return %c0_i32, %c0_i32_0 : i32, i32
  }
  func.func @transform_12(%arg0: i32) -> (i32, i32) {
    %c0_i32 = arith.constant 0 : i32
    %c0_i32_0 = arith.constant 0 : i32
    %c0_i32_1 = arith.constant 0 : i32
    return %c0_i32, %c0_i32_0 : i32, i32
  }
  func.func @transform_13(%arg0: i32) -> (i32, i32) {
    %c0_i32 = arith.constant 0 : i32
    %c0_i32_0 = arith.constant 0 : i32
    %c0_i32_1 = arith.constant 0 : i32
    return %c0_i32, %c0_i32_0 : i32, i32
  }
  func.func @transform_14(%arg0: i32) -> (i32, i32, i32) {
    %c0_i32 = arith.constant 0 : i32
    %c0_i32_0 = arith.constant 0 : i32
    %c0_i32_1 = arith.constant 0 : i32
    return %arg0, %c0_i32, %c0_i32_0 : i32, i32, i32
  }
}

</mosaic_0001>

<bundles_post_ra>
// kernel: tpu_custom_call.1
= control target key start
LH: loop header
LB: loop body
LE: loop exit
PB: predicated region body
PF: predicated region fallthrough
CT: control target
= control target key end

     0   :  { %s6016_s0 = inlined_call_operand.hbm [shape: f32[1,8,32], index: 0, kind: input, shape index: {}]   ;;  %s6017_s1 = inlined_call_operand.hbm [shape: f32[8,16,32], index: 1, kind: input, shape index: {}]   ;;  %s6018_s2 = inlined_call_operand.hbm [shape: f32[32,32], index: 2, kind: input, shape index: {}]   ;;  %s6019_s3 = inlined_call_operand.vmem [shape: f32[1,32], index: 3, kind: input, shape index: {}]   ;;  %s6020_s4 = inlined_call_operand.hbm [shape: f32[32,64], index: 4, kind: input, shape index: {}]   ;;  %s6021_s5 = inlined_call_operand.vmem [shape: f32[1,64], index: 5, kind: input, shape index: {}]   ;;  %s6022_s6 = inlined_call_operand.hbm [shape: f32[32,32], index: 6, kind: input, shape index: {}]   ;;  %s6023_s7 = inlined_call_operand.vmem [shape: f32[1,32], index: 7, kind: input, shape index: {}]   ;;  %s6024_s8 = inlined_call_operand.hbm [shape: f32[32,32], index: 8, kind: input, shape index: {}]   ;;  %s6025_s9 = inlined_call_operand.vmem [shape: f32[1,32], index: 9, kind: input, shape index: {}]   ;;  %s6026_s10 = inlined_call_operand.hbm [shape: f32[32,64], index: 10, kind: input, shape index: {}]   ;;  %s6027_s11 = inlined_call_operand.vmem [shape: f32[1,64], index: 11, kind: input, shape index: {}]   ;;  %s6028_s12 = inlined_call_operand.hbm [shape: f32[32,32], index: 12, kind: input, shape index: {}]   ;;  %s6029_s13 = inlined_call_operand.vmem [shape: f32[1,32], index: 13, kind: input, shape index: {}]   ;;  %s6030_s14 = inlined_call_operand.hbm [shape: f32[8,16,32], index: 14, kind: output, shape index: {}]  }
   0x1   :  { %6034 = sst [smem:[#allocation25_spill]] %s6016_s0 }
   0x2   :  { %6035 = sst [smem:[#allocation26_spill]] %s6018_s2 }
   0x3   :  { %6036 = sst [smem:[#allocation27_spill]] %s6020_s4 }
   0x4   :  { %6037 = sst [smem:[#allocation28_spill]] %s6022_s6 }
   0x5   :  { %6038 = sst [smem:[#allocation29_spill]] %s6024_s8 }
   0x6   :  { %6039 = sst [smem:[#allocation30_spill]] %s6026_s10 }
   0x7   :  { %6040 = sst [smem:[#allocation31_spill]] %s6028_s12 }
   0x8   :  { %6041 = sst [smem:[#allocation32_spill]] %s6029_s13 }
   0x9   :  { %6042 = sst [smem:[#allocation33_spill]] %s6030_s14 }
   0xa   :  { %19 = vsyncpa [#allocation3], 0 }
   0xb   :  { %20 = vsyncpa [#allocation6], 0 }
   0xc   :  { %22 = vsyncpa [#allocation6 + $0x1], 0 }
   0xd   :  { %23 = vsyncpa [#allocation9], 0 }
   0xe   :  { %24 = vsyncpa [#allocation12], 0 }
   0xf   :  { %25 = vsyncpa [#allocation15], 0 }
  0x10   :  { %26 = vsyncpa [#allocation4], 0 }
  0x11   :  { %28 = vsyncpa [#allocation4 + $0x1], 0  ;;  %s4911_s29 = smov 0   ;;  %s4913_s30 = smov 0  }
  0x12   :  { %s4915_s15 = smov 0   ;;  %s4917_s16 = smov 0  }
  0x13 LB: > { %s6043_s2 = sld [smem:[#allocation26_spill]]  ;;  %s4935_s20 = sadd.s32 4294967295, %s4814_s16   ;;  %s4814_s16 = sphi %s4917_s16, %s6067_s16   ;;  %s4810_s15 = sphi %s4915_s15, %s6066_s15   ;;  %s4806_s30 = sphi %s4913_s30, %s6065_s30   ;;  %s4802_s29 = sphi %s4911_s29, %s6064_s29  }
  0x14   : > { %p3842_p0 = scmp.ge.s32.totalorder %s4814_s16, 1  ;;  %p76_p1 = scmp.eq.s32.totalorder %s4935_s20, 0 }
  0x15   : > { %p364_p2 = scmp.lt.s32.totalorder %s4814_s16, 3  ;;  %s4816_s22 = smov [#allocation7]  }
  0x16   : > { %s389_s23 = sshll.u32 %s4816_s22, 4  ;;  %s6045_s4 = sld [smem:[#allocation27_spill]]  ;;  %s390_s23 = int_to_ptr.vmem [resolvable:$true] %s389_s23 }
  0x17   : > { %p4940_p3 = pnand %p3842_p0, %p364_p2  ;;  %s6047_s8 = sld [smem:[#allocation29_spill]] }
  0x18   : > { %s4817_s22 = smov [#allocation8]   ;;  %s6032_s14 = smov 128  }
  0x19   : > { %s387_s19 = sshll.u32 %s6043_s2, 4  ;;  %p4084_p4 = pneg %p4940_p3  ;;  %s388_s19 = int_to_ptr.hbm [resolvable:$true] %s387_s19 }
  0x1a   : > { %s406_s2 = sshll.u32 %s4817_s22, 4  ;;  %s6033_s13 = smov 8   ;;  %s407_s2 = int_to_ptr.vmem [resolvable:$true] %s406_s2 }
  0x1b   : > { %p4952_p6 = pnand %p4084_p4, %p76_p1  ;;  %s6048_s0 = sld [smem:[#allocation25_spill]] }
  0x1c   : > { %s404_s26 = sshll.u32 %s6045_s4, 4  ;;  %s4820_s17 = smov [#allocation11]   ;;  %s405_s26 = int_to_ptr.hbm [resolvable:$true] %s404_s26 }
  0x1d   : > { %s438_s18 = sshll.u32 %s6047_s8, 4  ;;  %s440_s22 = sshll.u32 %s4820_s17, 4  ;;  %s439_s18 = int_to_ptr.hbm [resolvable:$true] %s438_s18  ;;  %s441_s22 = int_to_ptr.vmem [resolvable:$true] %s440_s22 }
  0x1e   : > { %4090 = dma.hbm_to_vmem [thread:$0]  (!%p4952_p6), %s388_s19, 512, %s390_s23, [#allocation6], %s6032_s14, %s6032_s14, %s6033_s13  }
  0x1f   : > { %4093 = dma.hbm_to_vmem [thread:$0]  (!%p4952_p6), %s405_s26, 512, %s407_s2, [#allocation9], %s6032_s14, %s6032_s14, %s6033_s13  }
  0x20   : > { %4099 = dma.hbm_to_vmem [thread:$0]  (!%p4952_p6), %s439_s18, 512, %s441_s22, [#allocation12], %s6032_s14, %s6032_s14, %s6033_s13  }
  0x21   : > { %s376_s28 = sshll.u32 %s6048_s0, 4  ;;  %s4821_s19 = smov [#allocation2]   ;;  %s377_s28 = int_to_ptr.hbm [resolvable:$true] %s376_s28 }
  0x22   : > { %s378_s23 = sshll.u32 %s4821_s19, 4  ;;  %s6049_s6 = sld [smem:[#allocation28_spill]]  ;;  %s379_s23 = int_to_ptr.vmem [resolvable:$true] %s378_s23 }
  0x23   : > { %4087 = dma.hbm_to_vmem [thread:$0]  (!%p4952_p6), %s377_s28, 128, %s379_s23, [#allocation3]  }
  0x24   : > { %s6050_s10 = sld [smem:[#allocation30_spill]]  ;;  %s4822_s17 = smov [#allocation10]  }
  0x25   : > { %s423_s18 = sshll.u32 %s4822_s17, 4  ;;  %s4823_s4 = smov [#allocation13]   ;;  %s424_s18 = int_to_ptr.vmem [resolvable:$true] %s423_s18 }
  0x26   : > { %s457_s8 = sshll.u32 %s4823_s4, 4  ;;  %s6051_s12 = sld [smem:[#allocation31_spill]]  ;;  %s458_s8 = int_to_ptr.vmem [resolvable:$true] %s457_s8 }
  0x27   : > { %s4824_s23 = smov [#allocation14]   ;;  %s3841_s26 = sadd.s32 4294967294, %s4814_s16  }
  0x28   : > { %s421_s2 = sshll.u32 %s6049_s6, 4  ;;  %s5005_s24 = sadd.s32 1, %s4814_s16   ;;  %s422_s2 = int_to_ptr.hbm [resolvable:$true] %s421_s2 }
  0x29   : > { %4096 = dma.hbm_to_vmem [thread:$0]  (!%p4952_p6), %s422_s2, 512, %s424_s18, [#allocation9], %s6032_s14, %s6032_s14, %s6033_s13  }
  0x2a   : > { %s455_s25 = sshll.u32 %s6050_s10, 4  ;;  %s474_s2 = sshll.u32 %s4824_s23, 4  ;;  %s456_s25 = int_to_ptr.hbm [resolvable:$true] %s455_s25  ;;  %s475_s2 = int_to_ptr.vmem [resolvable:$true] %s474_s2 }
  0x2b   : > { %4102 = dma.hbm_to_vmem [thread:$0]  (!%p4952_p6), %s456_s25, 512, %s458_s8, [#allocation12], %s6032_s14, %s6032_s14, %s6033_s13  }
  0x2c   : > { %s472_s19 = sshll.u32 %s6051_s12, 4  ;;  %s62_s17 = sadd.s32 1, %s4810_s15  ;;  %s473_s19 = int_to_ptr.hbm [resolvable:$true] %s472_s19 }
  0x2d   : > { %4105 = dma.hbm_to_vmem [thread:$0]  (!%p4952_p6), %s473_s19, 512, %s475_s2, [#allocation15], %s6032_s14, %s6032_s14, %s6033_s13  }
  0x2e   : > { %s59_s18 = ssub.s32 %s4814_s16, %s5005_s24  ;;  %p69_p7 = scmp.ne.s32.totalorder %s4810_s15, %s4806_s30 }
  0x2f   : > { %p60_p8 = scmp.eq.s32.totalorder %s59_s18, 0  ;;  %p70_p9 = scmp.eq.s32.totalorder %s4814_s16, 0 }
  0x30   : > { %p75_p10 = scmp.ne.s32.totalorder %s4806_s30, %s4802_s29  ;;  %p351_p11 = scmp.eq.s32.totalorder %s4935_s20, 1 }
  0x31   : > { %s5017_s27 = scalar_select %p60_p8, %s4810_s15, %s62_s17  }
  0x32   : > { %p5019_p12 = por %p70_p9, %p69_p7  ;;  %p5025_p13 = por %p76_p1, %p75_p10 }
  0x33   : > { %6052 = sst [smem:[#allocation24_spill]] %s5017_s27  ;;  %p5029_p0 = por %p351_p11, %p69_p7 }
  0x34   : > { %p357_p2 = scmp.eq.s32.totalorder %s3841_s26, 1  ;;  %p4121_p4 = scmp.lt.s32.totalorder %s4814_s16, 2 }
  0x35   : > { %s491_s28 = sand.u32 1, %s4814_s16   ;;  %s493_s19 = sand.u32 1, %s4810_s15  }
  0x36   : > { %p5035_p6 = por %p357_p2, %p75_p10  ;;  %s4049_s23 = sshll.u32 %s4814_s16, 6 }
  0x37   : > { %s3851_s2 = sshll.u32 %s493_s19, 6  ;;  %s501_s14 = scalar_lea.hbm %s6017_s1, %s4049_s23 }
  0x38   : > { %s502_s13 = sshll.u32 %s501_s14, 4  ;;  %s495_s0 = scalar_lea.vmem [#allocation5], %s3851_s2  ;;  %s503_s13 = int_to_ptr.hbm [resolvable:$true] %s502_s13 }
  0x39   : > { %s504_s6 = sshll.u32 %s495_s0, 4  ;;  %p5046_p7 = pnand %p4121_p4, %p5019_p12  ;;  %s505_s6 = int_to_ptr.vmem [resolvable:$true] %s504_s6 }
  0x3a   : > { %s492_s10 = scalar_lea.sflag [#allocation6], %s491_s28  ;;  %s4698_s12 = sshra.s32 %s503_s13, 4  ;;  %s4699_s12 = int_to_ptr.hbm [resolvable:$true] %s4698_s12 }
  0x3b   : > { %s4700_s27 = scalar_lea.hbm %s4699_s12, 64  ;;  %p4702_p9 = pneg %p5046_p7 }
  0x3c   : > { %p4701_p8 = scmp.ne.s32.totalorder %s4699_s12, %s4700_s27  ;;  %s4705_s0 = scalar_lea.hbm %s6017_s1, 128 }
  0x3d   : > { %p4706_p12 = scmp.lt.s32.totalorder %s4699_s12, %s6017_s1  ;;  %p4707_p2 = scmp.lt.s32.totalorder %s4705_s0, %s4700_s27 }
  0x3e   : > { %p4703_p10 = pnand %p4702_p9, %p4701_p8 }
  0x3f   : > { %p4708_p4 = por %p4707_p2, %p4706_p12 }
  0x40   : > { %p4704_p11 = pneg %p4703_p10 }
  0x42   : > { %p4709_p5 = pnand %p4708_p4, %p4704_p11 }
  0x44   : > { %4712 = shalt.err (!%p4709_p5)
}
  0x45   : > { %s6058_s28 = smov 8   ;;  %s6059_s2 = smov 128  }
  0x46   : > { %4109 = dma.hbm_to_vmem [thread:$0]  (!%p5046_p7), %s503_s13, 1024, %s505_s6, %s492_s10, %s6059_s2, %s6059_s2, %s6058_s28  }
  0x47   : > { %516 = sbr.rel (%p4940_p3) target bundleno = 4653 (0x122d), region = 76 }
  0x4c   : > { %4773 = dma.done.wait (%p76_p1), [#allocation3], 128  }
  0x4d   : > { %4775 = vsyncadd (%p76_p1), [#allocation3], 4294967168  ;;  %s523_s12 = sand.u32 1, %s4935_s20   ;;  %s525_s27 = sand.u32 1, %s4806_s30  }
  0x4e   : > { %s5073_s17 = sshll.u32 %s525_s27, 6  ;;  %s524_s6 = scalar_lea.sflag [#allocation6], %s523_s12 }
  0x4f   : > { %s5076_s10 = scalar_lea.vmem [#allocation5], %s5073_s17 }
  0x50   : > { %4777 = dma.done.wait (%p5025_p13), %s524_s6, 1024  }
  0x51   : > { %4779 = vsyncadd (%p5025_p13), %s524_s6, 4294966272 }
  0x52   : > { %4781 = dma.done.wait (%p76_p1), [#allocation6], 512  }
  0x53   : > { %4783 = vsyncadd (%p76_p1), [#allocation6], 4294966784 }
  0x54   : > { %4785 = dma.done.wait (%p76_p1), [#allocation9], 1024  }
  0x55   : > { %4787 = vsyncadd (%p76_p1), [#allocation9], 4294966272 }
  0x56   : > { %4789 = dma.done.wait (%p76_p1), [#allocation12], 1024  }
  0x57   : > { %4791 = vsyncadd (%p76_p1), [#allocation12], 4294966272 }
  0x58   : > { %4793 = dma.done.wait (%p76_p1), [#allocation15], 512  }
  0x59   : > { %4795 = vsyncadd (%p76_p1), [#allocation15], 4294966784  ;;  %v649_v0 = vld [vmem:[#allocation8 + $0x18] sm:$0xff]  ;;  %v648_v1 = vld [vmem:[#allocation8 + $0x10] sm:$0xff]  ;;  %vm622_vm0 = vcmask 261120   ;;  %vm725_vm1 = vcmask 64512  }
  0x5a   : > { %695 = vmatpush.msra.mxu1 %v649_v0  ;;  %v617_v2 = vld [vmem:[#allocation7 + $0x18] sm:$0xff]  ;;  %v647_v3 = vld [vmem:[#allocation8 + $0x8] sm:$0xff]  ;;  %v616_v4 = vld [vmem:[#allocation7 + $0x10] sm:$0xff]  ;;  %s4825_s26 = smov 96   ;;  %vm833_vm2 = vcmask 130048   ;;  %s4826_s14 = smov 120  }
  0x5b   : > { %638 = vmatpush.msra.mxu0 %v617_v2  ;;  %v646_v5 = vld [vmem:[#allocation8] sm:$0xff]  ;;  %v615_v6 = vld [vmem:[#allocation7 + $0x8] sm:$0xff]  ;;  %v613_v9 = vld [vmem:[#allocation2] sm:$0xff]  ;;  %s4827_s19 = smov 88   ;;  %s4828_s0 = smov 112   ;;  %vm1878_vm3 = vcmask 195584  }
  0x5c   : > { %696 = vmatpush.msra.mxu1 %v648_v1  ;;  %v605_v7 = vld [vmem:[%s5076_s10] sm:$0xff]  ;;  %v606_v10 = vld [vmem:[%s5076_s10 + $0x8] sm:$0xff]  ;;  %v607_v11 = vld [vmem:[%s5076_s10 + $0x10] sm:$0xff]  ;;  %s4829_s23 = smov 104   ;;  %s4830_s25 = smov 80  }
  0x5d   : > { %639 = vmatpush.msra.mxu0 %v616_v4  ;;  %v614_v8 = vld [vmem:[#allocation7] sm:$0xff]  ;;  %v608_v12 = vld [vmem:[%s5076_s10 + $0x18] sm:$0xff]  ;;  %v610_v14 = vld [vmem:[%s5076_s10 + $0x28] sm:$0xff]  ;;  %s4831_s28 = smov 72   ;;  %s4832_s2 = smov 16  }
  0x5e   : > { %697 = vmatpush.msra.mxu1 %v647_v3  ;;  %v609_v13 = vld [vmem:[%s5076_s10 + $0x20] sm:$0xff]  ;;  %v611_v15 = vld [vmem:[%s5076_s10 + $0x30] sm:$0xff]  ;;  %v612_v16 = vld [vmem:[%s5076_s10 + $0x38] sm:$0xff]  ;;  %s4833_s12 = smov 8   ;;  %s4834_s6 = smov 24  }
  0x5f   : > { %640 = vmatpush.msra.mxu0 %v615_v6  ;;  %v4282_v18 = vld [vmem:[%s6021_s5] ss:$0 sm:$0xff] }
  0x60   : > { %698 = vmatpush.msra.mxu1 %v646_v5  ;;  %v4283_v19 = vld [vmem:[%s6019_s3] ss:$0 sm:$0xff] }
  0x61   : > { %3866 = vmatmul.msk.f32.vlgmr.msra.gmra.mxu1 %vm622_vm0, %v605_v7  ;;  %641 = vmatpush.msra.mxu0 %v614_v8 }
  0x62   : > { %3865 = vmatmul.msk.f32.vlgmr.msra.gmra.mxu0 %vm622_vm0, %v613_v9 }
  0x69   : > { %3867 = vmatmul.msk.f32.gmra.mxu1 %vm622_vm0, %v606_v10 }
  0x71   : > { %3868 = vmatmul.msk.f32.gmra.mxu1 %vm622_vm0, %v607_v11 }
  0x79   : > { %3869 = vmatmul.msk.f32.gmra.mxu1 %vm622_vm0, %v608_v12 }
  0x81   : > { %3870 = vmatmul.msk.f32.gmra.mxu1 %vm622_vm0, %v609_v13 }
  0x89   : > { %3871 = vmatmul.msk.f32.gmra.mxu1 %vm622_vm0, %v610_v14 }
  0x91   : > { %3872 = vmatmul.msk.f32.gmra.mxu1 %vm622_vm0, %v611_v15 }
  0x99   : > { %3873 = vmatmul.msk.f32.gmra.mxu1 %vm622_vm0, %v612_v16 }
  0xde   : > { %v700_v17 = vpop.f32.mrf.mxu1 }
  0xdf   : > { %v643_v20 = vpop.f32.mrf.mxu0  ;;  %v5121_v22 = vadd.f32 %v4282_v18, %v700_v17 }
  0xe0   : > { %v5125_v24 = vadd.f32 %v4283_v19, %v643_v20 }
  0xe2   : > { %v5136_v26 = vmul.f32 0.17677669, %v5125_v24 }
  0xe6   : > { %v703_v21 = vpop.f32.mrf.mxu1 }
  0xe7   : > { %v5123_v23 = vadd.f32 %v4282_v18, %v703_v21 }
  0xe9   : > { %3874 = vmatpush.xpose.msk.msrb.mxu0 %vm725_vm1, %v5123_v23  ;;  %v5131_v25 = vpack.i.bf16 %v5121_v22, %v5123_v23 }
  0xeb   : > { %4183 = vrot.lane.b32.xlu2 %v5131_v25, %s4825_s26 }
  0xed   : > { %3875 = vmatpush.xpose.msk.msrb.mxu0 %vm725_vm1, %v5121_v22 }
  0xee   : > { %v706_v27 = vpop.f32.mrf.mxu1 }
  0xef   : > { %v5146_v30 = vadd.f32 %v4282_v18, %v706_v27 }
  0xf0   : > { %3876 = vmatmul.msk.f32.vlgmr.msrb.gmra.mxu0 %vm725_vm1, %v5136_v26 }
  0xf6   : > { %v709_v28 = vpop.f32.mrf.mxu1 }
  0xf7   : > { %v5142_v29 = vadd.f32 %v4282_v18, %v709_v28 }
  0xf9   : > { %3877 = vmatpush.xpose.msk.msra.mxu3 %vm725_vm1, %v5142_v29 }
  0xfd   : > { %3878 = vmatpush.xpose.msk.msra.mxu3 %vm725_vm1, %v5146_v30 }
  0xfe   : > { %v712_v31 = vpop.f32.mrf.mxu1 }
  0xff   : > { %v5156_v34 = vadd.f32 %v4282_v18, %v712_v31 }
 0x100   : > { %3879 = vmatmul.msk.f32.vlgmr.msra.gmra.mxu3 %vm725_vm1, %v5136_v26 }
 0x106   : > { %v715_v32 = vpop.f32.mrf.mxu1 }
 0x107   : > { %v5152_v33 = vadd.f32 %v4282_v18, %v715_v32 }
 0x109   : > { %3880 = vmatpush.xpose.msk.msra.mxu0 %vm725_vm1, %v5152_v33  ;;  %v5200_v4 = vpack.i.bf16 %v5156_v34, %v5152_v33 }
 0x10d   : > { %3881 = vmatpush.xpose.msk.msra.mxu0 %vm725_vm1, %v5156_v34 }
 0x10e   : > { %v718_v35 = vpop.f32.mrf.mxu1 }
 0x10f   : > { %v5168_v39 = vadd.f32 %v4282_v18, %v718_v35 }
 0x110   : > { %3882 = vmatmul.msk.f32.vlgmr.msra.gmra.mxu0 %vm725_vm1, %v5136_v26 }
 0x111   : > { %v4192_v54 = vpack.i.bf16 %v5168_v39, %v5146_v30 }
 0x116   : > { %v721_v36 = vpop.f32.mrf.mxu1 }
 0x117   : > { %v5162_v37 = vadd.f32 %v4282_v18, %v721_v36 }
 0x119   : > { %3883 = vmatpush.xpose.msk.msra.mxu2 %vm725_vm1, %v5162_v37  ;;  %v4187_v38 = vpack.i.bf16 %v5162_v37, %v5142_v29 }
 0x11b   : > { %4188 = vrot.lane.b32.xlu0 %v4187_v38, %s4825_s26 }
 0x11d   : > { %3884 = vmatpush.xpose.msk.msra.mxu2 %vm725_vm1, %v5168_v39 }
 0x120   : > { %3885 = vmatmul.msk.f32.vlgmr.msra.gmra.mxu2 %vm725_vm1, %v5136_v26 }
 0x145   : > { %v4184_v40 = vpop.permute.xlu2 %4183 }
 0x146   : > { %v4185_v41 = vunpack.i.l.bf16 %v4184_v40  ;;  %v4186_v42 = vunpack.i.h.bf16 %v4184_v40 }
 0x148   : > { %901 = vmatpush.msrb.mxu3 %v4185_v41 }
 0x14a   : > { %902 = vmatpush.msrb.mxu3 %v4186_v42 }
 0x16d   : > { %v752_v43 = vpop.f32.mrf.mxu0 }
 0x16e   : > { %v834_v44 = vsel %vm833_vm2, %v752_v43, -inf }
 0x16f   : > { %835 = vmax.xlane.f32.xlu0 %v834_v44 }
 0x183   : > { %v778_v45 = vpop.f32.mrf.mxu3 }
 0x184   : > { %v837_v46 = vsel %vm833_vm2, %v778_v45, -inf }
 0x185   : > { %838 = vmax.xlane.f32.xlu0 %v837_v46 }
 0x18d   : > { %v4189_v47 = vpop.permute.xlu0 %4188  ;;  %v804_v48 = vpop.f32.mrf.mxu0 }
 0x18e   : > { %v4191_v49 = vunpack.i.h.bf16 %v4189_v47  ;;  %v4190_v50 = vunpack.i.l.bf16 %v4189_v47  ;;  %v840_v51 = vsel %vm833_vm2, %v804_v48, -inf }
 0x18f   : > { %841 = vmax.xlane.f32.xlu2 %v840_v51 }
 0x190   : > { %930 = vmatpush.msrb.mxu0 %v4190_v50  ;;  %988 = vmatpush.msra.mxu3 %v4191_v49 }
 0x199   : > { %996 = vrot.lane.b32.xlu0 %v5121_v22, %s4826_s14 }
 0x1a3   : > { %v830_v52 = vpop.f32.mrf.mxu2 }
 0x1a4   : > { %v843_v53 = vsel %vm833_vm2, %v830_v52, -inf }
 0x1a5   : > { %844 = vmax.xlane.f32.xlu1 %v843_v53 }
 0x1a7   : > { %998 = vrot.lane.b32.xlu2 %v5123_v23, %s4826_s14 }
 0x1af   : > { %1056 = vrot.lane.b32.xlu2 %v5152_v33, %s4826_s14 }
 0x1b7   : > { %1054 = vrot.lane.b32.xlu2 %v5156_v34, %s4826_s14 }
 0x1be   : > { %4193 = vrot.lane.b32.xlu1 %v4192_v54, %s4825_s26 }
 0x1bf   : > { %1082 = vrot.lane.b32.xlu2 %v5168_v39, %s4826_s14 }
 0x1c7   : > { %1028 = vrot.lane.b32.xlu2 %v5142_v29, %s4826_s14 }
 0x1e2   : > { %v836_v55 = vpop.xlane.xlu0 %835 }
 0x1e3   : > { %v846_v56 = vsub.f32 %v752_v43, %v836_v55 }
 0x1e5   : > { %v850_v57 = vmul.f32 1.442695, %v846_v56 }
 0x1e7   : > { %4288 = vpow2.f32 %v850_v57 }
 0x1ed   : > { %v4289_v58 = vpop.eup %4288 }
 0x1ee   : > { %v858_v59 = vsel %vm833_vm2, %v4289_v58, 0.0 }
 0x1ef   : > { %859 = vadd.xlane.f32.xlu1 %v858_v59  ;;  %v5237_v59 = vpack.i.bf16 %v5168_v39, %v5162_v37 }
 0x1f8   : > { %v839_v60 = vpop.xlane.xlu0 %838 }
 0x1f9   : > { %v847_v61 = vsub.f32 %v778_v45, %v839_v60 }
 0x1fb   : > { %v852_v62 = vmul.f32 1.442695, %v847_v61 }
 0x1fd   : > { %4290 = vpow2.f32 %v852_v62 }
 0x202   : > { %v842_v7 = vpop.xlane.xlu2 %841 }
 0x203   : > { %v4291_v63 = vpop.eup %4290  ;;  %v848_v13 = vsub.f32 %v804_v48, %v842_v7 }
 0x204   : > { %v861_v0 = vsel %vm833_vm2, %v4291_v63, 0.0 }
 0x205   : > { %862 = vadd.xlane.f32.xlu0 %v861_v0  ;;  %v854_v14 = vmul.f32 1.442695, %v848_v13 }
 0x20a   : > { %v999_v11 = vpop.permute.xlu2 %998 }
 0x20b   : > { %v997_v12 = vpop.permute.xlu0 %996 }
 0x212   : > { %v1057_v17 = vpop.permute.xlu2 %1056 }
 0x218   : > { %v845_v1 = vpop.xlane.xlu1 %844 }
 0x219   : > { %v849_v2 = vsub.f32 %v830_v52, %v845_v1  ;;  %1084 = vrot.lane.b32.xlu0 %v5162_v37, %s4826_s14 }
 0x21a   : > { %v1055_v21 = vpop.permute.xlu2 %1054 }
 0x21b   : > { %v856_v3 = vmul.f32 1.442695, %v849_v2 }
 0x21d   : > { %4292 = vpow2.f32 %v856_v3 }
 0x21e   : > { %4294 = vpow2.f32 %v854_v14 }
 0x221   : > { %4198 = vrot.lane.b32.xlu0 %v5200_v4, %s4825_s26 }
 0x222   : > { %v1083_v35 = vpop.permute.xlu2 %1082 }
 0x223   : > { %v4293_v5 = vpop.eup %4292 }
 0x224   : > { %v867_v6 = vsel %vm833_vm2, %v4293_v5, 0.0  ;;  %v4295_v16 = vpop.eup %4294 }
 0x225   : > { %868 = vadd.xlane.f32.xlu1 %v867_v6  ;;  %v864_v18 = vsel %vm833_vm2, %v4295_v16, 0.0 }
 0x229   : > { %1026 = vrot.lane.b32.xlu0 %v5146_v30, %s4826_s14 }
 0x22a   : > { %v1029_v41 = vpop.permute.xlu2 %1028 }
 0x230   : > { %v4194_v8 = vpop.permute.xlu1 %4193 }
 0x231   : > { %v4196_v9 = vunpack.i.h.bf16 %v4194_v8  ;;  %v4195_v10 = vunpack.i.l.bf16 %v4194_v8 }
 0x233   : > { %931 = vmatpush.msrb.mxu0 %v4195_v10  ;;  %989 = vmatpush.msra.mxu3 %v4196_v9 }
 0x235   : > { %3890 = vmatpush.xpose.msk.msra.mxu0 %vm725_vm1, %v999_v11 }
 0x239   : > { %3891 = vmatpush.xpose.msk.msra.mxu0 %vm725_vm1, %v997_v12 }
 0x23e   : > { %994 = vrot.lane.b32.xlu1 %v5136_v26, %s4826_s14 }
 0x262   : > { %v860_v15 = vpop.xlane.xlu1 %859 }
 0x263   : > { %4296 = vrcp.f32 %v860_v15 }
 0x268   : > { %865 = vadd.xlane.f32.xlu1 %v864_v18 }
 0x269   : > { %v4297_v19 = vpop.eup %4296 }
 0x26a   : > { %v874_v20 = vmul.f32 %v4297_v19, %v4289_v58 }
 0x26c   : > { %3886 = vmatmul.msk.f32.vlgmr.msrb.gmra.mxu3 %vm833_vm2, %v874_v20 }
 0x26d   : > { %3896 = vmatpush.xpose.msk.msrb.mxu3 %vm725_vm1, %v1057_v17 }
 0x271   : > { %3897 = vmatpush.xpose.msk.msrb.mxu3 %vm725_vm1, %v1055_v21  ;;  %v5267_v21 = vpack.i.bf16 %v5146_v30, %v5142_v29 }
 0x278   : > { %v863_v27 = vpop.xlane.xlu0 %862 }
 0x279   : > { %4298 = vrcp.f32 %v863_v27 }
 0x27f   : > { %v4299_v28 = vpop.eup %4298 }
 0x280   : > { %v875_v31 = vmul.f32 %v4299_v28, %v4291_v63 }
 0x282   : > { %3887 = vmatmul.msk.f32.vlgmr.msrb.gmra.mxu0 %vm833_vm2, %v875_v31 }
 0x28b   : > { %v1085_v32 = vpop.permute.xlu0 %1084 }
 0x28c   : > { %3899 = vmatpush.xpose.msk.msrb.mxu0 %vm725_vm1, %v1085_v32 }
 0x290   : > { %3900 = vmatpush.xpose.msk.msrb.mxu0 %vm725_vm1, %v1083_v35 }
 0x293   : > { %v4199_v36 = vpop.permute.xlu0 %4198 }
 0x294   : > { %v4200_v38 = vunpack.i.l.bf16 %v4199_v36  ;;  %v4201_v40 = vunpack.i.h.bf16 %v4199_v36 }
 0x296   : > { %959 = vmatpush.msrb.mxu2 %v4200_v38 }
 0x298   : > { %v869_v42 = vpop.xlane.xlu1 %868  ;;  %960 = vmatpush.msrb.mxu2 %v4201_v40 }
 0x299   : > { %4300 = vrcp.f32 %v869_v42 }
 0x29a   : > { %3893 = vmatpush.xpose.msk.msra.mxu2 %vm725_vm1, %v1029_v41 }
 0x29b   : > { %v1027_v43 = vpop.permute.xlu0 %1026 }
 0x29e   : > { %3894 = vmatpush.xpose.msk.msra.mxu2 %vm725_vm1, %v1027_v43 }
 0x29f   : > { %v4301_v44 = vpop.eup %4300 }
 0x2a0   : > { %v877_v45 = vmul.f32 %v4301_v44, %v4293_v5 }
 0x2a2   : > { %3889 = vmatmul.msk.f32.vlgmr.msra.gmra.mxu3 %vm833_vm2, %v877_v45 }
 0x2b0   : > { %v995_v46 = vpop.permute.xlu1 %994 }
 0x2b1   : > { %3892 = vmatmul.msk.f32.vlgmr.msra.gmra.mxu0 %vm725_vm1, %v995_v46  ;;  %3898 = vmatmul.msk.f32.vlgmr.msrb.gmra.mxu3 %vm725_vm1, %v995_v46 }
 0x2b9   : > { %3901 = vmatmul.msk.f32.vlgmr.msrb.gmra.mxu0 %vm725_vm1, %v995_v46 }
 0x2db   : > { %v866_v47 = vpop.xlane.xlu1 %865 }
 0x2dc   : > { %4302 = vrcp.f32 %v866_v47 }
 0x2e2   : > { %v4303_v48 = vpop.eup %4302 }
 0x2e3   : > { %v876_v49 = vmul.f32 %v4303_v48, %v4295_v16 }
 0x2e5   : > { %3888 = vmatmul.msk.f32.vlgmr.msrb.gmra.mxu2 %vm833_vm2, %v876_v49 }
 0x2ed   : > { %3895 = vmatmul.msk.f32.vlgmr.msra.gmra.mxu2 %vm725_vm1, %v995_v46 }
 0x2ef   : > { %v5226_v50 = vpop.f32.mrf.mxu3 }
 0x2ff   : > { %v5228_v51 = vpop.f32.mrf.mxu0 }
 0x325   : > { %v5230_v52 = vpop.f32.mrf.mxu3 }
 0x32e   : > { %v1023_v53 = vpop.f32.mrf.mxu0 }
 0x32f   : > { %v1110_v54 = vsel %vm833_vm2, %v1023_v53, -inf }
 0x330   : > { %1111 = vmax.xlane.f32.xlu2 %v1110_v54 }
 0x334   : > { %v1079_v55 = vpop.f32.mrf.mxu3 }
 0x335   : > { %v1116_v56 = vsel %vm833_vm2, %v1079_v55, -inf }
 0x336   : > { %1117 = vmax.xlane.f32.xlu0 %v1116_v56  ;;  %v1107_v57 = vpop.f32.mrf.mxu0 }
 0x337   : > { %v1119_v58 = vsel %vm833_vm2, %v1107_v57, -inf }
 0x338   : > { %1120 = vmax.xlane.f32.xlu1 %v1119_v58 }
 0x348   : > { %4213 = vrot.lane.b32.xlu2 %v5237_v59, %s4827_s19 }
 0x34a   : > { %4203 = vrot.lane.b32.xlu0 %v5131_v25, %s4827_s19 }
 0x352   : > { %1304 = vrot.lane.b32.xlu0 %v5142_v29, %s4828_s0 }
 0x35a   : > { %1332 = vrot.lane.b32.xlu0 %v5152_v33, %s4828_s0 }
 0x362   : > { %1270 = vrot.lane.b32.xlu0 %v5136_v26, %s4828_s0 }
 0x368   : > { %v5249_v60 = vpop.f32.mrf.mxu2 }
 0x36a   : > { %1274 = vrot.lane.b32.xlu0 %v5123_v23, %s4828_s0 }
 0x370   : > { %v1051_v61 = vpop.f32.mrf.mxu2 }
 0x371   : > { %v1113_v62 = vsel %vm833_vm2, %v1051_v61, -inf }
 0x372   : > { %1360 = vrot.lane.b32.xlu0 %v5162_v37, %s4828_s0  ;;  %1114 = vmax.xlane.f32.xlu1 %v1113_v62 }
 0x38b   : > { %4208 = vrot.lane.b32.xlu1 %v5200_v4, %s4827_s19 }
 0x3a3   : > { %v1112_v63 = vpop.xlane.xlu2 %1111 }
 0x3a4   : > { %v1122_v0 = vsub.f32 %v1023_v53, %v1112_v63 }
 0x3a6   : > { %v1126_v1 = vmul.f32 1.442695, %v1122_v0 }
 0x3a8   : > { %4304 = vpow2.f32 %v1126_v1 }
 0x3a9   : > { %v1118_v2 = vpop.xlane.xlu0 %1117 }
 0x3aa   : > { %v1124_v3 = vsub.f32 %v1079_v55, %v1118_v2 }
 0x3ab   : > { %v1121_v5 = vpop.xlane.xlu1 %1120  ;;  %v4214_v16 = vpop.permute.xlu2 %4213 }
 0x3ac   : > { %v1130_v6 = vmul.f32 1.442695, %v1124_v3  ;;  %v1125_v7 = vsub.f32 %v1107_v57, %v1121_v5  ;;  %v4215_v19 = vunpack.i.l.bf16 %v4214_v16  ;;  %v4216_v20 = vunpack.i.h.bf16 %v4214_v16 }
 0x3ae   : > { %v4305_v8 = vpop.eup %4304  ;;  %4306 = vpow2.f32 %v1130_v6  ;;  %v1132_v9 = vmul.f32 1.442695, %v1125_v7 }
 0x3af   : > { %v1134_v10 = vsel %vm833_vm2, %v4305_v8, 0.0 }
 0x3b0   : > { %4308 = vpow2.f32 %v1132_v9  ;;  %1135 = vadd.xlane.f32.xlu2 %v1134_v10 }
 0x3b4   : > { %v4307_v11 = vpop.eup %4306 }
 0x3b5   : > { %v1140_v12 = vsel %vm833_vm2, %v4307_v11, 0.0 }
 0x3b6   : > { %v4309_v13 = vpop.eup %4308  ;;  %1141 = vadd.xlane.f32.xlu1 %v1140_v12 }
 0x3b7   : > { %v1143_v14 = vsel %vm833_vm2, %v4309_v13, 0.0 }
 0x3b8   : > { %1144 = vadd.xlane.f32.xlu2 %v1143_v14 }
 0x3bc   : > { %v4204_v15 = vpop.permute.xlu0 %4203 }
 0x3bd   : > { %v4205_v17 = vunpack.i.l.bf16 %v4204_v15  ;;  %v4206_v18 = vunpack.i.h.bf16 %v4204_v15 }
 0x3bf   : > { %1177 = vmatpush.msrb.mxu2 %v4205_v17 }
 0x3c1   : > { %1178 = vmatpush.msrb.mxu2 %v4206_v18 }
 0x3c3   : > { %1264 = vmatpush.msra.mxu2 %v4215_v19 }
 0x3c4   : > { %v1305_v41 = vpop.permute.xlu0 %1304 }
 0x3c5   : > { %1265 = vmatpush.msra.mxu2 %v4216_v20 }
 0x3cc   : > { %v1333_v47 = vpop.permute.xlu0 %1332 }
 0x3cf   : > { %1302 = vrot.lane.b32.xlu1 %v5146_v30, %s4828_s0 }
 0x3d0   : > { %1330 = vrot.lane.b32.xlu2 %v5156_v34, %s4828_s0 }
 0x3d4   : > { %v1271_v56 = vpop.permute.xlu0 %1270 }
 0x3d8   : > { %4218 = vrot.lane.b32.xlu2 %v5267_v21, %s4827_s19 }
 0x3dc   : > { %v1275_v62 = vpop.permute.xlu0 %1274 }
 0x3e0   : > { %1272 = vrot.lane.b32.xlu2 %v5121_v22, %s4828_s0 }
 0x3e4   : > { %v1361_v5 = vpop.permute.xlu0 %1360 }
 0x3e5   : > { %v1115_v27 = vpop.xlane.xlu1 %1114 }
 0x3e6   : > { %v1123_v28 = vsub.f32 %v1051_v61, %v1115_v27 }
 0x3e8   : > { %1358 = vrot.lane.b32.xlu2 %v5168_v39, %s4828_s0  ;;  %v1128_v31 = vmul.f32 1.442695, %v1123_v28 }
 0x3ea   : > { %4310 = vpow2.f32 %v1128_v31 }
 0x3f0   : > { %v4311_v32 = vpop.eup %4310 }
 0x3f1   : > { %v1137_v35 = vsel %vm833_vm2, %v4311_v32, 0.0 }
 0x3f9   : > { %1138 = vadd.xlane.f32.xlu1 %v1137_v35 }
 0x3fd   : > { %v4209_v36 = vpop.permute.xlu1 %4208 }
 0x3fe   : > { %v4210_v38 = vunpack.i.l.bf16 %v4209_v36  ;;  %v4211_v40 = vunpack.i.h.bf16 %v4209_v36 }
 0x400   : > { %1235 = vmatpush.msra.mxu0 %v4210_v38 }
 0x402   : > { %1236 = vmatpush.msra.mxu0 %v4211_v40 }
 0x404   : > { %3909 = vmatpush.xpose.msk.msrb.mxu0 %vm725_vm1, %v1305_v41 }
 0x423   : > { %v1136_v42 = vpop.xlane.xlu2 %1135 }
 0x424   : > { %4312 = vrcp.f32 %v1136_v42 }
 0x429   : > { %v1142_v43 = vpop.xlane.xlu1 %1141 }
 0x42a   : > { %v4313_v44 = vpop.eup %4312  ;;  %4314 = vrcp.f32 %v1142_v43 }
 0x42b   : > { %v1150_v45 = vmul.f32 %v4313_v44, %v4305_v8  ;;  %v1145_v46 = vpop.xlane.xlu2 %1144 }
 0x42c   : > { %4316 = vrcp.f32 %v1145_v46 }
 0x42d   : > { %3902 = vmatmul.msk.f32.vlgmr.msrb.gmra.mxu2 %vm833_vm2, %v1150_v45 }
 0x42e   : > { %3912 = vmatpush.xpose.msk.msrb.mxu2 %vm725_vm1, %v1333_v47 }
 0x430   : > { %v4315_v48 = vpop.eup %4314 }
 0x431   : > { %v1152_v49 = vmul.f32 %v4315_v48, %v4307_v11 }
 0x432   : > { %v4317_v53 = vpop.eup %4316 }
 0x433   : > { %v1153_v54 = vmul.f32 %v4317_v53, %v4309_v13  ;;  %3904 = vmatmul.msk.f32.vlgmr.msra.gmra.mxu0 %vm833_vm2, %v1152_v49  ;;  %v1331_v55 = vpop.permute.xlu2 %1330 }
 0x434   : > { %3913 = vmatpush.xpose.msk.msrb.mxu2 %vm725_vm1, %v1331_v55 }
 0x435   : > { %3905 = vmatmul.msk.f32.vlgmr.msra.gmra.mxu2 %vm833_vm2, %v1153_v54 }
 0x43b   : > { %v4219_v57 = vpop.permute.xlu2 %4218 }
 0x43c   : > { %v4220_v58 = vunpack.i.l.bf16 %v4219_v57  ;;  %v4221_v61 = vunpack.i.h.bf16 %v4219_v57 }
 0x43d   : > { %3914 = vmatmul.msk.f32.vlgmr.msrb.gmra.mxu2 %vm725_vm1, %v1271_v56 }
 0x43e   : > { %1206 = vmatpush.msra.mxu3 %v4220_v58 }
 0x440   : > { %1207 = vmatpush.msra.mxu3 %v4221_v61 }
 0x441   : > { %v1303_v63 = vpop.permute.xlu1 %1302 }
 0x442   : > { %3906 = vmatpush.xpose.msk.msrb.mxu3 %vm725_vm1, %v1275_v62  ;;  %3910 = vmatpush.xpose.msk.msrb.mxu0 %vm725_vm1, %v1303_v63 }
 0x443   : > { %v1273_v0 = vpop.permute.xlu2 %1272 }
 0x445   : > { %3911 = vmatmul.msk.f32.vlgmr.msrb.gmra.mxu0 %vm725_vm1, %v1271_v56 }
 0x446   : > { %3907 = vmatpush.xpose.msk.msrb.mxu3 %vm725_vm1, %v1273_v0 }
 0x44b   : > { %v1359_v6 = vpop.permute.xlu2 %1358 }
 0x46c   : > { %v1139_v1 = vpop.xlane.xlu1 %1138 }
 0x46d   : > { %4318 = vrcp.f32 %v1139_v1 }
 0x473   : > { %v4319_v2 = vpop.eup %4318 }
 0x474   : > { %v1151_v3 = vmul.f32 %v4319_v2, %v4311_v32 }
 0x476   : > { %3903 = vmatmul.msk.f32.vlgmr.msra.gmra.mxu3 %vm833_vm2, %v1151_v3 }
 0x477   : > { %3915 = vmatpush.xpose.msk.msra.mxu3 %vm725_vm1, %v1361_v5 }
 0x47b   : > { %3916 = vmatpush.xpose.msk.msra.mxu3 %vm725_vm1, %v1359_v6 }
 0x47e   : > { %3908 = vmatmul.msk.f32.vlgmr.msrb.gmra.mxu3 %vm725_vm1, %v1271_v56 }
 0x486   : > { %3917 = vmatmul.msk.f32.vlgmr.msra.gmra.mxu3 %vm725_vm1, %v1271_v56 }
 0x4b0   : > { %v5292_v7 = vpop.f32.mrf.mxu2  ;;  %v5296_v9 = vpop.f32.mrf.mxu0 }
 0x4b8   : > { %v5294_v8 = vpop.f32.mrf.mxu2 }
 0x4c0   : > { %v1355_v10 = vpop.f32.mrf.mxu2 }
 0x4c1   : > { %v1392_v11 = vsel %vm833_vm2, %v1355_v10, -inf }
 0x4c2   : > { %v1327_v12 = vpop.f32.mrf.mxu0  ;;  %1393 = vmax.xlane.f32.xlu2 %v1392_v11 }
 0x4c3   : > { %v1389_v13 = vsel %vm833_vm2, %v1327_v12, -inf }
 0x4c4   : > { %1390 = vmax.xlane.f32.xlu0 %v1389_v13 }
 0x4da   : > { %1550 = vrot.lane.b32.xlu2 %v5123_v23, %s4829_s23 }
 0x4f9   : > { %v5302_v14 = vpop.f32.mrf.mxu3 }
 0x501   : > { %v1299_v15 = vpop.f32.mrf.mxu3 }
 0x502   : > { %v1386_v16 = vsel %vm833_vm2, %v1299_v15, -inf }
 0x503   : > { %1387 = vmax.xlane.f32.xlu1 %v1386_v16 }
 0x509   : > { %v1383_v17 = vpop.f32.mrf.mxu3 }
 0x50a   : > { %v1395_v18 = vsel %vm833_vm2, %v1383_v17, -inf }
 0x50b   : > { %1396 = vmax.xlane.f32.xlu0 %v1395_v18 }
 0x51c   : > { %4223 = vrot.lane.b32.xlu1 %v5267_v21, %s4830_s25 }
 0x51f   : > { %1580 = vrot.lane.b32.xlu0 %v5142_v29, %s4829_s23 }
 0x524   : > { %4228 = vrot.lane.b32.xlu1 %v5200_v4, %s4830_s25 }
 0x527   : > { %1548 = vrot.lane.b32.xlu0 %v5121_v22, %s4829_s23 }
 0x52c   : > { %1578 = vrot.lane.b32.xlu1 %v5146_v30, %s4829_s23 }
 0x52f   : > { %1608 = vrot.lane.b32.xlu0 %v5152_v33, %s4829_s23 }
 0x535   : > { %v1394_v23 = vpop.xlane.xlu2 %1393 }
 0x536   : > { %v1400_v19 = vsub.f32 %v1355_v10, %v1394_v23 }
 0x537   : > { %4233 = vrot.lane.b32.xlu0 %v5131_v25, %s4830_s25  ;;  %v1391_v27 = vpop.xlane.xlu0 %1390 }
 0x538   : > { %v1406_v20 = vmul.f32 1.442695, %v1400_v19  ;;  %v1399_v28 = vsub.f32 %v1327_v12, %v1391_v27 }
 0x53a   : > { %4320 = vpow2.f32 %v1406_v20  ;;  %v1404_v33 = vmul.f32 1.442695, %v1399_v28 }
 0x53c   : > { %4322 = vpow2.f32 %v1404_v33 }
 0x53d   : > { %v1551_v29 = vpop.permute.xlu2 %1550 }
 0x53e   : > { %3922 = vmatpush.xpose.msk.msrb.mxu1 %vm725_vm1, %v1551_v29 }
 0x53f   : > { %4238 = vrot.lane.b32.xlu0 %v5237_v59, %s4830_s25 }
 0x540   : > { %v4321_v22 = vpop.eup %4320 }
 0x541   : > { %v1416_v30 = vsel %vm833_vm2, %v4321_v22, 0.0 }
 0x542   : > { %1417 = vadd.xlane.f32.xlu2 %v1416_v30  ;;  %v4323_v31 = vpop.eup %4322 }
 0x543   : > { %v1413_v32 = vsel %vm833_vm2, %v4323_v31, 0.0 }
 0x547   : > { %1636 = vrot.lane.b32.xlu0 %v5162_v37, %s4829_s23 }
 0x54f   : > { %1634 = vrot.lane.b32.xlu0 %v5168_v39, %s4829_s23 }
 0x556   : > { %1414 = vadd.xlane.f32.xlu1 %v1413_v32 }
 0x55a   : > { %1606 = vrot.lane.b32.xlu2 %v5156_v34, %s4829_s23 }
 0x56f   : > { %1546 = vrot.lane.b32.xlu1 %v5136_v26, %s4829_s23 }
 0x576   : > { %v1388_v37 = vpop.xlane.xlu1 %1387 }
 0x577   : > { %v1398_v40 = vsub.f32 %v1299_v15, %v1388_v37 }
 0x579   : > { %v1402_v42 = vmul.f32 1.442695, %v1398_v40 }
 0x57e   : > { %v1397_v35 = vpop.xlane.xlu0 %1396 }
 0x57f   : > { %v1401_v36 = vsub.f32 %v1383_v17, %v1397_v35 }
 0x581   : > { %v1408_v38 = vmul.f32 1.442695, %v1401_v36 }
 0x583   : > { %4324 = vpow2.f32 %v1408_v38 }
 0x584   : > { %4326 = vpow2.f32 %v1402_v42 }
 0x589   : > { %v5333_v41 = vpop.eup %4324 }
 0x58a   : > { %v1419_v39 = vsel %vm833_vm2, %v5333_v41, 0.0  ;;  %v4327_v26 = vpop.eup %4326 }
 0x58b   : > { %1420 = vadd.xlane.f32.xlu2 %v1419_v39  ;;  %v1410_v48 = vsel %vm833_vm2, %v4327_v26, 0.0 }
 0x58e   : > { %v4224_v43 = vpop.permute.xlu1 %4223 }
 0x58f   : > { %v4225_v44 = vunpack.i.l.bf16 %v4224_v43  ;;  %v4226_v34 = vunpack.i.h.bf16 %v4224_v43 }
 0x591   : > { %v1581_v45 = vpop.permute.xlu0 %1580  ;;  %1482 = vmatpush.msra.mxu2 %v4225_v44 }
 0x593   : > { %1483 = vmatpush.msra.mxu2 %v4226_v34 }
 0x595   : > { %3925 = vmatpush.xpose.msk.msrb.mxu2 %vm725_vm1, %v1581_v45 }
 0x596   : > { %v4229_v46 = vpop.permute.xlu1 %4228 }
 0x597   : > { %v4230_v47 = vunpack.i.l.bf16 %v4229_v46  ;;  %v4231_v49 = vunpack.i.h.bf16 %v4229_v46 }
 0x599   : > { %1411 = vadd.xlane.f32.xlu1 %v1410_v48  ;;  %1511 = vmatpush.msrb.mxu3 %v4230_v47  ;;  %v1549_v53 = vpop.permute.xlu0 %1548 }
 0x59a   : > { %3923 = vmatpush.xpose.msk.msrb.mxu1 %vm725_vm1, %v1549_v53 }
 0x59b   : > { %1512 = vmatpush.msrb.mxu3 %v4231_v49 }
 0x59e   : > { %v1579_v54 = vpop.permute.xlu1 %1578 }
 0x59f   : > { %3926 = vmatpush.xpose.msk.msrb.mxu2 %vm725_vm1, %v1579_v54 }
 0x5a1   : > { %v1609_v55 = vpop.permute.xlu0 %1608 }
 0x5a2   : > { %3928 = vmatpush.xpose.msk.msra.mxu3 %vm725_vm1, %v1609_v55 }
 0x5a9   : > { %v4234_v56 = vpop.permute.xlu0 %4233 }
 0x5aa   : > { %v4235_v57 = vunpack.i.l.bf16 %v4234_v56  ;;  %v4236_v58 = vunpack.i.h.bf16 %v4234_v56 }
 0x5ac   : > { %1453 = vmatpush.msra.mxu0 %v4235_v57 }
 0x5ae   : > { %1454 = vmatpush.msra.mxu0 %v4236_v58 }
 0x5b1   : > { %v4239_v61 = vpop.permute.xlu0 %4238 }
 0x5b2   : > { %v4240_v62 = vunpack.i.l.bf16 %v4239_v61  ;;  %v4241_v63 = vunpack.i.h.bf16 %v4239_v61 }
 0x5b4   : > { %1540 = vmatpush.msrb.mxu0 %v4240_v62 }
 0x5b5   : > { %v1418_v0 = vpop.xlane.xlu2 %1417 }
 0x5b6   : > { %4328 = vrcp.f32 %v1418_v0  ;;  %1541 = vmatpush.msrb.mxu0 %v4241_v63 }
 0x5b9   : > { %v1637_v13 = vpop.permute.xlu0 %1636 }
 0x5bc   : > { %v4329_v1 = vpop.eup %4328 }
 0x5bd   : > { %v1428_v2 = vmul.f32 %v4329_v1, %v4321_v22  ;;  %v1607_v3 = vpop.permute.xlu2 %1606 }
 0x5be   : > { %3929 = vmatpush.xpose.msk.msra.mxu3 %vm725_vm1, %v1607_v3 }
 0x5bf   : > { %3920 = vmatmul.msk.f32.vlgmr.msrb.gmra.mxu3 %vm833_vm2, %v1428_v2 }
 0x5c1   : > { %v1635_v23 = vpop.permute.xlu0 %1634 }
 0x5c9   : > { %v1415_v5 = vpop.xlane.xlu1 %1414 }
 0x5ca   : > { %4330 = vrcp.f32 %v1415_v5 }
 0x5d0   : > { %v4331_v6 = vpop.eup %4330 }
 0x5d1   : > { %v1427_v10 = vmul.f32 %v4331_v6, %v4323_v31 }
 0x5d3   : > { %3919 = vmatmul.msk.f32.vlgmr.msra.gmra.mxu2 %vm833_vm2, %v1427_v10 }
 0x5e1   : > { %v1547_v11 = vpop.permute.xlu1 %1546 }
 0x5e2   : > { %3924 = vmatmul.msk.f32.vlgmr.msrb.gmra.mxu1 %vm725_vm1, %v1547_v11  ;;  %3927 = vmatmul.msk.f32.vlgmr.msrb.gmra.mxu2 %vm725_vm1, %v1547_v11 }
 0x5e3   : > { %3930 = vmatmul.msk.f32.vlgmr.msra.gmra.mxu3 %vm725_vm1, %v1547_v11 }
 0x5fe   : > { %v1421_v15 = vpop.xlane.xlu2 %1420 }
 0x60c   : > { %v1412_v12 = vpop.xlane.xlu1 %1411 }
 0x60d   : > { %4332 = vrcp.f32 %v1412_v12 }
 0x60e   : > { %4334 = vrcp.f32 %v1421_v15 }
 0x613   : > { %v4333_v16 = vpop.eup %4332 }
 0x614   : > { %v1426_v17 = vmul.f32 %v4333_v16, %v4327_v26  ;;  %v4335_v18 = vpop.eup %4334 }
 0x615   : > { %v1429_v19 = vmul.f32 %v4335_v18, %v5333_v41 }
 0x616   : > { %3918 = vmatmul.msk.f32.vlgmr.msra.gmra.mxu0 %vm833_vm2, %v1426_v17 }
 0x617   : > { %3931 = vmatpush.xpose.msk.msra.mxu0 %vm725_vm1, %v1637_v13 }
 0x61b   : > { %3932 = vmatpush.xpose.msk.msra.mxu0 %vm725_vm1, %v1635_v23 }
 0x61e   : > { %3921 = vmatmul.msk.f32.vlgmr.msrb.gmra.mxu0 %vm833_vm2, %v1429_v19 }
 0x626   : > { %3933 = vmatmul.msk.f32.vlgmr.msra.gmra.mxu0 %vm725_vm1, %v1547_v11 }
 0x642   : > { %v5356_v29 = vpop.f32.mrf.mxu3 }
 0x656   : > { %v5354_v20 = vpop.f32.mrf.mxu2 }
 0x65f   : > { %v1575_v22 = vpop.f32.mrf.mxu1 }
 0x660   : > { %v1662_v27 = vsel %vm833_vm2, %v1575_v22, -inf }
 0x661   : > { %1663 = vmax.xlane.f32.xlu0 %v1662_v27  ;;  %v653_v27 = vld [vmem:[#allocation10 + $0x10] sm:$0xff] }
 0x665   : > { %v1603_v30 = vpop.f32.mrf.mxu2 }
 0x666   : > { %v1631_v28 = vpop.f32.mrf.mxu3  ;;  %v1665_v33 = vsel %vm833_vm2, %v1603_v30, -inf }
 0x667   : > { %1666 = vmax.xlane.f32.xlu1 %v1665_v33  ;;  %v1668_v31 = vsel %vm833_vm2, %v1631_v28, -inf }
 0x668   : > { %1669 = vmax.xlane.f32.xlu2 %v1668_v31 }
 0x693   : > { %v1456_v32 = vpop.f32.mrf.mxu0 }
 0x69b   : > { %v5361_v40 = vpop.f32.mrf.mxu0 }
 0x6a3   : > { %v1659_v46 = vpop.f32.mrf.mxu0 }
 0x6a4   : > { %v1671_v53 = vsel %vm833_vm2, %v1659_v46, -inf }
 0x6d4   : > { %v1664_v35 = vpop.xlane.xlu0 %1663 }
 0x6d5   : > { %v1674_v36 = vsub.f32 %v1575_v22, %v1664_v35  ;;  %v654_v22 = vld [vmem:[#allocation10 + $0x18] sm:$0xff] }
 0x6d7   : > { %v1678_v38 = vmul.f32 1.442695, %v1674_v36 }
 0x6d9   : > { %4336 = vpow2.f32 %v1678_v38  ;;  %v1942_v38 = vld [vmem:[#allocation11 + $0x18] sm:$0xff] }
 0x6da   : > { %v1667_v37 = vpop.xlane.xlu1 %1666 }
 0x6db   : > { %v1675_v41 = vsub.f32 %v1603_v30, %v1667_v37  ;;  %v1670_v39 = vpop.xlane.xlu2 %1669 }
 0x6dc   : > { %v1676_v42 = vsub.f32 %v1631_v28, %v1670_v39  ;;  %v651_v28 = vld [vmem:[#allocation10] sm:$0xff] }
 0x6dd   : > { %v1680_v43 = vmul.f32 1.442695, %v1675_v41 }
 0x6de   : > { %v1682_v44 = vmul.f32 1.442695, %v1676_v42 }
 0x6df   : > { %v4337_v34 = vpop.eup %4336  ;;  %4338 = vpow2.f32 %v1680_v43 }
 0x6e0   : > { %4340 = vpow2.f32 %v1682_v44  ;;  %v1686_v45 = vsel %vm833_vm2, %v4337_v34, 0.0 }
 0x6e1   : > { %1687 = vadd.xlane.f32.xlu1 %v1686_v45 }
 0x6e5   : > { %v4339_v26 = vpop.eup %4338 }
 0x6e6   : > { %v4341_v47 = vpop.eup %4340  ;;  %v1689_v48 = vsel %vm833_vm2, %v4339_v26, 0.0 }
 0x6e7   : > { %1690 = vadd.xlane.f32.xlu2 %v1689_v48  ;;  %v1692_v49 = vsel %vm833_vm2, %v4341_v47, 0.0 }
 0x6e8   : > { %1693 = vadd.xlane.f32.xlu0 %v1692_v49  ;;  %v1941_v49 = vld [vmem:[#allocation11 + $0x10] sm:$0xff] }
 0x6e9   : > { %1672 = vmax.xlane.f32.xlu1 %v1671_v53  ;;  %v1940_v53 = vld [vmem:[#allocation11 + $0x8] sm:$0xff] }
 0x6fc   : > { %4253 = vrot.lane.b32.xlu0 %v5200_v4, %s4831_s28 }
 0x6ff   : > { %4243 = vrot.lane.b32.xlu2 %v5131_v25, %s4831_s28 }
 0x702   : > { %4248 = vrot.lane.b32.xlu1 %v5267_v21, %s4831_s28 }
 0x704   : > { %1842 = vrot.lane.b32.xlu0 %v1456_v32, %s4832_s2 }
 0x70a   : > { %4258 = vrot.lane.b32.xlu1 %v5237_v59, %s4831_s28 }
 0x70c   : > { %1828 = vrot.lane.b32.xlu0 %v5302_v14, %s4833_s12 }
 0x712   : > { %1826 = vrot.lane.b32.xlu1 %v5292_v7, %s4833_s12 }
 0x754   : > { %v1688_v4 = vpop.xlane.xlu1 %1687 }
 0x755   : > { %4342 = vrcp.f32 %v1688_v4  ;;  %v1991_v4 = vld [vmem:[#allocation13 + $0x18] sm:$0xff] }
 0x75a   : > { %v1691_v54 = vpop.xlane.xlu2 %1690 }
 0x75b   : > { %v4343_v57 = vpop.eup %4342  ;;  %v1694_v62 = vpop.xlane.xlu0 %1693 }
 0x75c   : > { %v1673_v55 = vpop.xlane.xlu1 %1672  ;;  %v1702_v59 = vmul.f32 %v4343_v57, %v4337_v34 }
 0x75d   : > { %v1677_v25 = vsub.f32 %v1659_v46, %v1673_v55  ;;  %v1990_v55 = vld [vmem:[#allocation13 + $0x10] sm:$0xff] }
 0x75f   : > { %v1684_v56 = vmul.f32 1.442695, %v1677_v25  ;;  %v1988_v25 = vld [vmem:[#allocation13] sm:$0xff] }
 0x761   : > { %4344 = vpow2.f32 %v1684_v56 }
 0x762   : > { %v4244_v21 = vpop.permute.xlu2 %4243  ;;  %4346 = vrcp.f32 %v1694_v62 }
 0x763   : > { %v4245_v58 = vunpack.i.l.bf16 %v4244_v21  ;;  %v4246_v61 = vunpack.i.h.bf16 %v4244_v21  ;;  %4348 = vrcp.f32 %v1691_v54  ;;  %v1939_v54 = vld [vmem:[#allocation11] sm:$0xff] }
 0x765   : > { %1729 = vmatpush.msra.mxu1 %v4245_v58 }
 0x767   : > { %v4345_v63 = vpop.eup %4344  ;;  %1730 = vmatpush.msra.mxu1 %v4246_v61 }
 0x768   : > { %3934 = vmatmul.msk.f32.vlgmr.msra.gmra.mxu1 %vm833_vm2, %v1702_v59  ;;  %v1695_v7 = vsel %vm833_vm2, %v4345_v63, 0.0  ;;  %v4347_v0 = vpop.eup %4346 }
 0x769   : > { %1696 = vadd.xlane.f32.xlu2 %v1695_v7  ;;  %v1704_v3 = vmul.f32 %v4347_v0, %v4341_v47  ;;  %v4349_v6 = vpop.eup %4348 }
 0x76a   : > { %v1703_v12 = vmul.f32 %v4349_v6, %v4339_v26 }
 0x76e   : > { %v4254_v14 = vpop.permute.xlu0 %4253 }
 0x76f   : > { %v4255_v1 = vunpack.i.l.bf16 %v4254_v14  ;;  %v4256_v2 = vunpack.i.h.bf16 %v4254_v14 }
 0x771   : > { %1787 = vmatpush.msrb.mxu3 %v4255_v1  ;;  %v4480_v1 = vld [vmem:[%s5076_s10] sm:$0xff] }
 0x773   : > { %1788 = vmatpush.msrb.mxu3 %v4256_v2  ;;  %v4481_v2 = vld [vmem:[%s5076_s10 + $0x8] sm:$0xff] }
 0x774   : > { %3936 = vmatmul.msk.f32.vlgmr.msrb.gmra.mxu3 %vm833_vm2, %v1704_v3  ;;  %v4249_v5 = vpop.permute.xlu1 %4248 }
 0x775   : > { %v4250_v10 = vunpack.i.l.bf16 %v4249_v5  ;;  %v4251_v11 = vunpack.i.h.bf16 %v4249_v5  ;;  %2025 = vmatpush.msra.mxu3 %v1991_v4 }
 0x776   : > { %v1843_v31 = vpop.permute.xlu0 %1842 }
 0x777   : > { %1758 = vmatpush.msra.mxu2 %v4250_v10  ;;  %2026 = vmatpush.msra.mxu3 %v1990_v55  ;;  %v4483_v10 = vld [vmem:[%s5076_s10 + $0x18] sm:$0xff] }
 0x779   : > { %1759 = vmatpush.msra.mxu2 %v4251_v11 }
 0x77a   : > { %3935 = vmatmul.msk.f32.vlgmr.msra.gmra.mxu2 %vm833_vm2, %v1703_v12 }
 0x77b   : > { %1914 = vmatpush.msrb.mxu2 %v654_v22 }
 0x77c   : > { %v4259_v13 = vpop.permute.xlu1 %4258 }
 0x77d   : > { %v4260_v15 = vunpack.i.l.bf16 %v4259_v13  ;;  %v4261_v16 = vunpack.i.h.bf16 %v4259_v13  ;;  %1915 = vmatpush.msrb.mxu2 %v653_v27 }
 0x77f   : > { %1816 = vmatpush.msrb.mxu0 %v4260_v15 }
 0x781   : > { %1846 = vrot.lane.b32.xlu2 %v5356_v29, %s4832_s2  ;;  %1817 = vmatpush.msrb.mxu0 %v4261_v16  ;;  %v4484_v16 = vld [vmem:[%s5076_s10 + $0x20] sm:$0xff] }
 0x784   : > { %v1827_v33 = vpop.permute.xlu1 %1826 }
 0x7dc   : > { %v1697_v17 = vpop.xlane.xlu2 %1696 }
 0x7dd   : > { %4350 = vrcp.f32 %v1697_v17 }
 0x7e3   : > { %v4351_v18 = vpop.eup %4350 }
 0x7e4   : > { %v1705_v23 = vmul.f32 %v4351_v18, %v4345_v63  ;;  %v1847_v26 = vpop.permute.xlu2 %1846  ;;  %v4284_v63 = vld [vmem:[%s6023_s7] ss:$0 sm:$0xff]  ;;  %v4485_v18 = vld [vmem:[%s5076_s10 + $0x28] sm:$0xff] }
 0x7e5   : > { %v1732_v19 = vpop.f32.mrf.mxu1 }
 0x7e6   : > { %3937 = vmatmul.msk.f32.vlgmr.msrb.gmra.mxu0 %vm833_vm2, %v1705_v23  ;;  %1858 = vrot.lane.b32.xlu1 %v1732_v19, %s4834_s6  ;;  %v4486_v23 = vld [vmem:[%s5076_s10 + $0x30] sm:$0xff]  ;;  %v4487_v19 = vld [vmem:[%s5076_s10 + $0x38] sm:$0xff] }
 0x7ee   : > { %1844 = vrot.lane.b32.xlu1 %v5354_v20, %s4832_s2  ;;  %v652_v20 = vld [vmem:[#allocation10 + $0x8] sm:$0xff] }
 0x7ef   : > { %1916 = vmatpush.msrb.mxu2 %v652_v20  ;;  %v4285_v20 = vld [vmem:[%s6025_s9] ss:$0 sm:$0xff] }
 0x7f1   : > { %1917 = vmatpush.msrb.mxu2 %v651_v28 }
 0x7f3   : > { %1959 = vmatpush.msra.mxu2 %v1942_v38 }
 0x7f5   : > { %1960 = vmatpush.msra.mxu2 %v1941_v49 }
 0x7f6   : > { %1830 = vrot.lane.b32.xlu1 %v5296_v9, %s4833_s12  ;;  %v1870_v9 = vsel %vm725_vm1, %v5226_v50, %v1827_v33 }
 0x7f7   : > { %v1790_v30 = vpop.f32.mrf.mxu3  ;;  %v1874_v32 = vsel %vm833_vm2, %v1870_v9, %v1843_v31  ;;  %1961 = vmatpush.msra.mxu2 %v1940_v53  ;;  %v4286_v9 = vld [vmem:[%s6027_s11] ss:$0 sm:$0xff] }
 0x7f9   : > { %1962 = vmatpush.msra.mxu2 %v1939_v54 }
 0x7fd   : > { %v1761_v29 = vpop.f32.mrf.mxu2 }
 0x7fe   : > { %1860 = vrot.lane.b32.xlu0 %v1761_v29, %s4834_s6  ;;  %1832 = vrot.lane.b32.xlu1 %v5294_v8, %s4833_s12 }
 0x806   : > { %1862 = vrot.lane.b32.xlu0 %v1790_v30, %s4834_s6 }
 0x80e   : > { %1848 = vrot.lane.b32.xlu0 %v5361_v40, %s4832_s2  ;;  %v1829_v40 = vpop.permute.xlu0 %1828 }
 0x80f   : > { %v1871_v50 = vsel %vm725_vm1, %v5228_v51, %v1829_v40 }
 0x858   : > { %v1859_v35 = vpop.permute.xlu1 %1858 }
 0x859   : > { %v1879_v8 = vsel %vm1878_vm3, %v1874_v32, %v1859_v35 }
 0x85a   : > { %v1883_v36 = vadd.f32 %v1879_v8, %v5125_v24 }
 0x85c   : > { %3938 = vmatmul.msk.f32.vlgmr.msrb.gmra.mxu2 %vm622_vm0, %v1883_v36 }
 0x860   : > { %v1845_v41 = vpop.permute.xlu1 %1844 }
 0x861   : > { %v1875_v39 = vsel %vm833_vm2, %v1871_v50, %v1845_v41 }
 0x863   : > { %v1819_v37 = vpop.f32.mrf.mxu0 }
 0x864   : > { %1864 = vrot.lane.b32.xlu1 %v1819_v37, %s4834_s6 }
 0x868   : > { %v1831_v44 = vpop.permute.xlu1 %1830 }
 0x869   : > { %v1872_v45 = vsel %vm725_vm1, %v5249_v60, %v1831_v44  ;;  %v1989_v60 = vld [vmem:[#allocation13 + $0x8] sm:$0xff] }
 0x86a   : > { %v1876_v47 = vsel %vm833_vm2, %v1872_v45, %v1847_v26  ;;  %2027 = vmatpush.msra.mxu3 %v1989_v60 }
 0x86c   : > { %2028 = vmatpush.msra.mxu3 %v1988_v25 }
 0x870   : > { %v1861_v42 = vpop.permute.xlu0 %1860  ;;  %v1833_v56 = vpop.permute.xlu1 %1832 }
 0x871   : > { %v1880_v43 = vsel %vm1878_vm3, %v1875_v39, %v1861_v42  ;;  %v1873_v57 = vsel %vm725_vm1, %v5230_v52, %v1833_v56 }
 0x872   : > { %v1884_v34 = vadd.f32 %v1880_v43, %v5125_v24 }
 0x874   : > { %3939 = vmatmul.msk.f32.gmra.mxu2 %vm622_vm0, %v1884_v34 }
 0x878   : > { %v1863_v46 = vpop.permute.xlu0 %1862 }
 0x879   : > { %v1881_v48 = vsel %vm1878_vm3, %v1876_v47, %v1863_v46 }
 0x87a   : > { %v1885_v51 = vadd.f32 %v1881_v48, %v5125_v24 }
 0x87c   : > { %3940 = vmatmul.msk.f32.gmra.mxu2 %vm622_vm0, %v1885_v51 }
 0x880   : > { %v1849_v21 = vpop.permute.xlu0 %1848 }
 0x881   : > { %v1877_v58 = vsel %vm833_vm2, %v1873_v57, %v1849_v21 }
 0x8d6   : > { %v1865_v61 = vpop.permute.xlu1 %1864 }
 0x8d7   : > { %v1882_v59 = vsel %vm1878_vm3, %v1877_v58, %v1865_v61 }
 0x8d8   : > { %v1886_v62 = vadd.f32 %v1882_v59, %v5125_v24  ;;  %v4482_v24 = vld [vmem:[%s5076_s10 + $0x10] sm:$0xff] }
 0x8da   : > { %3941 = vmatmul.msk.f32.gmra.mxu2 %vm622_vm0, %v1886_v62 }
 0x8df   : > { %v1919_v7 = vpop.f32.mrf.mxu2 }
 0x8e0   : > { %v1920_v14 = vadd.f32 %v4284_v63, %v1919_v7 }
 0x8e2   : > { %v1931_v0 = vmax.f32 %v1920_v14, 0.0  ;;  %3942 = vmatmul.msk.f32.vlgmr.msra.gmra.mxu2 %vm622_vm0, %v4480_v1 }
 0x8e4   : > { %v1935_v52 = vadd.f32 %v1931_v0, %v1883_v36 }
 0x8e6   : > { %3950 = vmatmul.msk.f32.vlgmr.msra.gmra.mxu3 %vm622_vm0, %v1935_v52 }
 0x8ea   : > { %3943 = vmatmul.msk.f32.gmra.mxu2 %vm622_vm0, %v4481_v2 }
 0x8f2   : > { %3944 = vmatmul.msk.f32.gmra.mxu2 %vm622_vm0, %v4482_v24 }
 0x8f7   : > { %v1922_v3 = vpop.f32.mrf.mxu2 }
 0x8f8   : > { %v1923_v5 = vadd.f32 %v4284_v63, %v1922_v3 }
 0x8fa   : > { %v1932_v6 = vmax.f32 %v1923_v5, 0.0  ;;  %3945 = vmatmul.msk.f32.gmra.mxu2 %vm622_vm0, %v4483_v10 }
 0x8fc   : > { %v1936_v11 = vadd.f32 %v1932_v6, %v1884_v34 }
 0x8fe   : > { %3951 = vmatmul.msk.f32.gmra.mxu3 %vm622_vm0, %v1936_v11 }
 0x8ff   : > { %v1925_v12 = vpop.f32.mrf.mxu2 }
 0x900   : > { %v1926_v13 = vadd.f32 %v4284_v63, %v1925_v12 }
 0x902   : > { %v1933_v15 = vmax.f32 %v1926_v13, 0.0  ;;  %3946 = vmatmul.msk.f32.gmra.mxu2 %vm622_vm0, %v4484_v16 }
 0x904   : > { %v1937_v17 = vadd.f32 %v1933_v15, %v1885_v51 }
 0x906   : > { %3952 = vmatmul.msk.f32.gmra.mxu3 %vm622_vm0, %v1937_v17 }
 0x90a   : > { %3947 = vmatmul.msk.f32.gmra.mxu2 %vm622_vm0, %v4485_v18 }
 0x912   : > { %3948 = vmatmul.msk.f32.gmra.mxu2 %vm622_vm0, %v4486_v23 }
 0x91a   : > { %3949 = vmatmul.msk.f32.gmra.mxu2 %vm622_vm0, %v4487_v19 }
 0x95d   : > { %v1928_v22 = vpop.f32.mrf.mxu2 }
 0x95e   : > { %v1929_v27 = vadd.f32 %v4284_v63, %v1928_v22 }
 0x960   : > { %v1934_v29 = vmax.f32 %v1929_v27, 0.0 }
 0x962   : > { %v1938_v30 = vadd.f32 %v1934_v29, %v1886_v62 }
 0x964   : > { %3953 = vmatmul.msk.f32.gmra.mxu3 %vm622_vm0, %v1938_v30 }
 0x965   : > { %v1964_v28 = vpop.f32.mrf.mxu2 }
 0x966   : > { %v5449_v33 = vadd.f32 %v4285_v20, %v1964_v28 }
 0x968   : > { %v5455_v31 = vmul.f32 0.17677669, %v5449_v33 }
 0x969   : > { %v2030_v32 = vpop.f32.mrf.mxu3 }
 0x96a   : > { %v5457_v35 = vadd.f32 %v4286_v9, %v2030_v32  ;;  %2394 = vrot.lane.b32.xlu2 %v5455_v31, %s4826_s14 }
 0x96c   : > { %2398 = vrot.lane.b32.xlu0 %v5457_v35, %s4826_s14  ;;  %3954 = vmatpush.xpose.msk.msra.mxu0 %vm725_vm1, %v5457_v35 }
 0x96d   : > { %v1967_v8 = vpop.f32.mrf.mxu2 }
 0x96e   : > { %v5465_v36 = vadd.f32 %v4285_v20, %v1967_v8 }
 0x96f   : > { %3955 = vmatmul.msk.f32.vlgmr.msra.gmra.mxu0 %vm725_vm1, %v5455_v31 }
 0x970   : > { %v5470_v38 = vmul.f32 0.17677669, %v5465_v36 }
 0x975   : > { %v1970_v37 = vpop.f32.mrf.mxu2 }
 0x976   : > { %v5472_v40 = vadd.f32 %v4285_v20, %v1970_v37 }
 0x977   : > { %3956 = vmatmul.msk.f32.gmra.mxu0 %vm725_vm1, %v5470_v38 }
 0x978   : > { %v5477_v41 = vmul.f32 0.17677669, %v5472_v40 }
 0x97a   : > { %2429 = vrot.lane.b32.xlu1 %v5477_v41, %s4826_s14 }
 0x97d   : > { %v1973_v50 = vpop.f32.mrf.mxu2 }
 0x97e   : > { %v5481_v39 = vadd.f32 %v4285_v20, %v1973_v50 }
 0x980   : > { %v5484_v42 = vmul.f32 0.17677669, %v5481_v39 }
 0x981   : > { %v2033_v43 = vpop.f32.mrf.mxu3 }
 0x982   : > { %v5486_v44 = vadd.f32 %v4286_v9, %v2033_v43  ;;  %2431 = vrot.lane.b32.xlu0 %v5484_v42, %s4826_s14 }
 0x984   : > { %3957 = vmatpush.xpose.msk.msrb.mxu0 %vm725_vm1, %v5486_v44 }
 0x985   : > { %v1976_v34 = vpop.f32.mrf.mxu2 }
 0x986   : > { %v5494_v45 = vadd.f32 %v4285_v20, %v1976_v34 }
 0x987   : > { %3958 = vmatmul.msk.f32.vlgmr.msrb.gmra.mxu0 %vm725_vm1, %v5477_v41 }
 0x988   : > { %v5501_v47 = vmul.f32 0.17677669, %v5494_v45 }
 0x989   : > { %v2036_v26 = vpop.f32.mrf.mxu3 }
 0x98a   : > { %v5496_v46 = vadd.f32 %v4286_v9, %v2036_v26  ;;  %2433 = vrot.lane.b32.xlu0 %v5486_v44, %s4826_s14 }
 0x98c   : > { %3960 = vmatpush.xpose.msk.msrb.mxu3 %vm725_vm1, %v5496_v46  ;;  %v4262_v48 = vpack.i.bf16 %v5496_v46, %v5486_v44 }
 0x98d   : > { %v1979_v51 = vpop.f32.mrf.mxu2 }
 0x98e   : > { %4263 = vrot.lane.b32.xlu2 %v4262_v48, %s4825_s26  ;;  %v5514_v49 = vadd.f32 %v4285_v20, %v1979_v51 }
 0x98f   : > { %3959 = vmatmul.msk.f32.gmra.mxu0 %vm725_vm1, %v5484_v42  ;;  %3961 = vmatmul.msk.f32.vlgmr.msrb.gmra.mxu3 %vm725_vm1, %v5501_v47 }
 0x990   : > { %v5517_v53 = vmul.f32 0.17677669, %v5514_v49 }
 0x995   : > { %v1982_v54 = vpop.f32.mrf.mxu2 }
 0x996   : > { %2468 = vrot.lane.b32.xlu2 %v5496_v46, %s4826_s14  ;;  %v5523_v55 = vadd.f32 %v4285_v20, %v1982_v54 }
 0x997   : > { %3962 = vmatmul.msk.f32.gmra.mxu3 %vm725_vm1, %v5517_v53 }
 0x998   : > { %v5528_v21 = vmul.f32 0.17677669, %v5523_v55 }
 0x99d   : > { %v1985_v61 = vpop.f32.mrf.mxu2 }
 0x99e   : > { %v5536_v7 = vadd.f32 %v4285_v20, %v1985_v61 }
 0x9a0   : > { %v5539_v0 = vmul.f32 0.17677669, %v5536_v7 }
 0x9c4   : > { %v5521_v4 = vpop.permute.xlu2 %2394 }
 0x9de   : > { %v2399_v59 = vpop.permute.xlu0 %2398 }
 0x9e7   : > { %v2039_v60 = vpop.f32.mrf.mxu3 }
 0x9e8   : > { %v5525_v25 = vadd.f32 %v4286_v9, %v2039_v60  ;;  %v4264_v56 = vpop.permute.xlu2 %4263 }
 0x9e9   : > { %v4266_v57 = vunpack.i.h.bf16 %v4264_v56  ;;  %v4265_v58 = vunpack.i.l.bf16 %v4264_v56 }
 0x9ea   : > { %3963 = vmatpush.xpose.msk.msra.mxu3 %vm725_vm1, %v5525_v25 }
 0x9eb   : > { %2322 = vmatpush.msrb.mxu1 %v4265_v58 }
 0x9ec   : > { %v2076_v62 = vpop.f32.mrf.mxu0  ;;  %v2430_v3 = vpop.permute.xlu1 %2429 }
 0x9ed   : > { %3974 = vmatpush.xpose.msk.msra.mxu1 %vm725_vm1, %v2399_v59  ;;  %3964 = vmatmul.msk.f32.vlgmr.msra.gmra.mxu3 %vm725_vm1, %v5528_v21  ;;  %v2178_v63 = vsel %vm725_vm1, %v2076_v62, -inf }
 0x9ee   : > { %2354 = vmatpush.msrb.mxu3 %v4266_v57  ;;  %2179 = vmax.xlane.f32.xlu1 %v2178_v63 }
 0x9f0   : > { %v2469_v14 = vpop.permute.xlu2 %2468 }
 0x9f1   : > { %3980 = vmatpush.xpose.msk.msra.mxu3 %vm725_vm1, %v2469_v14 }
 0x9f4   : > { %v2432_v1 = vpop.permute.xlu0 %2431  ;;  %v5542_v52 = vpop.f32.mrf.mxu0 }
 0x9f5   : > { %3965 = vmatmul.msk.f32.gmra.mxu3 %vm725_vm1, %v5539_v0  ;;  %v2181_v2 = vsel %vm725_vm1, %v5542_v52, -inf }
 0x9f6   : > { %2182 = vmax.xlane.f32.xlu2 %v2181_v2 }
 0x9fc   : > { %v2434_v24 = vpop.permute.xlu0 %2433 }
 0x9fd   : > { %3977 = vmatpush.xpose.msk.msrb.mxu2 %vm725_vm1, %v2434_v24 }
 0xa00   : > { %3978 = vmatmul.msk.f32.vlgmr.msrb.gmra.mxu2 %vm725_vm1, %v2430_v3 }
 0xa04   : > { %v2108_v5 = vpop.f32.mrf.mxu0 }
 0xa05   : > { %v2184_v6 = vsel %vm725_vm1, %v2108_v5, -inf }
 0xa06   : > { %2185 = vmax.xlane.f32.xlu0 %v2184_v6 }
 0xa08   : > { %3979 = vmatmul.msk.f32.gmra.mxu2 %vm725_vm1, %v2432_v1 }
 0xa0c   : > { %v2111_v10 = vpop.f32.mrf.mxu0 }
 0xa0d   : > { %v2187_v11 = vsel %vm725_vm1, %v2111_v10, -inf }
 0xa0e   : > { %2188 = vmax.xlane.f32.xlu1 %v2187_v11 }
 0xa12   : > { %v2140_v12 = vpop.f32.mrf.mxu3 }
 0xa13   : > { %v2190_v13 = vsel %vm725_vm1, %v2140_v12, -inf }
 0xa14   : > { %2191 = vmax.xlane.f32.xlu2 %v2190_v13 }
 0xa1a   : > { %v2143_v18 = vpop.f32.mrf.mxu3 }
 0xa1b   : > { %v2193_v27 = vsel %vm725_vm1, %v2143_v18, -inf }
 0xa61   : > { %v2180_v15 = vpop.xlane.xlu1 %2179 }
 0xa62   : > { %v2202_v16 = vsub.f32 %v2076_v62, %v2180_v15 }
 0xa64   : > { %v2210_v17 = vmul.f32 1.442695, %v2202_v16 }
 0xa66   : > { %4352 = vpow2.f32 %v2210_v17 }
 0xa69   : > { %v5558_v8 = vpop.xlane.xlu2 %2182 }
 0xa6c   : > { %v4353_v23 = vpop.eup %4352 }
 0xa6d   : > { %v2226_v19 = vsel %vm725_vm1, %v4353_v23, 0.0 }
 0xa6e   : > { %2227 = vadd.xlane.f32.xlu0 %v2226_v19 }
 0xa70   : > { %v2172_v22 = vpop.f32.mrf.mxu3 }
 0xa71   : > { %v2196_v9 = vsel %vm725_vm1, %v2172_v22, -inf }
 0xa76   : > { %2194 = vmax.xlane.f32.xlu0 %v2193_v27 }
 0xa78   : > { %v2175_v29 = vpop.f32.mrf.mxu3 }
 0xa79   : > { %v2186_v30 = vpop.xlane.xlu0 %2185  ;;  %v2199_v20 = vsel %vm725_vm1, %v2175_v29, -inf }
 0xa7a   : > { %v2204_v28 = vsub.f32 %v2108_v5, %v2186_v30  ;;  %2200 = vmax.xlane.f32.xlu2 %v2199_v20 }
 0xa7c   : > { %v2214_v32 = vmul.f32 1.442695, %v2204_v28 }
 0xa7e   : > { %4354 = vpow2.f32 %v2214_v32  ;;  %2197 = vmax.xlane.f32.xlu0 %v2196_v9 }
 0xa81   : > { %v2189_v37 = vpop.xlane.xlu1 %2188 }
 0xa82   : > { %v2205_v50 = vsub.f32 %v2111_v10, %v2189_v37 }
 0xa84   : > { %v4355_v43 = vpop.eup %4354  ;;  %v2216_v34 = vmul.f32 1.442695, %v2205_v50  ;;  %v2203_v50 = vsub.f32 %v5542_v52, %v5558_v8 }
 0xa85   : > { %v2232_v26 = vsel %vm725_vm1, %v4355_v43, 0.0 }
 0xa86   : > { %4356 = vpow2.f32 %v2216_v34  ;;  %2233 = vadd.xlane.f32.xlu1 %v2232_v26  ;;  %v2458_v34 = vpop.f32.mrf.mxu2 }
 0xa87   : > { %v2192_v48 = vpop.xlane.xlu2 %2191 }
 0xa88   : > { %v2206_v51 = vsub.f32 %v2140_v12, %v2192_v48 }
 0xa8a   : > { %v2218_v54 = vmul.f32 1.442695, %v2206_v51 }
 0xa8c   : > { %v4357_v60 = vpop.eup %4356  ;;  %4358 = vpow2.f32 %v2218_v54 }
 0xa8d   : > { %v2235_v56 = vsel %vm725_vm1, %v4357_v60, 0.0 }
 0xa8e   : > { %2236 = vadd.xlane.f32.xlu0 %v2235_v56  ;;  %v2461_v48 = vpop.f32.mrf.mxu2 }
 0xa8f   : > { %v2543_v51 = vsel %vm725_vm1, %v2461_v48, -inf }
 0xa92   : > { %v4359_v57 = vpop.eup %4358  ;;  %2464 = vrot.lane.b32.xlu2 %v5501_v47, %s4826_s14 }
 0xa93   : > { %v2238_v58 = vsel %vm725_vm1, %v4359_v57, 0.0 }
 0xa94   : > { %2239 = vadd.xlane.f32.xlu1 %v2238_v58 }
 0xa9a   : > { %2266 = vrot.lane.b32.xlu2 %v5457_v35, %s4825_s26 }
 0xaa2   : > { %2362 = vrot.lane.b32.xlu0 %v5525_v25, %s4825_s26  ;;  %2466 = vrot.lane.b32.xlu2 %v5517_v53, %s4826_s14 }
 0xae1   : > { %v2228_v61 = vpop.xlane.xlu0 %2227 }
 0xae9   : > { %v2195_v59 = vpop.xlane.xlu0 %2194 }
 0xaea   : > { %v2207_v62 = vsub.f32 %v2143_v18, %v2195_v59 }
 0xaec   : > { %v2220_v63 = vmul.f32 1.442695, %v2207_v62 }
 0xaed   : > { %v2201_v14 = vpop.xlane.xlu2 %2200 }
 0xaee   : > { %4360 = vpow2.f32 %v2220_v63  ;;  %v2209_v1 = vsub.f32 %v2175_v29, %v2201_v14  ;;  %v4267_v63 = vpack.i.bf16 %v5457_v35, %v5486_v44 }
 0xaf0   : > { %v2224_v2 = vmul.f32 1.442695, %v2209_v1 }
 0xaf1   : > { %v2198_v24 = vpop.xlane.xlu0 %2197 }
 0xaf2   : > { %4362 = vpow2.f32 %v2224_v2  ;;  %v2208_v3 = vsub.f32 %v2172_v22, %v2198_v24 }
 0xaf3   : > { %4364 = vrcp.f32 %v2228_v61 }
 0xaf4   : > { %v4361_v5 = vpop.eup %4360  ;;  %v2222_v6 = vmul.f32 1.442695, %v2208_v3 }
 0xaf5   : > { %v2465_v10 = vpop.permute.xlu2 %2464  ;;  %v2241_v11 = vsel %vm725_vm1, %v4361_v5, 0.0 }
 0xaf6   : > { %4366 = vpow2.f32 %v2222_v6  ;;  %2242 = vadd.xlane.f32.xlu1 %v2241_v11 }
 0xaf8   : > { %v5572_v12 = vpop.eup %4362 }
 0xaf9   : > { %v2234_v13 = vpop.xlane.xlu1 %2233  ;;  %v2247_v15 = vsel %vm725_vm1, %v5572_v12, 0.0  ;;  %v4365_v16 = vpop.eup %4364 }
 0xafa   : > { %4368 = vrcp.f32 %v2234_v13  ;;  %2248 = vadd.xlane.f32.xlu0 %v2247_v15  ;;  %v2258_v18 = vmul.f32 %v4365_v16, %v4353_v23 }
 0xafc   : > { %v5576_v17 = vpop.eup %4366 }
 0xafd   : > { %v2267_v19 = vpop.permute.xlu2 %2266  ;;  %v2244_v22 = vsel %vm725_vm1, %v5576_v17, 0.0 }
 0xafe   : > { %2245 = vadd.xlane.f32.xlu2 %v2244_v22  ;;  %2290 = vmatpush.msra.mxu0 %v2267_v19 }
 0xaff   : > { %3966 = vmatmul.msk.f32.vlgmr.msra.gmra.mxu0 %vm725_vm1, %v2258_v18 }
 0xb00   : > { %v4369_v27 = vpop.eup %4368 }
 0xb01   : > { %v2260_v29 = vmul.f32 %v4369_v27, %v4355_v43  ;;  %v2237_v30 = vpop.xlane.xlu0 %2236  ;;  %v2212_v43 = vmul.f32 1.442695, %v2203_v50 }
 0xb02   : > { %4370 = vrcp.f32 %v2237_v30 }
 0xb03   : > { %3968 = vmatmul.msk.f32.vlgmr.msrb.gmra.mxu1 %vm725_vm1, %v2260_v29 }
 0xb05   : > { %v2467_v58 = vpop.permute.xlu2 %2466 }
 0xb07   : > { %v2240_v20 = vpop.xlane.xlu1 %2239 }
 0xb08   : > { %v4371_v28 = vpop.eup %4370  ;;  %4372 = vrcp.f32 %v2240_v20 }
 0xb09   : > { %v2261_v9 = vmul.f32 %v4371_v28, %v4357_v60  ;;  %4374 = vpow2.f32 %v2212_v43  ;;  %v2540_v60 = vsel %vm725_vm1, %v2458_v34, -inf }
 0xb0b   : > { %3969 = vmatmul.msk.f32.gmra.mxu1 %vm725_vm1, %v2261_v9 }
 0xb0e   : > { %v4373_v23 = vpop.eup %4372  ;;  %2501 = vrot.lane.b32.xlu0 %v5539_v0, %s4826_s14 }
 0xb0f   : > { %v2262_v32 = vmul.f32 %v4373_v23, %v4359_v57  ;;  %2396 = vrot.lane.b32.xlu1 %v5470_v38, %s4826_s14  ;;  %v4375_v26 = vpop.eup %4374 }
 0xb11   : > { %3970 = vmatmul.msk.f32.vlgmr.msrb.gmra.mxu3 %vm725_vm1, %v2262_v32 }
 0xb13   : > { %3975 = vmatmul.msk.f32.vlgmr.msra.gmra.mxu1 %vm725_vm1, %v5521_v4  ;;  %v2229_v4 = vsel %vm725_vm1, %v4375_v26, 0.0 }
 0xb14   : > { %v2363_v37 = vpop.permute.xlu0 %2362 }
 0xb15   : > { %2386 = vmatpush.msrb.mxu0 %v2363_v37 }
 0xb16   : > { %2499 = vrot.lane.b32.xlu2 %v5528_v21, %s4826_s14  ;;  %2789 = vrot.lane.b32.xlu0 %v5486_v44, %s4828_s0 }
 0xb1e   : > { %2785 = vrot.lane.b32.xlu0 %v5477_v41, %s4828_s0 }
 0xb39   : > { %2230 = vadd.xlane.f32.xlu1 %v2229_v4 }
 0xb3f   : > { %2544 = vmax.xlane.f32.xlu2 %v2543_v51 }
 0xb52   : > { %2503 = vrot.lane.b32.xlu1 %v5525_v25, %s4826_s14  ;;  %s6060_s14 = sld [smem:[#allocation32_spill]] }
 0xb57   : > { %2686 = vrot.lane.b32.xlu2 %v5496_v46, %s4827_s19 }
 0xb69   : > { %v2243_v54 = vpop.xlane.xlu1 %2242 }
 0xb6a   : > { %4376 = vrcp.f32 %v2243_v54 }
 0xb6d   : > { %v2249_v6 = vpop.xlane.xlu0 %2248 }
 0xb70   : > { %v4377_v52 = vpop.eup %4376 }
 0xb71   : > { %v2263_v8 = vmul.f32 %v4377_v52, %v4361_v5  ;;  %v2246_v14 = vpop.xlane.xlu2 %2245 }
 0xb73   : > { %3971 = vmatmul.msk.f32.gmra.mxu3 %vm725_vm1, %v2263_v8 }
 0xb79   : > { %v2500_v1 = vpop.permute.xlu2 %2499 }
 0xb7b   : > { %3981 = vmatmul.msk.f32.vlgmr.msra.gmra.mxu3 %vm725_vm1, %v2465_v10 }
 0xb7c   : > { %2541 = vmax.xlane.f32.xlu1 %v2540_v60 }
 0xb80   : > { %v5607_v56 = vpop.f32.mrf.mxu1  ;;  %v2502_v19 = vpop.permute.xlu0 %2501 }
 0xb81   : > { %v2397_v57 = vpop.permute.xlu1 %2396 }
 0xb82   : > { %3976 = vmatmul.msk.f32.gmra.mxu1 %vm725_vm1, %v2397_v57 }
 0xb83   : > { %3982 = vmatmul.msk.f32.gmra.mxu3 %vm725_vm1, %v2467_v58 }
 0xb88   : > { %v5611_v61 = vpop.f32.mrf.mxu1  ;;  %v2790_v20 = vpop.permute.xlu0 %2789 }
 0xb90   : > { %v2423_v59 = vpop.f32.mrf.mxu1  ;;  %v5634_v32 = vpop.permute.xlu0 %2785 }
 0xb91   : > { %v2534_v62 = vsel %vm725_vm1, %v2423_v59, -inf }
 0xb92   : > { %2535 = vmax.xlane.f32.xlu0 %v2534_v62 }
 0xb94   : > { %v5629_v22 = vpop.f32.mrf.mxu3 }
 0xb95   : > { %4268 = vrot.lane.b32.xlu1 %v4267_v63, %s4827_s19 }
 0xb9d   : > { %2754 = vrot.lane.b32.xlu1 %v5457_v35, %s4828_s0 }
 0xba5   : > { %2750 = vrot.lane.b32.xlu1 %v5455_v31, %s4828_s0 }
 0xbac   : > { %v2231_v2 = vpop.xlane.xlu1 %2230 }
 0xbad   : > { %4378 = vrcp.f32 %v2231_v2 }
 0xbae   : > { %4380 = vrcp.f32 %v2246_v14 }
 0xbaf   : > { %4382 = vrcp.f32 %v2249_v6 }
 0xbb2   : > { %v2545_v24 = vpop.xlane.xlu2 %2544 }
 0xbb3   : > { %v4379_v3 = vpop.eup %4378 }
 0xbb4   : > { %v2259_v5 = vmul.f32 %v4379_v3, %v4375_v26  ;;  %v4381_v10 = vpop.eup %4380 }
 0xbb5   : > { %v2264_v13 = vmul.f32 %v4381_v10, %v5576_v17  ;;  %v4383_v15 = vpop.eup %4382  ;;  %v2561_v17 = vsub.f32 %v2461_v48, %v2545_v24 }
 0xbb6   : > { %3967 = vmatmul.msk.f32.gmra.mxu0 %vm725_vm1, %v2259_v5  ;;  %v2265_v18 = vmul.f32 %v4383_v15, %v5572_v12 }
 0xbb7   : > { %v2572_v28 = vmul.f32 1.442695, %v2561_v17 }
 0xbba   : > { %v2687_v11 = vpop.permute.xlu2 %2686 }
 0xbbb   : > { %2710 = vmatpush.msrb.mxu3 %v2687_v11 }
 0xbbe   : > { %3972 = vmatmul.msk.f32.vlgmr.msrb.gmra.mxu0 %vm725_vm1, %v2264_v13 }
 0xbc4   : > { %v2504_v16 = vpop.permute.xlu1 %2503 }
 0xbc5   : > { %3983 = vmatpush.xpose.msk.msra.mxu0 %vm725_vm1, %v2504_v16 }
 0xbc6   : > { %3973 = vmatmul.msk.f32.gmra.mxu0 %vm725_vm1, %v2265_v18 }
 0xbce   : > { %3984 = vmatmul.msk.f32.vlgmr.msra.gmra.mxu0 %vm725_vm1, %v2500_v1 }
 0xbd6   : > { %3985 = vmatmul.msk.f32.gmra.mxu0 %vm725_vm1, %v2502_v19 }
 0xbef   : > { %v2542_v27 = vpop.xlane.xlu1 %2541 }
 0xbf0   : > { %v2560_v29 = vsub.f32 %v2458_v34, %v2542_v27 }
 0xbf2   : > { %v2570_v30 = vmul.f32 1.442695, %v2560_v29 }
 0xbf4   : > { %4384 = vpow2.f32 %v2570_v30 }
 0xbf5   : > { %4386 = vpow2.f32 %v2572_v28 }
 0xbf6   : > { %v5631_v9 = vpop.f32.mrf.mxu3 }
 0xbfa   : > { %v4385_v12 = vpop.eup %4384 }
 0xbfb   : > { %v2588_v23 = vsel %vm725_vm1, %v4385_v12, 0.0  ;;  %v5637_v26 = vpop.eup %4386 }
 0xbfc   : > { %2589 = vadd.xlane.f32.xlu2 %v2588_v23  ;;  %v2591_v4 = vsel %vm725_vm1, %v5637_v26, 0.0 }
 0xbfe   : > { %v2493_v37 = vpop.f32.mrf.mxu3 }
 0xbff   : > { %v2426_v50 = vpop.f32.mrf.mxu1  ;;  %v2546_v43 = vsel %vm725_vm1, %v2493_v37, -inf }
 0xc00   : > { %2547 = vmax.xlane.f32.xlu0 %v2546_v43  ;;  %v2537_v34 = vsel %vm725_vm1, %v2426_v50, -inf }
 0xc01   : > { %2538 = vmax.xlane.f32.xlu1 %v2537_v34 }
 0xc04   : > { %2592 = vadd.xlane.f32.xlu2 %v2591_v4 }
 0xc05   : > { %v2536_v48 = vpop.xlane.xlu0 %2535 }
 0xc06   : > { %v2558_v51 = vsub.f32 %v2423_v59, %v2536_v48  ;;  %v2496_v54 = vpop.f32.mrf.mxu3  ;;  %v5652_v59 = vpop.f32.mrf.mxu0 }
 0xc07   : > { %v4269_v52 = vpop.permute.xlu1 %4268  ;;  %v2549_v8 = vsel %vm725_vm1, %v2496_v54, -inf }
 0xc08   : > { %v2566_v60 = vmul.f32 1.442695, %v2558_v51  ;;  %v4271_v57 = vunpack.i.h.bf16 %v4269_v52  ;;  %v4270_v58 = vunpack.i.l.bf16 %v4269_v52 }
 0xc09   : > { %2550 = vmax.xlane.f32.xlu1 %v2549_v8 }
 0xc0a   : > { %4388 = vpow2.f32 %v2566_v60  ;;  %2646 = vmatpush.msrb.mxu1 %v4271_v57  ;;  %2678 = vmatpush.msra.mxu2 %v4270_v58 }
 0xc0c   : > { %3997 = vmatpush.xpose.msk.msrb.mxu2 %vm725_vm1, %v2790_v20 }
 0xc0f   : > { %v2755_v62 = vpop.permute.xlu1 %2754 }
 0xc10   : > { %v4389_v63 = vpop.eup %4388  ;;  %3994 = vmatpush.xpose.msk.msra.mxu1 %vm725_vm1, %v2755_v62 }
 0xc11   : > { %v2582_v14 = vsel %vm725_vm1, %v4389_v63, 0.0 }
 0xc12   : > { %2583 = vadd.xlane.f32.xlu1 %v2582_v14 }
 0xc14   : > { %2787 = vrot.lane.b32.xlu0 %v5484_v42, %s4828_s0 }
 0xc17   : > { %v5664_v11 = vpop.permute.xlu1 %2750 }
 0xc1c   : > { %2824 = vrot.lane.b32.xlu2 %v5496_v46, %s4828_s0 }
 0xc24   : > { %2822 = vrot.lane.b32.xlu2 %v5517_v53, %s4828_s0 }
 0xc2b   : > { %2752 = vrot.lane.b32.xlu1 %v5470_v38, %s4828_s0 }
 0xc33   : > { %v5656_v1 = vpop.f32.mrf.mxu0 }
 0xc3b   : > { %v5658_v2 = vpop.f32.mrf.mxu0 }
 0xc43   : > { %v5660_v24 = vpop.f32.mrf.mxu0 }
 0xc4b   : > { %v2528_v3 = vpop.f32.mrf.mxu0 }
 0xc4c   : > { %v2552_v5 = vsel %vm725_vm1, %v2528_v3, -inf }
 0xc4d   : > { %2553 = vmax.xlane.f32.xlu0 %v2552_v5 }
 0xc53   : > { %v2531_v6 = vpop.f32.mrf.mxu0 }
 0xc54   : > { %v2555_v10 = vsel %vm725_vm1, %v2531_v6, -inf }
 0xc55   : > { %2556 = vmax.xlane.f32.xlu0 %v2555_v10 }
 0xc6f   : > { %v2590_v13 = vpop.xlane.xlu2 %2589 }
 0xc70   : > { %4390 = vrcp.f32 %v2590_v13 }
 0xc73   : > { %v2548_v15 = vpop.xlane.xlu0 %2547 }
 0xc74   : > { %v2562_v16 = vsub.f32 %v2493_v37, %v2548_v15  ;;  %v2539_v18 = vpop.xlane.xlu1 %2538 }
 0xc75   : > { %v2559_v19 = vsub.f32 %v2426_v50, %v2539_v18 }
 0xc76   : > { %v4391_v27 = vpop.eup %4390  ;;  %v2574_v29 = vmul.f32 1.442695, %v2562_v16 }
 0xc77   : > { %v2616_v17 = vmul.f32 %v4391_v27, %v4385_v12  ;;  %v2568_v30 = vmul.f32 1.442695, %v2559_v19  ;;  %v2593_v20 = vpop.xlane.xlu2 %2592 }
 0xc78   : > { %4392 = vpow2.f32 %v2574_v29 }
 0xc79   : > { %4394 = vpow2.f32 %v2568_v30  ;;  %3988 = vmatmul.msk.f32.vlgmr.msra.gmra.mxu2 %vm725_vm1, %v2616_v17 }
 0xc7a   : > { %4396 = vrcp.f32 %v2593_v20 }
 0xc7c   : > { %v2551_v28 = vpop.xlane.xlu1 %2550 }
 0xc7d   : > { %v2563_v23 = vsub.f32 %v2496_v54, %v2551_v28 }
 0xc7e   : > { %v4393_v43 = vpop.eup %4392 }
 0xc7f   : > { %v4395_v34 = vpop.eup %4394  ;;  %v2576_v4 = vmul.f32 1.442695, %v2563_v23  ;;  %v2825_v48 = vpop.permute.xlu2 %2824  ;;  %v2594_v37 = vsel %vm725_vm1, %v4393_v43, 0.0 }
 0xc80   : > { %v4397_v51 = vpop.eup %4396  ;;  %2595 = vadd.xlane.f32.xlu2 %v2594_v37  ;;  %4000 = vmatpush.xpose.msk.msra.mxu3 %vm725_vm1, %v2825_v48  ;;  %v2585_v12 = vsel %vm725_vm1, %v4395_v34, 0.0 }
 0xc81   : > { %4398 = vpow2.f32 %v2576_v4  ;;  %2586 = vadd.xlane.f32.xlu0 %v2585_v12  ;;  %v2617_v50 = vmul.f32 %v4397_v51, %v5637_v26 }
 0xc83   : > { %3989 = vmatmul.msk.f32.gmra.mxu2 %vm725_vm1, %v2617_v50 }
 0xc85   : > { %v2584_v52 = vpop.xlane.xlu1 %2583 }
 0xc86   : > { %4400 = vrcp.f32 %v2584_v52  ;;  %v2788_v58 = vpop.permute.xlu0 %2787 }
 0xc87   : > { %v4399_v54 = vpop.eup %4398  ;;  %v2823_v18 = vpop.permute.xlu2 %2822 }
 0xc88   : > { %v2597_v8 = vsel %vm725_vm1, %v4399_v54, 0.0 }
 0xc89   : > { %2598 = vadd.xlane.f32.xlu2 %v2597_v8 }
 0xc8b   : > { %3998 = vmatmul.msk.f32.vlgmr.msrb.gmra.mxu2 %vm725_vm1, %v5634_v32 }
 0xc8c   : > { %v4401_v60 = vpop.eup %4400 }
 0xc8d   : > { %v2614_v57 = vmul.f32 %v4401_v60, %v4389_v63 }
 0xc8f   : > { %3986 = vmatmul.msk.f32.vlgmr.msrb.gmra.mxu1 %vm725_vm1, %v2614_v57 }
 0xc93   : > { %3999 = vmatmul.msk.f32.gmra.mxu2 %vm725_vm1, %v2788_v58 }
 0xc95   : > { %2820 = vrot.lane.b32.xlu0 %v5501_v47, %s4828_s0 }
 0xc9d   : > { %v2753_v37 = vpop.permute.xlu1 %2752 }
 0xca1   : > { %2718 = vrot.lane.b32.xlu2 %v5525_v25, %s4827_s19  ;;  %s5961_s19 = scalar_lea.vmem [#allocation16], %s5073_s17  ;;  %s4051_s17 = sshll.u32 %s4935_s20, 6 }
 0xca2   : > { %s3683_s20 = scalar_lea.sflag [#allocation4], %s525_s27 }
 0xca9   : > { %2859 = vrot.lane.b32.xlu2 %v5525_v25, %s4828_s0 }
 0xcb1   : > { %2855 = vrot.lane.b32.xlu2 %v5528_v21, %s4828_s0 }
 0xcb9   : > { %2857 = vrot.lane.b32.xlu2 %v5539_v0, %s4828_s0 }
 0xcc0   : > { %v2554_v32 = vpop.xlane.xlu0 %2553 }
 0xcc1   : > { %v2564_v26 = vsub.f32 %v2528_v3, %v2554_v32 }
 0xcc3   : > { %v2578_v62 = vmul.f32 1.442695, %v2564_v26 }
 0xcc5   : > { %4402 = vpow2.f32 %v2578_v62 }
 0xcc8   : > { %v2557_v63 = vpop.xlane.xlu0 %2556 }
 0xcc9   : > { %v2565_v14 = vsub.f32 %v2531_v6, %v2557_v63 }
 0xccb   : > { %v4403_v5 = vpop.eup %4402  ;;  %v2580_v10 = vmul.f32 1.442695, %v2565_v14 }
 0xccc   : > { %v2600_v13 = vsel %vm725_vm1, %v4403_v5, 0.0 }
 0xccd   : > { %4404 = vpow2.f32 %v2580_v10  ;;  %2601 = vadd.xlane.f32.xlu1 %v2600_v13 }
 0xcd3   : > { %v4405_v15 = vpop.eup %4404 }
 0xcd4   : > { %v2603_v16 = vsel %vm725_vm1, %v4405_v15, 0.0 }
 0xcd5   : > { %2604 = vadd.xlane.f32.xlu0 %v2603_v16 }
 0xcf3   : > { %v2596_v19 = vpop.xlane.xlu2 %2595 }
 0xcf4   : > { %4406 = vrcp.f32 %v2596_v19  ;;  %v2587_v27 = vpop.xlane.xlu0 %2586 }
 0xcf5   : > { %4408 = vrcp.f32 %v2587_v27 }
 0xcfa   : > { %v4407_v3 = vpop.eup %4406 }
 0xcfb   : > { %v4409_v29 = vpop.eup %4408  ;;  %v2618_v17 = vmul.f32 %v4407_v3, %v4393_v43 }
 0xcfc   : > { %v5689_v30 = vpop.f32.mrf.mxu2  ;;  %v2599_v6 = vpop.xlane.xlu2 %2598  ;;  %v2615_v20 = vmul.f32 %v4409_v29, %v4395_v34 }
 0xcfd   : > { %4410 = vrcp.f32 %v2599_v6  ;;  %3990 = vmatmul.msk.f32.vlgmr.msrb.gmra.mxu3 %vm725_vm1, %v2618_v17 }
 0xcfe   : > { %3987 = vmatmul.msk.f32.gmra.mxu1 %vm725_vm1, %v2615_v20 }
 0xd03   : > { %v4411_v28 = vpop.eup %4410 }
 0xd04   : > { %v2719_v23 = vpop.permute.xlu2 %2718  ;;  %v2619_v4 = vmul.f32 %v4411_v28, %v4399_v54 }
 0xd05   : > { %2742 = vmatpush.msrb.mxu0 %v2719_v23 }
 0xd06   : > { %v5693_v48 = vpop.f32.mrf.mxu2  ;;  %3991 = vmatmul.msk.f32.gmra.mxu3 %vm725_vm1, %v2619_v4  ;;  %3995 = vmatmul.msk.f32.vlgmr.msra.gmra.mxu1 %vm725_vm1, %v5664_v11  ;;  %v5708_v11 = vpack.i.bf16 %v5486_v44, %v5457_v35 }
 0xd07   : > { %v2821_v51 = vpop.permute.xlu0 %2820 }
 0xd0c   : > { %v2860_v43 = vpop.permute.xlu2 %2859  ;;  %v5716_v62 = vpop.f32.mrf.mxu1 }
 0xd0d   : > { %4003 = vmatpush.xpose.msk.msra.mxu0 %vm725_vm1, %v2860_v43 }
 0xd0e   : > { %v2814_v34 = vpop.f32.mrf.mxu2  ;;  %3996 = vmatmul.msk.f32.gmra.mxu1 %vm725_vm1, %v2753_v37  ;;  %4001 = vmatmul.msk.f32.vlgmr.msra.gmra.mxu3 %vm725_vm1, %v2821_v51 }
 0xd0f   : > { %v2896_v12 = vsel %vm725_vm1, %v2814_v34, -inf }
 0xd10   : > { %2897 = vmax.xlane.f32.xlu2 %v2896_v12 }
 0xd14   : > { %v2856_v26 = vpop.permute.xlu2 %2855 }
 0xd16   : > { %v2817_v50 = vpop.f32.mrf.mxu2  ;;  %4002 = vmatmul.msk.f32.gmra.mxu3 %vm725_vm1, %v2823_v18 }
 0xd17   : > { %v2899_v52 = vsel %vm725_vm1, %v2817_v50, -inf }
 0xd18   : > { %2900 = vmax.xlane.f32.xlu1 %v2899_v52 }
 0xd28   : > { %3110 = vrot.lane.b32.xlu2 %v5457_v35, %s4829_s23  ;;  %v2858_v35 = vpop.permute.xlu2 %2857 }
 0xd31   : > { %4273 = vrot.lane.b32.xlu1 %v5708_v11, %s4830_s25 }
 0xd40   : > { %v2602_v54 = vpop.xlane.xlu1 %2601 }
 0xd41   : > { %4412 = vrcp.f32 %v2602_v54 }
 0xd47   : > { %v4413_v8 = vpop.eup %4412 }
 0xd48   : > { %v2620_v60 = vmul.f32 %v4413_v8, %v4403_v5  ;;  %v2605_v57 = vpop.xlane.xlu0 %2604 }
 0xd49   : > { %4414 = vrcp.f32 %v2605_v57 }
 0xd4a   : > { %3992 = vmatmul.msk.f32.vlgmr.msrb.gmra.mxu0 %vm725_vm1, %v2620_v60 }
 0xd4f   : > { %v4415_v58 = vpop.eup %4414 }
 0xd50   : > { %v2621_v32 = vmul.f32 %v4415_v58, %v4405_v15 }
 0xd52   : > { %3993 = vmatmul.msk.f32.gmra.mxu0 %vm725_vm1, %v2621_v32 }
 0xd5a   : > { %4004 = vmatmul.msk.f32.vlgmr.msra.gmra.mxu0 %vm725_vm1, %v2856_v26 }
 0xd62   : > { %4005 = vmatmul.msk.f32.gmra.mxu0 %vm725_vm1, %v2858_v35 }
 0xd7b   : > { %v5718_v63 = vpop.f32.mrf.mxu1 }
 0xd80   : > { %v5720_v14 = vpop.f32.mrf.mxu3 }
 0xd83   : > { %v2898_v5 = vpop.xlane.xlu2 %2897  ;;  %v5722_v10 = vpop.f32.mrf.mxu1 }
 0xd84   : > { %v2916_v13 = vsub.f32 %v2814_v34, %v2898_v5  ;;  %v2890_v43 = vsel %vm725_vm1, %v5722_v10, -inf }
 0xd86   : > { %v2926_v16 = vmul.f32 1.442695, %v2916_v13 }
 0xd88   : > { %4416 = vpow2.f32 %v2926_v16 }
 0xd89   : > { %v5724_v15 = vpop.f32.mrf.mxu3 }
 0xd8b   : > { %v2901_v18 = vpop.xlane.xlu1 %2900  ;;  %v2782_v27 = vpop.f32.mrf.mxu1 }
 0xd8c   : > { %v2917_v19 = vsub.f32 %v2817_v50, %v2901_v18  ;;  %v2893_v3 = vsel %vm725_vm1, %v2782_v27, -inf  ;;  %v3111_v12 = vpop.permute.xlu2 %3110 }
 0xd8d   : > { %2894 = vmax.xlane.f32.xlu0 %v2893_v3 }
 0xd8e   : > { %v4417_v29 = vpop.eup %4416  ;;  %v2928_v17 = vmul.f32 1.442695, %v2917_v19 }
 0xd8f   : > { %v2944_v6 = vsel %vm725_vm1, %v4417_v29, 0.0 }
 0xd90   : > { %4418 = vpow2.f32 %v2928_v17  ;;  %2945 = vadd.xlane.f32.xlu1 %v2944_v6 }
 0xd91   : > { %v2849_v20 = vpop.f32.mrf.mxu3 }
 0xd92   : > { %v2902_v28 = vsel %vm725_vm1, %v2849_v20, -inf }
 0xd95   : > { %2903 = vmax.xlane.f32.xlu0 %v2902_v28 }
 0xd96   : > { %v4419_v23 = vpop.eup %4418 }
 0xd97   : > { %v2947_v4 = vsel %vm725_vm1, %v4419_v23, 0.0 }
 0xd98   : > { %2948 = vadd.xlane.f32.xlu2 %v2947_v4  ;;  %2891 = vmax.xlane.f32.xlu1 %v2890_v43 }
 0xd99   : > { %v2852_v54 = vpop.f32.mrf.mxu3 }
 0xda3   : > { %v4274_v37 = vpop.permute.xlu1 %4273 }
 0xda4   : > { %v4276_v51 = vunpack.i.h.bf16 %v4274_v37  ;;  %v4275_v34 = vunpack.i.l.bf16 %v4274_v37 }
 0xda6   : > { %3002 = vmatpush.msrb.mxu1 %v4275_v34  ;;  %3034 = vmatpush.msra.mxu2 %v4276_v51 }
 0xda8   : > { %4014 = vmatpush.xpose.msk.msra.mxu1 %vm725_vm1, %v3111_v12 }
 0xda9   : > { %3106 = vrot.lane.b32.xlu0 %v5455_v31, %s4829_s23 }
 0xdb0   : > { %3141 = vrot.lane.b32.xlu2 %v5477_v41, %s4829_s23 }
 0xdb1   : > { %3145 = vrot.lane.b32.xlu1 %v5486_v44, %s4829_s23 }
 0xdb8   : > { %3143 = vrot.lane.b32.xlu2 %v5484_v42, %s4829_s23 }
 0xdb9   : > { %3042 = vrot.lane.b32.xlu1 %v5496_v46, %s4830_s25 }
 0xdc0   : > { %3176 = vrot.lane.b32.xlu2 %v5501_v47, %s4829_s23  ;;  %v2905_v47 = vsel %vm725_vm1, %v2852_v54, -inf }
 0xdc1   : > { %3108 = vrot.lane.b32.xlu1 %v5470_v38, %s4829_s23 }
 0xdc7   : > { %v5747_v50 = vpop.f32.mrf.mxu0 }
 0xdc8   : > { %3178 = vrot.lane.b32.xlu2 %v5517_v53, %s4829_s23 }
 0xdcf   : > { %v5751_v31 = vpop.f32.mrf.mxu0 }
 0xdd7   : > { %v2884_v41 = vpop.f32.mrf.mxu0 }
 0xdd8   : > { %v2908_v44 = vsel %vm725_vm1, %v2884_v41, -inf }
 0xdd9   : > { %2909 = vmax.xlane.f32.xlu0 %v2908_v44 }
 0xddf   : > { %v2887_v42 = vpop.f32.mrf.mxu0 }
 0xde0   : > { %v2911_v52 = vsel %vm725_vm1, %v2887_v42, -inf }
 0xde1   : > { %2912 = vmax.xlane.f32.xlu0 %v2911_v52 }
 0xdeb   : > { %2906 = vmax.xlane.f32.xlu1 %v2905_v47 }
 0xe00   : > { %v2895_v38 = vpop.xlane.xlu0 %2894 }
 0xe01   : > { %v2915_v8 = vsub.f32 %v2782_v27, %v2895_v38 }
 0xe03   : > { %v2946_v60 = vpop.xlane.xlu1 %2945  ;;  %v2924_v57 = vmul.f32 1.442695, %v2915_v8 }
 0xe04   : > { %4420 = vrcp.f32 %v2946_v60 }
 0xe05   : > { %4422 = vpow2.f32 %v2924_v57 }
 0xe08   : > { %v2904_v53 = vpop.xlane.xlu0 %2903 }
 0xe09   : > { %v2918_v32 = vsub.f32 %v2849_v20, %v2904_v53 }
 0xe0a   : > { %v4421_v58 = vpop.eup %4420 }
 0xe0b   : > { %v2972_v26 = vmul.f32 %v4421_v58, %v4417_v29  ;;  %v2892_v35 = vpop.xlane.xlu1 %2891  ;;  %v2949_v5 = vpop.xlane.xlu2 %2948  ;;  %v2930_v16 = vmul.f32 1.442695, %v2918_v32 }
 0xe0c   : > { %v5756_v13 = vpop.eup %4422  ;;  %v2914_v18 = vsub.f32 %v5722_v10, %v2892_v35  ;;  %4424 = vrcp.f32 %v2949_v5 }
 0xe0d   : > { %4008 = vmatmul.msk.f32.vlgmr.msra.gmra.mxu2 %vm725_vm1, %v2972_v26  ;;  %v2941_v19 = vsel %vm725_vm1, %v5756_v13, 0.0  ;;  %4426 = vpow2.f32 %v2930_v16 }
 0xe0e   : > { %v2922_v27 = vmul.f32 1.442695, %v2914_v18  ;;  %2942 = vadd.xlane.f32.xlu0 %v2941_v19 }
 0xe10   : > { %4428 = vpow2.f32 %v2922_v27 }
 0xe12   : > { %v4425_v3 = vpop.eup %4424 }
 0xe13   : > { %v2973_v17 = vmul.f32 %v4425_v3, %v4419_v23  ;;  %v4427_v29 = vpop.eup %4426  ;;  %v3142_v4 = vpop.permute.xlu2 %3141 }
 0xe14   : > { %v2950_v6 = vsel %vm725_vm1, %v4427_v29, 0.0 }
 0xe15   : > { %4009 = vmatmul.msk.f32.gmra.mxu2 %vm725_vm1, %v2973_v17 }
 0xe16   : > { %v4429_v20 = vpop.eup %4428  ;;  %2951 = vadd.xlane.f32.xlu0 %v2950_v6 }
 0xe17   : > { %v2938_v10 = vsel %vm725_vm1, %v4429_v20, 0.0 }
 0xe18   : > { %2939 = vadd.xlane.f32.xlu1 %v2938_v10 }
 0xe1b   : > { %v3144_v37 = vpop.permute.xlu2 %3143  ;;  %v3107_v23 = vpop.permute.xlu0 %3106 }
 0xe23   : > { %v3146_v28 = vpop.permute.xlu1 %3145 }
 0xe24   : > { %4017 = vmatpush.xpose.msk.msrb.mxu2 %vm725_vm1, %v3146_v28  ;;  %v3177_v28 = vpop.permute.xlu2 %3176 }
 0xe27   : > { %4018 = vmatmul.msk.f32.vlgmr.msrb.gmra.mxu2 %vm725_vm1, %v3142_v4 }
 0xe2b   : > { %v3043_v43 = vpop.permute.xlu1 %3042 }
 0xe2c   : > { %3066 = vmatpush.msrb.mxu3 %v3043_v43  ;;  %v3179_v43 = vpop.permute.xlu2 %3178 }
 0xe2f   : > { %4019 = vmatmul.msk.f32.gmra.mxu2 %vm725_vm1, %v3144_v37 }
 0xe31   : > { %3180 = vrot.lane.b32.xlu1 %v5496_v46, %s4829_s23 }
 0xe33   : > { %v3109_v47 = vpop.permute.xlu1 %3108 }
 0xe4c   : > { %v2910_v51 = vpop.xlane.xlu0 %2909 }
 0xe4d   : > { %v2920_v34 = vsub.f32 %v2884_v41, %v2910_v51 }
 0xe4f   : > { %v2934_v12 = vmul.f32 1.442695, %v2920_v34 }
 0xe51   : > { %4430 = vpow2.f32 %v2934_v12 }
 0xe54   : > { %v2913_v44 = vpop.xlane.xlu0 %2912 }
 0xe55   : > { %v2921_v52 = vsub.f32 %v2887_v42, %v2913_v44 }
 0xe57   : > { %v4431_v38 = vpop.eup %4430  ;;  %v2936_v8 = vmul.f32 1.442695, %v2921_v52 }
 0xe58   : > { %v2956_v60 = vsel %vm725_vm1, %v4431_v38, 0.0 }
 0xe59   : > { %4432 = vpow2.f32 %v2936_v8 }
 0xe5b   : > { %2957 = vadd.xlane.f32.xlu1 %v2956_v60 }
 0xe5e   : > { %v2907_v57 = vpop.xlane.xlu1 %2906 }
 0xe5f   : > { %v4433_v53 = vpop.eup %4432  ;;  %v2919_v58 = vsub.f32 %v2852_v54, %v2907_v57 }
 0xe60   : > { %v2959_v32 = vsel %vm725_vm1, %v4433_v53, 0.0 }
 0xe61   : > { %v2932_v26 = vmul.f32 1.442695, %v2919_v58  ;;  %2960 = vadd.xlane.f32.xlu2 %v2959_v32 }
 0xe63   : > { %4434 = vpow2.f32 %v2932_v26 }
 0xe69   : > { %v4435_v41 = vpop.eup %4434 }
 0xe6a   : > { %v2953_v35 = vsel %vm725_vm1, %v4435_v41, 0.0 }
 0xe6b   : > { %2954 = vadd.xlane.f32.xlu0 %v2953_v35 }
 0xe74   : > { %3211 = vrot.lane.b32.xlu1 %v5528_v21, %s4829_s23 }
 0xe7f   : > { %3074 = vrot.lane.b32.xlu0 %v5525_v25, %s4830_s25  ;;  %s6061_s25 = sld [smem:[#allocation33_spill]] }
 0xe81   : > { %v2943_v42 = vpop.xlane.xlu0 %2942 }
 0xe85   : > { %s4748_s10 = scalar_lea.hbm %s6061_s25, 128 }
 0xe87   : > { %3215 = vrot.lane.b32.xlu0 %v5525_v25, %s4829_s23 }
 0xe89   : > { %v2952_v54 = vpop.xlane.xlu0 %2951 }
 0xe8a   : > { %4436 = vrcp.f32 %v2952_v54 }
 0xe8b   : > { %v2940_v5 = vpop.xlane.xlu1 %2939 }
 0xe8c   : > { %4438 = vrcp.f32 %v2940_v5 }
 0xe8d   : > { %4440 = vrcp.f32 %v2943_v42 }
 0xe8f   : > { %3213 = vrot.lane.b32.xlu0 %v5539_v0, %s4829_s23 }
 0xe90   : > { %v4437_v16 = vpop.eup %4436  ;;  %v5783_v3 = vpop.f32.mrf.mxu2 }
 0xe91   : > { %v2974_v18 = vmul.f32 %v4437_v16, %v4427_v29 }
 0xe92   : > { %v4439_v19 = vpop.eup %4438 }
 0xe93   : > { %v2970_v27 = vmul.f32 %v4439_v19, %v4429_v20  ;;  %4010 = vmatmul.msk.f32.vlgmr.msrb.gmra.mxu3 %vm725_vm1, %v2974_v18  ;;  %v4441_v21 = vpop.eup %4440 }
 0xe94   : > { %v2971_v17 = vmul.f32 %v4441_v21, %v5756_v13 }
 0xe95   : > { %4006 = vmatmul.msk.f32.vlgmr.msrb.gmra.mxu1 %vm725_vm1, %v2970_v27 }
 0xe98   : > { %v5787_v6 = vpop.f32.mrf.mxu2 }
 0xe9d   : > { %4007 = vmatmul.msk.f32.gmra.mxu1 %vm725_vm1, %v2971_v17 }
 0xea3   : > { %v3181_v10 = vpop.permute.xlu1 %3180 }
 0xea4   : > { %4020 = vmatpush.xpose.msk.msra.mxu3 %vm725_vm1, %v3181_v10 }
 0xea5   : > { %4015 = vmatmul.msk.f32.vlgmr.msra.gmra.mxu1 %vm725_vm1, %v3107_v23 }
 0xeaa   : > { %v5791_v0 = vpop.f32.mrf.mxu2 }
 0xeab   : > { %v3252_v5 = vsel %vm725_vm1, %v5791_v0, -inf }
 0xead   : > { %4016 = vmatmul.msk.f32.gmra.mxu1 %vm725_vm1, %v3109_v47 }
 0xeb2   : > { %v3173_v29 = vpop.f32.mrf.mxu2 }
 0xeb3   : > { %v3255_v20 = vsel %vm725_vm1, %v3173_v29, -inf }
 0xeb4   : > { %3256 = vmax.xlane.f32.xlu1 %v3255_v20 }
 0xece   : > { %v2958_v37 = vpop.xlane.xlu1 %2957 }
 0xed4   : > { %v2961_v34 = vpop.xlane.xlu2 %2960 }
 0xede   : > { %v2955_v4 = vpop.xlane.xlu0 %2954 }
 0xedf   : > { %4442 = vrcp.f32 %v2955_v4 }
 0xee0   : > { %4444 = vrcp.f32 %v2958_v37 }
 0xee1   : > { %4446 = vrcp.f32 %v2961_v34 }
 0xee5   : > { %v4443_v13 = vpop.eup %4442 }
 0xee6   : > { %v2975_v51 = vmul.f32 %v4443_v13, %v4435_v41  ;;  %v4445_v23 = vpop.eup %4444  ;;  %v3212_v60 = vpop.permute.xlu1 %3211 }
 0xee7   : > { %v2976_v12 = vmul.f32 %v4445_v23, %v4431_v38  ;;  %v4447_v52 = vpop.eup %4446 }
 0xee8   : > { %4011 = vmatmul.msk.f32.gmra.mxu3 %vm725_vm1, %v2975_v51  ;;  %v2977_v8 = vmul.f32 %v4447_v52, %v4433_v53 }
 0xef0   : > { %4021 = vmatmul.msk.f32.vlgmr.msra.gmra.mxu3 %vm725_vm1, %v3177_v28 }
 0xef1   : > { %v3075_v44 = vpop.permute.xlu0 %3074 }
 0xef2   : > { %3098 = vmatpush.msrb.mxu0 %v3075_v44 }
 0xef3   : > { %4012 = vmatmul.msk.f32.vlgmr.msrb.gmra.mxu0 %vm725_vm1, %v2976_v12 }
 0xef8   : > { %4022 = vmatmul.msk.f32.gmra.mxu3 %vm725_vm1, %v3179_v43 }
 0xef9   : > { %v3216_v47 = vpop.permute.xlu0 %3215 }
 0xefa   : > { %4023 = vmatpush.xpose.msk.msra.mxu0 %vm725_vm1, %v3216_v47 }
 0xefb   : > { %4013 = vmatmul.msk.f32.gmra.mxu0 %vm725_vm1, %v2977_v8 }
 0xf01   : > { %v3214_v57 = vpop.permute.xlu0 %3213 }
 0xf03   : > { %4024 = vmatmul.msk.f32.vlgmr.msra.gmra.mxu0 %vm725_vm1, %v3212_v60 }
 0xf0b   : > { %4025 = vmatmul.msk.f32.gmra.mxu0 %vm725_vm1, %v3214_v57 }
 0xf12   : > { %v5803_v38 = vpop.f32.mrf.mxu1 }
 0xf16   : > { %v5817_v27 = vpop.f32.mrf.mxu3 }
 0xf1a   : > { %v5805_v58 = vpop.f32.mrf.mxu1 }
 0xf22   : > { %v3135_v32 = vpop.f32.mrf.mxu1 }
 0xf23   : > { %v3246_v26 = vsel %vm725_vm1, %v3135_v32, -inf }
 0xf24   : > { %3247 = vmax.xlane.f32.xlu2 %v3246_v26 }
 0xf27   : > { %v3257_v41 = vpop.xlane.xlu1 %3256 }
 0xf28   : > { %v3273_v53 = vsub.f32 %v3173_v29, %v3257_v41 }
 0xf2a   : > { %v3284_v35 = vmul.f32 1.442695, %v3273_v53  ;;  %v3138_v42 = vpop.f32.mrf.mxu1 }
 0xf2b   : > { %v3249_v54 = vsel %vm725_vm1, %v3138_v42, -inf }
 0xf2c   : > { %4448 = vpow2.f32 %v3284_v35  ;;  %3250 = vmax.xlane.f32.xlu0 %v3249_v54  ;;  %3253 = vmax.xlane.f32.xlu2 %v3252_v5 }
 0xf32   : > { %v5811_v16 = vpop.eup %4448 }
 0xf33   : > { %v3303_v18 = vsel %vm725_vm1, %v5811_v16, 0.0 }
 0xf34   : > { %3304 = vadd.xlane.f32.xlu1 %v3303_v18 }
 0xf6b   : > { %v5821_v17 = vpop.f32.mrf.mxu3 }
 0xf70   : > { %v5815_v19 = vpop.f32.mrf.mxu0 }
 0xf73   : > { %v3205_v20 = vpop.f32.mrf.mxu3 }
 0xf74   : > { %v3258_v4 = vsel %vm725_vm1, %v3205_v20, -inf }
 0xf78   : > { %v5819_v21 = vpop.f32.mrf.mxu0 }
 0xf7b   : > { %v3208_v8 = vpop.f32.mrf.mxu3 }
 0xf7c   : > { %v3261_v57 = vsel %vm725_vm1, %v3208_v8, -inf }
 0xf80   : > { %v3240_v10 = vpop.f32.mrf.mxu0 }
 0xf81   : > { %v3264_v29 = vsel %vm725_vm1, %v3240_v10, -inf }
 0xf82   : > { %3265 = vmax.xlane.f32.xlu2 %v3264_v29 }
 0xf88   : > { %v3243_v28 = vpop.f32.mrf.mxu0 }
 0xf89   : > { %v3267_v13 = vsel %vm725_vm1, %v3243_v28, -inf }
 0xf8a   : > { %3259 = vmax.xlane.f32.xlu2 %v3258_v4  ;;  %3268 = vmax.xlane.f32.xlu0 %v3267_v13 }
 0xf97   : > { %v3248_v43 = vpop.xlane.xlu2 %3247 }
 0xf98   : > { %v3270_v12 = vsub.f32 %v3135_v32, %v3248_v43 }
 0xf9a   : > { %v3278_v52 = vmul.f32 1.442695, %v3270_v12 }
 0xf9e   : > { %4278 = vrot.lane.b32.xlu0 %v5708_v11, %s4831_s28 }
 0xf9f   : > { %v3254_v37 = vpop.xlane.xlu2 %3253  ;;  %v3251_v47 = vpop.xlane.xlu0 %3250 }
 0xfa0   : > { %v3272_v51 = vsub.f32 %v5791_v0, %v3254_v37  ;;  %v3271_v60 = vsub.f32 %v3138_v42, %v3251_v47 }
 0xfa2   : > { %v3282_v34 = vmul.f32 1.442695, %v3272_v51  ;;  %v3280_v26 = vmul.f32 1.442695, %v3271_v60 }
 0xfa4   : > { %4450 = vpow2.f32 %v3282_v34 }
 0xfa5   : > { %4452 = vpow2.f32 %v3278_v52 }
 0xfa6   : > { %4454 = vpow2.f32 %v3280_v26 }
 0xfa7   : > { %v3305_v47 = vpop.xlane.xlu1 %3304 }
 0xfaa   : > { %v4451_v23 = vpop.eup %4450 }
 0xfab   : > { %v3300_v44 = vsel %vm725_vm1, %v4451_v23, 0.0  ;;  %v4453_v11 = vpop.eup %4452 }
 0xfac   : > { %3301 = vadd.xlane.f32.xlu2 %v3300_v44  ;;  %v3294_v0 = vsel %vm725_vm1, %v4453_v11, 0.0  ;;  %v5832_v41 = vpop.eup %4454 }
 0xfad   : > { %v3297_v32 = vsel %vm725_vm1, %v5832_v41, 0.0 }
 0xfb4   : > { %3262 = vmax.xlane.f32.xlu2 %v3261_v57 }
 0xfbc   : > { %3295 = vadd.xlane.f32.xlu2 %v3294_v0 }
 0xfc4   : > { %3298 = vadd.xlane.f32.xlu2 %v3297_v32 }
 0xff5   : > { %v3266_v53 = vpop.xlane.xlu2 %3265 }
 0xff6   : > { %v3276_v35 = vsub.f32 %v3240_v10, %v3266_v53 }
 0xff8   : > { %v3290_v54 = vmul.f32 1.442695, %v3276_v35 }
 0xffa   : > { %4456 = vpow2.f32 %v3290_v54 }
 0xffd   : > { %v3269_v42 = vpop.xlane.xlu0 %3268  ;;  %v3260_v5 = vpop.xlane.xlu2 %3259 }
 0xffe   : > { %v3277_v18 = vsub.f32 %v3243_v28, %v3269_v42  ;;  %v3274_v29 = vsub.f32 %v3205_v20, %v3260_v5 }
0x1000   : > { %v5836_v4 = vpop.eup %4456  ;;  %v3292_v13 = vmul.f32 1.442695, %v3277_v18  ;;  %v3286_v43 = vmul.f32 1.442695, %v3274_v29 }
0x1001   : > { %v3312_v37 = vsel %vm725_vm1, %v5836_v4, 0.0 }
0x1002   : > { %4458 = vpow2.f32 %v3292_v13  ;;  %3313 = vadd.xlane.f32.xlu0 %v3312_v37 }
0x1003   : > { %4460 = vpow2.f32 %v3286_v43 }
0x1008   : > { %v5840_v51 = vpop.eup %4458 }
0x1009   : > { %v4461_v34 = vpop.eup %4460  ;;  %v3315_v10 = vsel %vm725_vm1, %v5840_v51, 0.0 }
0x100a   : > { %3316 = vadd.xlane.f32.xlu1 %v3315_v10  ;;  %v3306_v28 = vsel %vm725_vm1, %v4461_v34, 0.0 }
0x100b   : > { %3307 = vadd.xlane.f32.xlu2 %v3306_v28 }
0x1010   : > { %v4279_v20 = vpop.permute.xlu0 %4278 }
0x1011   : > { %v4281_v12 = vunpack.i.h.bf16 %v4279_v20  ;;  %v4280_v44 = vunpack.i.l.bf16 %v4279_v20 }
0x1013   : > { %3358 = vmatpush.msrb.mxu1 %v4280_v44  ;;  %3390 = vmatpush.msra.mxu2 %v4281_v12 }
0x1016   : > { %3504 = vrot.lane.b32.xlu0 %v5805_v58, %s4832_s2 }
0x101e   : > { %3508 = vrot.lane.b32.xlu0 %v5787_v6, %s4832_s2 }
0x101f   : > { %v3302_v52 = vpop.xlane.xlu2 %3301 }
0x1020   : > { %4462 = vrcp.f32 %v3302_v52 }
0x1021   : > { %4464 = vrcp.f32 %v3305_v47 }
0x1023   : > { %3398 = vrot.lane.b32.xlu2 %v5496_v46, %s4831_s28 }
0x1026   : > { %3510 = vrot.lane.b32.xlu0 %v5817_v27, %s4832_s2  ;;  %v4463_v60 = vpop.eup %4462 }
0x1027   : > { %v3328_v57 = vmul.f32 %v4463_v60, %v4451_v23  ;;  %v3263_v26 = vpop.xlane.xlu2 %3262  ;;  %v4465_v6 = vpop.eup %4464 }
0x1028   : > { %v3275_v0 = vsub.f32 %v3208_v8, %v3263_v26  ;;  %v3329_v32 = vmul.f32 %v4465_v6, %v5811_v16 }
0x1029   : > { %4028 = vmatmul.msk.f32.vlgmr.msra.gmra.mxu2 %vm725_vm1, %v3328_v57 }
0x102a   : > { %v3288_v58 = vmul.f32 1.442695, %v3275_v0 }
0x102b   : > { %3470 = vrot.lane.b32.xlu2 %v5716_v62, %s4833_s12 }
0x102c   : > { %4466 = vpow2.f32 %v3288_v58 }
0x102e   : > { %3512 = vrot.lane.b32.xlu0 %v5821_v17, %s4832_s2 }
0x102f   : > { %v3296_v46 = vpop.xlane.xlu2 %3295 }
0x1030   : > { %4468 = vrcp.f32 %v3296_v46 }
0x1031   : > { %4029 = vmatmul.msk.f32.gmra.mxu2 %vm725_vm1, %v3329_v32 }
0x1032   : > { %v4467_v27 = vpop.eup %4466 }
0x1033   : > { %3502 = vrot.lane.b32.xlu2 %v5803_v38, %s4832_s2  ;;  %v3309_v23 = vsel %vm725_vm1, %v4467_v27, 0.0 }
0x1034   : > { %3310 = vadd.xlane.f32.xlu1 %v3309_v23 }
0x1036   : > { %3514 = vrot.lane.b32.xlu0 %v5815_v19, %s4832_s2  ;;  %v4469_v62 = vpop.eup %4468 }
0x1037   : > { %v3326_v8 = vmul.f32 %v4469_v62, %v4453_v11  ;;  %v3299_v53 = vpop.xlane.xlu2 %3298 }
0x1038   : > { %4470 = vrcp.f32 %v3299_v53 }
0x1039   : > { %4026 = vmatmul.msk.f32.vlgmr.msrb.gmra.mxu1 %vm725_vm1, %v3326_v8 }
0x103b   : > { %3472 = vrot.lane.b32.xlu2 %v5718_v63, %s4833_s12 }
0x103e   : > { %3516 = vrot.lane.b32.xlu0 %v5819_v21, %s4832_s2  ;;  %v4471_v16 = vpop.eup %4470 }
0x103f   : > { %v3327_v38 = vmul.f32 %v4471_v16, %v5832_v41 }
0x1041   : > { %4027 = vmatmul.msk.f32.gmra.mxu1 %vm725_vm1, %v3327_v38 }
0x1043   : > { %3474 = vrot.lane.b32.xlu2 %v5689_v30, %s4833_s12 }
0x104d   : > { %3430 = vrot.lane.b32.xlu1 %v5525_v25, %s4831_s28  ;;  %s3695_s28 = scalar_lea.hbm %s6061_s25, %s4051_s17 }
0x1075   : > { %v3314_v30 = vpop.xlane.xlu0 %3313 }
0x107d   : > { %v3317_v63 = vpop.xlane.xlu1 %3316 }
0x107e   : > { %v3308_v19 = vpop.xlane.xlu2 %3307 }
0x107f   : > { %4472 = vrcp.f32 %v3308_v19 }
0x1085   : > { %v4473_v17 = vpop.eup %4472 }
0x1086   : > { %v3330_v11 = vmul.f32 %v4473_v17, %v4461_v34  ;;  %v3399_v35 = vpop.permute.xlu2 %3398 }
0x1087   : > { %3422 = vmatpush.msrb.mxu3 %v3399_v35 }
0x1088   : > { %4030 = vmatmul.msk.f32.vlgmr.msrb.gmra.mxu3 %vm725_vm1, %v3330_v11  ;;  %v3505_v47 = vpop.permute.xlu0 %3504 }
0x1090   : > { %v3509_v62 = vpop.permute.xlu0 %3508 }
0x1098   : > { %v3511_v11 = vpop.permute.xlu0 %3510 }
0x10a7   : > { %v3311_v21 = vpop.xlane.xlu1 %3310 }
0x10a8   : > { %4474 = vrcp.f32 %v3311_v21 }
0x10a9   : > { %4476 = vrcp.f32 %v3314_v30 }
0x10aa   : > { %4478 = vrcp.f32 %v3317_v63 }
0x10ac   : > { %v3392_v41 = vpop.f32.mrf.mxu2 }
0x10ad   : > { %3538 = vrot.lane.b32.xlu2 %v3392_v41, %s4834_s6  ;;  %v3513_v41 = vpop.permute.xlu0 %3512 }
0x10ae   : > { %v4475_v54 = vpop.eup %4474 }
0x10af   : > { %v3331_v42 = vmul.f32 %v4475_v54, %v4467_v27  ;;  %v4477_v18 = vpop.eup %4476 }
0x10b0   : > { %v3332_v13 = vmul.f32 %v4477_v18, %v5836_v4  ;;  %v4479_v37 = vpop.eup %4478  ;;  %v1995_v4 = vld [vmem:[#allocation14 + $0x10] sm:$0xff] }
0x10b1   : > { %4031 = vmatmul.msk.f32.gmra.mxu3 %vm725_vm1, %v3331_v42  ;;  %v3333_v34 = vmul.f32 %v4479_v37, %v5840_v51  ;;  %v1994_v51 = vld [vmem:[#allocation14 + $0x8] sm:$0xff] }
0x10b4   : > { %v3395_v25 = vpop.f32.mrf.mxu2 }
0x10b5   : > { %3540 = vrot.lane.b32.xlu2 %v3395_v25, %s4834_s6  ;;  %v3515_v18 = vpop.permute.xlu0 %3514 }
0x10b6   : > { %v3360_v5 = vpop.f32.mrf.mxu1 }
0x10b7   : > { %3534 = vrot.lane.b32.xlu1 %v3360_v5, %s4834_s6 }
0x10be   : > { %v3363_v29 = vpop.f32.mrf.mxu1 }
0x10bf   : > { %v3431_v43 = vpop.permute.xlu1 %3430  ;;  %3536 = vrot.lane.b32.xlu1 %v3363_v29, %s4834_s6 }
0x10c0   : > { %3454 = vmatpush.msrb.mxu0 %v3431_v43 }
0x10c1   : > { %4032 = vmatmul.msk.f32.vlgmr.msrb.gmra.mxu0 %vm725_vm1, %v3332_v13 }
0x10c7   : > { %3506 = vrot.lane.b32.xlu1 %v5783_v3, %s4832_s2  ;;  %v1996_v3 = vld [vmem:[#allocation14 + $0x18] sm:$0xff]  ;;  %s3696_s2 = sshll.u32 %s5961_s19, 4  ;;  %s3697_s2 = int_to_ptr.vmem [resolvable:$true] %s3696_s2 }
0x10c8   : > { %3629 = vmatpush.msra.mxu1 %v1996_v3 }
0x10c9   : > { %4033 = vmatmul.msk.f32.gmra.mxu0 %vm725_vm1, %v3333_v34  ;;  %v3517_v34 = vpop.permute.xlu0 %3516 }
0x10ca   : > { %3630 = vmatpush.msra.mxu1 %v1995_v4 }
0x10cc   : > { %3631 = vmatpush.msra.mxu1 %v1994_v51 }
0x10cf   : > { %3476 = vrot.lane.b32.xlu1 %v5693_v48, %s4833_s12  ;;  %v1993_v48 = vld [vmem:[#allocation14] sm:$0xff] }
0x10d0   : > { %3632 = vmatpush.msra.mxu1 %v1993_v48 }
0x10d7   : > { %3478 = vrot.lane.b32.xlu1 %v5720_v14, %s4833_s12  ;;  %v3471_v14 = vpop.permute.xlu2 %3470 }
0x10df   : > { %3480 = vrot.lane.b32.xlu1 %v5724_v15, %s4833_s12  ;;  %v3503_v28 = vpop.permute.xlu2 %3502 }
0x10e7   : > { %3482 = vrot.lane.b32.xlu1 %v5747_v50, %s4833_s12  ;;  %v3473_v15 = vpop.permute.xlu2 %3472  ;;  %v3558_v50 = vsel %vm725_vm1, %v5652_v59, %v3471_v14 }
0x10e8   : > { %v3566_v20 = vsel %vm833_vm2, %v3558_v50, %v3503_v28  ;;  %v3559_v52 = vsel %vm725_vm1, %v5656_v1, %v3473_v15 }
0x10e9   : > { %v3567_v26 = vsel %vm833_vm2, %v3559_v52, %v3505_v47 }
0x10ef   : > { %3484 = vrot.lane.b32.xlu1 %v5751_v31, %s4833_s12  ;;  %v3475_v60 = vpop.permute.xlu2 %3474 }
0x1107   : > { %v3539_v1 = vpop.permute.xlu2 %3538 }
0x110b   : > { %v3424_v10 = vpop.f32.mrf.mxu3 }
0x110c   : > { %3542 = vrot.lane.b32.xlu2 %v3424_v10, %s4834_s6  ;;  %v4287_v10 = vld [vmem:[%s6060_s14] ss:$0 sm:$0xff] }
0x110f   : > { %v3541_v53 = vpop.permute.xlu2 %3540 }
0x1129   : > { %v3535_v31 = vpop.permute.xlu1 %3534 }
0x112a   : > { %v3574_v12 = vsel %vm1878_vm3, %v3566_v20, %v3535_v31 }
0x112b   : > { %v5904_v44 = vadd.f32 %v3574_v12, %v5449_v33  ;;  %v3560_v33 = vsel %vm725_vm1, %v5607_v56, %v3475_v60 }
0x112d   : > { %4034 = vmatmul.msk.f32.vlgmr.msra.gmra.mxu1 %vm622_vm0, %v5904_v44 }
0x1131   : > { %v3537_v57 = vpop.permute.xlu1 %3536 }
0x1132   : > { %v3575_v59 = vsel %vm1878_vm3, %v3567_v26, %v3537_v57 }
0x1133   : > { %v5913_v0 = vadd.f32 %v3575_v59, %v5465_v36 }
0x1134   : > { %v3427_v58 = vpop.f32.mrf.mxu3 }
0x1135   : > { %3544 = vrot.lane.b32.xlu2 %v3427_v58, %s4834_s6  ;;  %4035 = vmatmul.msk.f32.gmra.mxu1 %vm622_vm0, %v5913_v0 }
0x1139   : > { %v3507_v6 = vpop.permute.xlu1 %3506 }
0x113a   : > { %v3568_v46 = vsel %vm833_vm2, %v3560_v33, %v3507_v6 }
0x113b   : > { %v3576_v32 = vsel %vm1878_vm3, %v3568_v46, %v3539_v1 }
0x113c   : > { %v3584_v27 = vadd.f32 %v3576_v32, %v5472_v40 }
0x113e   : > { %v3456_v23 = vpop.f32.mrf.mxu0  ;;  %4036 = vmatmul.msk.f32.gmra.mxu1 %vm622_vm0, %v3584_v27 }
0x113f   : > { %3546 = vrot.lane.b32.xlu2 %v3456_v23, %s4834_s6 }
0x1141   : > { %v3477_v36 = vpop.permute.xlu1 %3476 }
0x1142   : > { %v3561_v8 = vsel %vm725_vm1, %v5611_v61, %v3477_v36 }
0x1143   : > { %v3569_v56 = vsel %vm833_vm2, %v3561_v8, %v3509_v62 }
0x1144   : > { %v3577_v16 = vsel %vm1878_vm3, %v3569_v56, %v3541_v53 }
0x1145   : > { %v3585_v38 = vadd.f32 %v3577_v16, %v5481_v39 }
0x1146   : > { %v3459_v19 = vpop.f32.mrf.mxu0 }
0x1147   : > { %3548 = vrot.lane.b32.xlu2 %v3459_v19, %s4834_s6  ;;  %4037 = vmatmul.msk.f32.gmra.mxu1 %vm622_vm0, %v3585_v38  ;;  %s3698_s6 = sshll.u32 %s3695_s28, 4  ;;  %s3699_s6 = int_to_ptr.hbm [resolvable:$true] %s3698_s6 }
0x1148   : > { %s4742_s4 = sshra.s32 %s3699_s6, 4  ;;  %s4743_s4 = int_to_ptr.hbm [resolvable:$true] %s4742_s4 }
0x1149   : > { %v3479_v40 = vpop.permute.xlu1 %3478  ;;  %s4744_s18 = scalar_lea.hbm %s4743_s4, 64  ;;  %p4749_p13 = scmp.lt.s32.totalorder %s4743_s4, %s6061_s25 }
0x114a   : > { %v3562_v17 = vsel %vm725_vm1, %v5629_v22, %v3479_v40  ;;  %p4745_p1 = scmp.ne.s32.totalorder %s4743_s4, %s4744_s18  ;;  %p4750_p7 = scmp.lt.s32.totalorder %s4748_s10, %s4744_s18 }
0x114b   : > { %v3570_v35 = vsel %vm833_vm2, %v3562_v17, %v3511_v11 }
0x114c   : > { %p4746_p3 = pnand %p4745_p1, %p5029_p0  ;;  %p4751_p8 = por %p4750_p7, %p4749_p13 }
0x114e   : > { %p4747_p5 = pneg %p4746_p3 }
0x1150   : > { %p4752_p9 = pnand %p4751_p8, %p4747_p5 }
0x1151   : > { %v3481_v39 = vpop.permute.xlu1 %3480 }
0x1152   : > { %v3563_v54 = vsel %vm725_vm1, %v5631_v9, %v3481_v39 }
0x1153   : > { %v3571_v42 = vsel %vm833_vm2, %v3563_v54, %v3513_v41 }
0x1159   : > { %v3483_v25 = vpop.permute.xlu1 %3482 }
0x1161   : > { %v3485_v9 = vpop.permute.xlu1 %3484 }
0x1166   : > { %v3543_v61 = vpop.permute.xlu2 %3542 }
0x1167   : > { %v3578_v63 = vsel %vm1878_vm3, %v3570_v35, %v3543_v61 }
0x1168   : > { %v3586_v21 = vadd.f32 %v3578_v63, %v5494_v45  ;;  %v3564_v45 = vsel %vm725_vm1, %v5658_v2, %v3483_v25 }
0x1169   : > { %v3572_v29 = vsel %vm833_vm2, %v3564_v45, %v3515_v18 }
0x116a   : > { %4038 = vmatmul.msk.f32.gmra.mxu1 %vm622_vm0, %v3586_v21 }
0x118f   : > { %v3545_v30 = vpop.permute.xlu2 %3544 }
0x1190   : > { %v3579_v22 = vsel %vm1878_vm3, %v3571_v42, %v3545_v30 }
0x1191   : > { %v3587_v5 = vadd.f32 %v3579_v22, %v5514_v49  ;;  %v3565_v49 = vsel %vm725_vm1, %v5660_v24, %v3485_v9 }
0x1192   : > { %v3573_v3 = vsel %vm833_vm2, %v3565_v49, %v3517_v34 }
0x1193   : > { %4039 = vmatmul.msk.f32.gmra.mxu1 %vm622_vm0, %v3587_v5 }
0x1199   : > { %v3547_v13 = vpop.permute.xlu2 %3546 }
0x119a   : > { %v3580_v43 = vsel %vm1878_vm3, %v3572_v29, %v3547_v13 }
0x119b   : > { %v3588_v37 = vadd.f32 %v3580_v43, %v5523_v55 }
0x119d   : > { %4040 = vmatmul.msk.f32.gmra.mxu1 %vm622_vm0, %v3588_v37 }
0x11a1   : > { %v3549_v4 = vpop.permute.xlu2 %3548 }
0x11a2   : > { %v3581_v2 = vsel %vm1878_vm3, %v3573_v3, %v3549_v4 }
0x11a3   : > { %v3589_v51 = vadd.f32 %v3581_v2, %v5536_v7 }
0x11a5   : > { %4041 = vmatmul.msk.f32.gmra.mxu1 %vm622_vm0, %v3589_v51 }
0x11aa   : > { %v3634_v55 = vpop.f32.mrf.mxu1 }
0x11ab   : > { %v3635_v48 = vadd.f32 %v4287_v10, %v3634_v55 }
0x11ad   : > { %v3658_v14 = vmax.f32 %v3635_v48, 0.0 }
0x11af   : > { %v3666_v28 = vadd.f32 %v3658_v14, %v5904_v44 }
0x11b1   : > { %3674 = vst.msk [vmem:[%s5961_s19] sm:$0xff] %vm622_vm0, %v3666_v28 }
0x11b2   : > { %v3637_v7 = vpop.f32.mrf.mxu1 }
0x11b3   : > { %v3638_v24 = vadd.f32 %v4287_v10, %v3637_v7 }
0x11b5   : > { %v3659_v15 = vmax.f32 %v3638_v24, 0.0 }
0x11b7   : > { %v3667_v50 = vadd.f32 %v3659_v15, %v5913_v0 }
0x11b9   : > { %3675 = vst.msk [vmem:[%s5961_s19 + $0x8] sm:$0xff] %vm622_vm0, %v3667_v50 }
0x11bb   : > { %v3640_v20 = vpop.f32.mrf.mxu1 }
0x11bc   : > { %v3641_v31 = vadd.f32 %v4287_v10, %v3640_v20 }
0x11be   : > { %v3660_v12 = vmax.f32 %v3641_v31, 0.0 }
0x11c0   : > { %v3668_v44 = vadd.f32 %v3660_v12, %v3584_v27 }
0x11c2   : > { %3676 = vst.msk [vmem:[%s5961_s19 + $0x10] sm:$0xff] %vm622_vm0, %v3668_v44 }
0x11c4   : > { %v3643_v52 = vpop.f32.mrf.mxu1 }
0x11c5   : > { %v3644_v47 = vadd.f32 %v4287_v10, %v3643_v52 }
0x11c7   : > { %v3661_v60 = vmax.f32 %v3644_v47, 0.0 }
0x11c9   : > { %v3669_v57 = vadd.f32 %v3661_v60, %v3585_v38 }
0x11cb   : > { %3677 = vst.msk [vmem:[%s5961_s19 + $0x18] sm:$0xff] %vm622_vm0, %v3669_v57 }
0x11e7   : > { %v3646_v26 = vpop.f32.mrf.mxu1 }
0x11e8   : > { %v3647_v59 = vadd.f32 %v4287_v10, %v3646_v26 }
0x11ea   : > { %v3662_v0 = vmax.f32 %v3647_v59, 0.0 }
0x11ec   : > { %v3670_v58 = vadd.f32 %v3662_v0, %v3586_v21 }
0x11ee   : > { %3678 = vst.msk [vmem:[%s5961_s19 + $0x20] sm:$0xff] %vm622_vm0, %v3670_v58 }
0x1210   : > { %v3649_v33 = vpop.f32.mrf.mxu1 }
0x1211   : > { %v3650_v1 = vadd.f32 %v4287_v10, %v3649_v33 }
0x1213   : > { %v3663_v6 = vmax.f32 %v3650_v1, 0.0 }
0x1215   : > { %v3671_v46 = vadd.f32 %v3663_v6, %v3587_v5 }
0x1217   : > { %3679 = vst.msk [vmem:[%s5961_s19 + $0x28] sm:$0xff] %vm622_vm0, %v3671_v46 }
0x121a   : > { %v3652_v32 = vpop.f32.mrf.mxu1 }
0x121b   : > { %v3653_v27 = vadd.f32 %v4287_v10, %v3652_v32 }
0x121d   : > { %v3664_v23 = vmax.f32 %v3653_v27, 0.0 }
0x121f   : > { %v3672_v36 = vadd.f32 %v3664_v23, %v3588_v37 }
0x1221   : > { %3680 = vst.msk [vmem:[%s5961_s19 + $0x30] sm:$0xff] %vm622_vm0, %v3672_v36 }
0x1222   : > { %v3655_v62 = vpop.f32.mrf.mxu1 }
0x1223   : > { %v3656_v8 = vadd.f32 %v4287_v10, %v3655_v62 }
0x1225   : > { %v3665_v53 = vmax.f32 %v3656_v8, 0.0 }
0x1227   : > { %v3673_v56 = vadd.f32 %v3665_v53, %v3589_v51 }
0x1229   : > { %3681 = vst.msk [vmem:[%s5961_s19 + $0x38] sm:$0xff] %vm622_vm0, %v3673_v56 }
0x122a   : > { %4755 = shalt.err (!%p4752_p9)
}
0x122b   : > { %s4835_s27 = smov 128  }
0x122c   : > { %4082 = dma.vmem_to_hbm [thread:$0]  (%p5029_p0), %s3697_s2, 1024, %s3699_s6, %s3683_s20, %s4835_s27, %s4835_s27, %s4833_s12  }
0x122d PF: > { %s3713_s19 = sand.u32 1, %s4802_s29   ;;  %p6062_p10 = scmp.ge.s32.totalorder %s4814_s16, 2 }
0x122e   : > { %s3714_s17 = scalar_lea.sflag [#allocation4], %s3713_s19 }
0x122f   : > { %p4111_p11 = pnand %p6062_p10, %p5035_p6 }
0x1231   : > { %p4112_p12 = pneg %p4111_p11 }
0x1233   : > { %4797 = dma.done.wait (%p4112_p12), %s3714_s17, 1024  }
0x1234   : > { %4799 = vsyncadd (%p4112_p12), %s3714_s17, 4294966272  ;;  %s6063_s0 = sld [smem:[#allocation24_spill]]  ;;  %p31_p2 = scmp.ge.s32.totalorder %s5005_s24, 4  }
0x1235   : > { %s6064_s29 = smov %s4806_s30  ;;  %s6065_s30 = smov %s4810_s15 }
0x1236   : > { %s6067_s16 = smov %s5005_s24  ;;  %33 = sbr.rel (!%p31_p2) target bundleno = 19 (0x13), region = 150 }
0x123a   : > { %s6066_s15 = smov %s6063_s0 }
0x123b   :  { %3720 = vsyncpa [#allocation3], 1 }
0x123c   :  { %3722 = vsyncpa [#allocation3 + $0x1], 1 }
0x123d   :  { %3723 = vsyncpa [#allocation6], 1 }
0x123e   :  { %3725 = vsyncpa [#allocation6 + $0x1], 1 }
0x123f   :  { %3726 = vsyncpa [#allocation9], 1 }
0x1240   :  { %3727 = vsyncpa [#allocation12], 1 }
0x1241   :  { %3728 = vsyncpa [#allocation15], 1 }
0x1242   :  { %3729 = vsyncpa [#allocation4], 1 }
0x1243   :  { %3731 = vsyncpa [#allocation4 + $0x1], 1 }

</bundles_post_ra>
